<compile_context>
chip_gen: v6e
topology: v6e:2x2x1
jax: 0.10.0
libtpu: 0.0.40
codegen_flags: <defaults>
</compile_context>

<pallas_src>
import jax
import jax.numpy as jnp
from jax.experimental import pallas as pl
from jax.experimental.pallas import tpu as pltpu


# ----------------------------------------------------------------------------
# Pallas kernel
# ----------------------------------------------------------------------------
def _make_kernel(Bb, T, D, H, num_layers, LANE, woff, boff):
    L2 = T // 2          # seq length after first MaxPool1d(2, 2)
    L4 = T // 4          # seq length after second MaxPool1d(2, 2)
    H4 = 4 * H
    f32 = jnp.float32
    bf16 = jnp.bfloat16

    def kernel(xcol_ref, w_ref, b_ref, out_ref):
        # static row/col slices into the packed weight / bias slabs (zero-cost views)
        def wseg(name, rows, cols):
            o = woff[name]
            return w_ref[o:o + rows, 0:cols]                  # bf16

        def bseg(name, cols):
            r = boff[name]
            return b_ref[r:r + 1, 0:cols]                     # f32, shape (1, cols)

        xcol = xcol_ref[...]                                  # (Bb*T, 3D) f32, im2col of x

        # ----------------------------- CNN branch -----------------------------
        # conv1 (k=3, padding folded into wrapper im2col) as ONE matmul + ReLU + MaxPool(2,2)
        y1 = jnp.dot(xcol.astype(bf16), wseg('c1w', 3 * D, 64),
                     preferred_element_type=f32) + bseg('c1b', 64)
        y1 = jnp.maximum(y1, 0.0)                             # (Bb*T, 64)
        y1 = jnp.max(y1.reshape(Bb * L2, 2, 64), axis=1).reshape(Bb, L2, 64)

        # conv2: in-kernel im2col (pad rows produced here), ONE (Bb*L2, 192) @ (192, 128)
        zrow = jnp.zeros((Bb, 1, 64), f32)
        y1p = jnp.concatenate([zrow, y1, zrow], axis=1)       # (Bb, L2+2, 64)
        x2 = jnp.concatenate(
            [y1p[:, 0:L2, :], y1p[:, 1:L2 + 1, :], y1p[:, 2:L2 + 2, :]],
            axis=-1).reshape(Bb * L2, 3 * 64)
        y2 = jnp.dot(x2.astype(bf16), wseg('c2w', 3 * 64, 128),
                     preferred_element_type=f32) + bseg('c2b', 128)
        y2 = jnp.maximum(y2, 0.0)
        y2 = jnp.max(y2.reshape(Bb * L4, 2, 128), axis=1)     # (Bb*L4, 128)

        # Flatten (torch NCL order folded into fccw layout in the wrapper) + LazyLinear + ReLU
        flat = y2.reshape(Bb, L4 * 128)
        out_cnn = jnp.maximum(
            jnp.dot(flat.astype(bf16), wseg('fccw', L4 * 128, 128),
                    preferred_element_type=f32) + bseg('fccb', 128), 0.0)   # (Bb, 128)

        # ----------------------------- LSTM branch -----------------------------
        # Hoisted layer-0 input projection; stored time-major (T, Bb, 4H) so the per-step
        # read is a leading-axis index (no per-step sublane shuffles).
        x0 = xcol[:, D:2 * D]                                 # centre im2col tap == x
        xz0 = (jnp.dot(x0.astype(bf16), wseg('wih0', D, H4),
                       preferred_element_type=f32) + bseg('lstm_b0', H4))
        xz0 = jnp.transpose(xz0.reshape(Bb, T, H4), (1, 0, 2))   # (T, Bb, 4H)

        whh0 = wseg('whh0', H, H4)
        wf = [wseg('wf%d' % l, 2 * H, H4) for l in range(1, num_layers)]
        bl = [bseg('lstm_b%d' % l, H4) for l in range(1, num_layers)]

        def cell(z, c_prev):
            # gate order [i, f, o, g]: one sigmoid over 3H lanes, one tanh over H lanes
            s = jax.nn.sigmoid(z[:, 0:3 * H])
            g = jnp.tanh(z[:, 3 * H:4 * H])
            c_new = s[:, H:2 * H] * c_prev + s[:, 0:H] * g
            h_new = s[:, 2 * H:3 * H] * jnp.tanh(c_new)
            return h_new, c_new

        hs = [jnp.zeros((Bb, H), f32) for _ in range(num_layers)]
        cs = [jnp.zeros((Bb, H), f32) for _ in range(num_layers)]

        # Diagonal (wavefront) schedule: at step s, layer l handles time t = s - l.
        # Every layer reads the PREVIOUS step's hidden states, so all per-step matmuls are
        # independent and the serial chain is T + num_layers - 1 steps, not num_layers * T.
        for s_idx in range(T + num_layers - 1):               # fully unrolled, static indexing
            h_prev = list(hs)
            c_prev = list(cs)
            for l in range(num_layers):
                t = s_idx - l
                if 0 <= t < T:
                    if l == 0:
                        z = xz0[t] + jnp.dot(h_prev[0].astype(bf16), whh0,
                                             preferred_element_type=f32)
                    else:
                        hin = jnp.concatenate([h_prev[l - 1], h_prev[l]], axis=-1)
                        z = jnp.dot(hin.astype(bf16), wf[l - 1],
                                    preferred_element_type=f32) + bl[l - 1]
                    hs[l], cs[l] = cell(z, c_prev[l])

        out_lstm = (jnp.dot(hs[-1].astype(bf16), wseg('fclw', H, 128),
                            preferred_element_type=f32) + bseg('fclb', 128))   # (Bb, 128)

        # -------- cat([cnn, lstm], dim=1) @ fc (weight split + lane-padded output) --------
        out = (jnp.dot(out_cnn.astype(bf16), wseg('fcw_cnn', 128, LANE),
                       preferred_element_type=f32)
               + jnp.dot(out_lstm.astype(bf16), wseg('fcw_lstm', 128, LANE),
                         preferred_element_type=f32)
               + bseg('fcb', LANE))
        out_ref[...] = out.astype(out_ref.dtype)

    return kernel


# ----------------------------------------------------------------------------
# Wrapper: weight re-layout / slab packing (plain JAX glue) + pallas_call
# ----------------------------------------------------------------------------
def _pack_rows(segments, lane, row_align, dtype):
    """Stack named 2-D arrays into one (N, lane) slab; returns (slab, row-offset dict)."""
    offs, parts, r = {}, [], 0
    for name, a in segments:
        a = jnp.asarray(a, jnp.float32)
        nr, nc = a.shape
        nrp = -(-nr // row_align) * row_align
        ap = jnp.zeros((nrp, lane), jnp.float32).at[:nr, :nc].set(a)
        offs[name] = r
        parts.append(ap)
        r += nrp
    slab = jnp.concatenate(parts, axis=0)
    pad = (-slab.shape[0]) % 8
    if pad:
        slab = jnp.pad(slab, ((0, pad), (0, 0)))
    return slab.astype(dtype), offs


def parallel_cnn_lstm_forward(x, params, hidden_size, num_layers, num_classes):
    B, T, D = x.shape
    H = hidden_size
    H4 = 4 * H
    L4 = T // 4
    LANE = max(128, H4)
    f32 = jnp.float32
    assert T % 4 == 0

    x = x.astype(f32)
    # conv1 "same" padding + im2col: row b*T + t = [x[b,t-1] | x[b,t] | x[b,t+1]]
    xpad = jnp.pad(x, ((0, 0), (1, 1), (0, 0)))
    xcol = jnp.concatenate([xpad[:, k:k + T, :] for k in range(3)],
                           axis=-1).reshape(B * T, 3 * D)

    def reorder_gates(w):   # last axis 4H in torch [i,f,g,o] order -> [i,f,o,g]
        return jnp.concatenate(
            [w[..., 0:2 * H], w[..., 3 * H:4 * H], w[..., 2 * H:3 * H]], axis=-1)

    # conv weights: torch (Cout, Cin, K) -> im2col layout (K*Cin, Cout)
    c1w = jnp.transpose(params['conv1_w'], (2, 1, 0)).reshape(3 * D, 64)
    c2w = jnp.transpose(params['conv2_w'], (2, 1, 0)).reshape(3 * 64, 128)
    # LazyLinear weight: torch (128, 128*L4) with in-index c*L4 + l  ->  (L4*128, 128)
    # matching the kernel's [b, l, c] flatten order (l*128 + c).
    fccw = jnp.transpose(params['fc_cnn_w'].reshape(128, 128, L4),
                         (2, 1, 0)).reshape(L4 * 128, 128)
    fclw = params['fc_lstm_w'].T                              # (H, 128)
    fcw_cnn = params['fc_w'][:, :128].T                       # (128, C)
    fcw_lstm = params['fc_w'][:, 128:].T                      # (128, C)

    lstm_w_segments, lstm_biases = [], []
    for l in range(num_layers):
        lp = params['lstm'][l]
        wih = reorder_gates(lp['w_ih'].T)                     # (in_dim, 4H), cols [i,f,o,g]
        whh = reorder_gates(lp['w_hh'].T)                     # (H, 4H)
        bias = reorder_gates((lp['b_ih'] + lp['b_hh']).reshape(1, H4))
        lstm_biases.append(('lstm_b%d' % l, bias))
        if l == 0:
            lstm_w_segments += [('wih0', wih), ('whh0', whh)]
        else:
            # fused recurrence weight for layer >= 1: rows [W_ih ; W_hh] -> (2H, 4H)
            lstm_w_segments.append(('wf%d' % l, jnp.concatenate([wih, whh], axis=0)))

    w_segments = ([('c1w', c1w), ('c2w', c2w), ('fccw', fccw)]
                  + lstm_w_segments
                  + [('fclw', fclw), ('fcw_cnn', fcw_cnn), ('fcw_lstm', fcw_lstm)])
    wslab, woff = _pack_rows(w_segments, lane=LANE, row_align=16, dtype=jnp.bfloat16)

    b_segments = ([('c1b', params['conv1_b'].reshape(1, 64)),
                   ('c2b', params['conv2_b'].reshape(1, 128)),
                   ('fccb', params['fc_cnn_b'].reshape(1, 128))]
                  + lstm_biases
                  + [('fclb', params['fc_lstm_b'].reshape(1, 128)),
                     ('fcb', params['fc_b'].reshape(1, num_classes))])
    bslab, boff = _pack_rows(b_segments, lane=LANE, row_align=1, dtype=f32)

    # Batch grid ("parallel" -> both TensorCores on v7x for real batch sizes).
    # TODO(synk): for large B, size block_B against v7x's 64 MiB VMEM (not v6e/v5e's 128 MiB)
    # and target >= 8 (ideally ~256) batch rows per MXU issue on v6e.
    block_B = B if (B <= 8 or B % 8 != 0) else 8
    grid = (B // block_B,)

    kernel = _make_kernel(block_B, T, D, H, num_layers, LANE, woff, boff)
    out = pl.pallas_call(
        kernel,
        out_shape=jax.ShapeDtypeStruct((B, LANE), f32),       # lane-padded output
        grid=grid,
        in_specs=[
            pl.BlockSpec((block_B * T, 3 * D), lambda b: (b, 0)),
            pl.BlockSpec(wslab.shape, lambda b: (0, 0)),
            pl.BlockSpec(bslab.shape, lambda b: (0, 0)),
        ],
        out_specs=pl.BlockSpec((block_B, LANE), lambda b: (b, 0)),
        compiler_params=pltpu.CompilerParams(dimension_semantics=("parallel",)),
    )(xcol, wslab, bslab)
    return out[:, :num_classes]


# ----------------------------------------------------------------------------
# Deterministic parameter init (torch layouts) + pure-JAX reference
# ----------------------------------------------------------------------------
def init_params(key, D, T, H, num_layers, C):
    L4 = T // 4
    keys = jax.random.split(key, 32)

    def rnd(k, shape, scale=0.1):
        return jax.random.normal(k, shape, jnp.float32) * scale

    p = {
        'conv1_w': rnd(keys[0], (64, D, 3)),
        'conv1_b': rnd(keys[1], (64,)),
        'conv2_w': rnd(keys[2], (128, 64, 3)),
        'conv2_b': rnd(keys[3], (128,)),
        'fc_cnn_w': rnd(keys[4], (128, 128 * L4)),            # LazyLinear: in = 128 * T//4
        'fc_cnn_b': rnd(keys[5], (128,)),
        'fc_lstm_w': rnd(keys[20], (128, H)),
        'fc_lstm_b': rnd(keys[21], (128,)),
        'fc_w': rnd(keys[22], (C, 256)),
        'fc_b': rnd(keys[23], (C,)),
    }
    lstm = []
    for l in range(num_layers):
        in_dim = D if l == 0 else H
        k0, k1, k2, k3 = jax.random.split(keys[6 + l], 4)
        lstm.append({'w_ih': rnd(k0, (4 * H, in_dim)),
                     'w_hh': rnd(k1, (4 * H, H)),
                     'b_ih': rnd(k2, (4 * H,)),
                     'b_hh': rnd(k3, (4 * H,))})
    p['lstm'] = lstm
    return p


def ref_forward(x, p, H, num_layers):
    """Pure-JAX replica of the PyTorch forward (torch weight layouts, torch gate order)."""
    B, T, D = x.shape
    hi = jax.lax.Precision.HIGHEST

    def conv_block(xbld, w, b):
        Ll = xbld.shape[1]
        xp = jnp.pad(xbld, ((0, 0), (1, 1), (0, 0)))
        y = b[None, None, :]
        for k in range(3):
            y = y + jnp.einsum('bld,od->blo', xp[:, k:k + Ll, :], w[:, :, k], precision=hi)
        y = jax.nn.relu(y)
        y = jnp.max(y.reshape(B, Ll // 2, 2, -1), axis=2)
        return y

    y = conv_block(x, p['conv1_w'], p['conv1_b'])
    y = conv_block(y, p['conv2_w'], p['conv2_b'])
    flat = jnp.transpose(y, (0, 2, 1)).reshape(B, -1)          # torch NCL flatten
    out_cnn = jax.nn.relu(jnp.dot(flat, p['fc_cnn_w'].T, precision=hi) + p['fc_cnn_b'])

    seq = x
    for l in range(num_layers):
        lp = p['lstm'][l]
        h = jnp.zeros((B, H), jnp.float32)
        c = jnp.zeros((B, H), jnp.float32)
        outs = []
        for t in range(T):
            z = (jnp.dot(seq[:, t, :], lp['w_ih'].T, precision=hi) + lp['b_ih']
                 + jnp.dot(h, lp['w_hh'].T, precision=hi) + lp['b_hh'])
            i, f, g, o = jnp.split(z, 4, axis=1)
            i, f, g, o = jax.nn.sigmoid(i), jax.nn.sigmoid(f), jnp.tanh(g), jax.nn.sigmoid(o)
            c = f * c + i * g
            h = o * jnp.tanh(c)
            outs.append(h)
        seq = jnp.stack(outs, axis=1)

    out_lstm = jnp.dot(seq[:, -1, :], p['fc_lstm_w'].T, precision=hi) + p['fc_lstm_b']
    out = jnp.concatenate([out_cnn, out_lstm], axis=1)
    out = jnp.dot(out, p['fc_w'].T, precision=hi) + p['fc_b']
    return out


# ----------------------------------------------------------------------------
if __name__ == "__main__":
    B, T, D = 2, 16, 8           # batch, seq_len, input_size
    H, NUM_LAYERS, C = 32, 2, 4  # hidden_size, num_layers, num_classes

    key = jax.random.PRNGKey(0)
    kx, kp = jax.random.split(key)
    x = jax.random.normal(kx, (B, T, D), jnp.float32)
    params = init_params(kp, D, T, H, NUM_LAYERS, C)

    out = jax.block_until_ready(parallel_cnn_lstm_forward(x, params, H, NUM_LAYERS, C))
    ref = jax.block_until_ready(ref_forward(x, params, H, NUM_LAYERS))

    assert out.shape == (B, C)
    # Tolerance covers bf16 MXU operands in the kernel vs HIGHEST-precision f32 reference.
    max_err = float(jnp.max(jnp.abs(out - ref)))
    assert max_err < 5e-2, f"mismatch vs reference: {max_err}"
    print("KERNEL_OK")
</pallas_src>

<mosaic_0001>
module attributes {stable_mosaic.version = 11 : i64} {
  func.func @kernel(%arg0: i32, %arg1: memref<32x24xf32, #tpu.memory_space<vmem>>, %arg2: memref<1136x128xbf16, #tpu.memory_space<vmem>>, %arg3: memref<8x128xf32, #tpu.memory_space<vmem>>, %arg4: memref<2x128xf32, #tpu.memory_space<vmem>>) attributes {dimension_semantics = [#tpu.dimension_semantics<parallel>], iteration_bounds = array<i64: 1>, scalar_prefetch = 0 : i64, scratch_operands = 0 : i64, tpu.core_type = #tpu.core_type<tc>, window_params = [{transform_indices = @transform_0, window_bounds = array<i64: 32, 24>}, {pipeline_mode = #tpu.pipeline_mode<synchronous>, transform_indices = @transform_1, window_bounds = array<i64: 1136, 128>}, {pipeline_mode = #tpu.pipeline_mode<synchronous>, transform_indices = @transform_2, window_bounds = array<i64: 8, 128>}, {transform_indices = @transform_3, window_bounds = array<i64: 2, 128>}]} {
    %c0 = arith.constant 0 : index
    %c0_0 = arith.constant 0 : index
    %0 = vector.load %arg1[%c0, %c0_0] : memref<32x24xf32, #tpu.memory_space<vmem>>, vector<32x24xf32>
    %1 = arith.truncf %0 : vector<32x24xf32> to vector<32x24xbf16>
    %c0_1 = arith.constant 0 : index
    %c0_2 = arith.constant 0 : index
    %2 = vector.load %arg2[%c0_1, %c0_2] : memref<1136x128xbf16, #tpu.memory_space<vmem>>, vector<24x64xbf16>
    %cst = arith.constant dense<0.000000e+00> : vector<32x64xf32>
    %3 = tpu.matmul %1, %2, %cst {dimension_numbers = #tpu.dot_dimension_numbers<[1], [0], [0], [1], [0, 0, 1, 1], [], []>} : vector<32x24xbf16>, vector<24x64xbf16>, vector<32x64xf32> -> vector<32x64xf32>
    %c0_3 = arith.constant 0 : index
    %c0_4 = arith.constant 0 : index
    %4 = vector.load %arg3[%c0_3, %c0_4] : memref<8x128xf32, #tpu.memory_space<vmem>>, vector<1x64xf32>
    %5 = vector.broadcast %4 : vector<1x64xf32> to vector<32x64xf32>
    %6 = arith.addf %3, %5 : vector<32x64xf32>
    %cst_5 = arith.constant 0.000000e+00 : f32
    %7 = vector.broadcast %cst_5 : f32 to vector<32x64xf32>
    %8 = arith.maximumf %6, %7 : vector<32x64xf32>
    %9 = vector.shape_cast %8 : vector<32x64xf32> to vector<16x2x64xf32>
    %cst_6 = arith.constant dense<0xFF800000> : vector<16x64xf32>
    %10 = vector.multi_reduction <maximumf>, %9, %cst_6 [1] : vector<16x2x64xf32> to vector<16x64xf32>
    %11 = vector.shape_cast %10 : vector<16x64xf32> to vector<2x8x64xf32>
    %cst_7 = arith.constant 0.000000e+00 : f32
    %12 = vector.broadcast %cst_7 : f32 to vector<2x1x64xf32>
    %13 = tpu.concatenate %12, %11, %12 in 1 : vector<2x1x64xf32>, vector<2x8x64xf32>, vector<2x1x64xf32> -> vector<2x10x64xf32>
    %14 = vector.extract_strided_slice %13 {offsets = [0, 0, 0], sizes = [2, 8, 64], strides = [1, 1, 1]} : vector<2x10x64xf32> to vector<2x8x64xf32>
    %15 = vector.extract_strided_slice %13 {offsets = [0, 1, 0], sizes = [2, 8, 64], strides = [1, 1, 1]} : vector<2x10x64xf32> to vector<2x8x64xf32>
    %16 = vector.extract_strided_slice %13 {offsets = [0, 2, 0], sizes = [2, 8, 64], strides = [1, 1, 1]} : vector<2x10x64xf32> to vector<2x8x64xf32>
    %17 = tpu.concatenate %14, %15, %16 in 2 : vector<2x8x64xf32>, vector<2x8x64xf32>, vector<2x8x64xf32> -> vector<2x8x192xf32>
    %18 = vector.shape_cast %17 : vector<2x8x192xf32> to vector<16x192xf32>
    %19 = arith.truncf %18 : vector<16x192xf32> to vector<16x192xbf16>
    %c32 = arith.constant 32 : index
    %c0_8 = arith.constant 0 : index
    %20 = vector.load %arg2[%c32, %c0_8] : memref<1136x128xbf16, #tpu.memory_space<vmem>>, vector<192x128xbf16>
    %cst_9 = arith.constant dense<0.000000e+00> : vector<16x128xf32>
    %21 = tpu.matmul %19, %20, %cst_9 {dimension_numbers = #tpu.dot_dimension_numbers<[1], [0], [0], [1], [0, 0, 1, 1], [], []>} : vector<16x192xbf16>, vector<192x128xbf16>, vector<16x128xf32> -> vector<16x128xf32>
    %c1 = arith.constant 1 : index
    %c0_10 = arith.constant 0 : index
    %22 = vector.load %arg3[%c1, %c0_10] : memref<8x128xf32, #tpu.memory_space<vmem>>, vector<1x128xf32>
    %23 = vector.broadcast %22 : vector<1x128xf32> to vector<16x128xf32>
    %24 = arith.addf %21, %23 : vector<16x128xf32>
    %cst_11 = arith.constant 0.000000e+00 : f32
    %25 = vector.broadcast %cst_11 : f32 to vector<16x128xf32>
    %26 = arith.maximumf %24, %25 : vector<16x128xf32>
    %27 = vector.shape_cast %26 : vector<16x128xf32> to vector<8x2x128xf32>
    %cst_12 = arith.constant dense<0xFF800000> : vector<8x128xf32>
    %28 = vector.multi_reduction <maximumf>, %27, %cst_12 [1] : vector<8x2x128xf32> to vector<8x128xf32>
    %29 = vector.shape_cast %28 : vector<8x128xf32> to vector<2x512xf32>
    %30 = arith.truncf %29 : vector<2x512xf32> to vector<2x512xbf16>
    %c224 = arith.constant 224 : index
    %c0_13 = arith.constant 0 : index
    %31 = vector.load %arg2[%c224, %c0_13] : memref<1136x128xbf16, #tpu.memory_space<vmem>>, vector<512x128xbf16>
    %cst_14 = arith.constant dense<0.000000e+00> : vector<2x128xf32>
    %32 = tpu.matmul %30, %31, %cst_14 {dimension_numbers = #tpu.dot_dimension_numbers<[1], [0], [0], [1], [0, 0, 1, 1], [], []>} : vector<2x512xbf16>, vector<512x128xbf16>, vector<2x128xf32> -> vector<2x128xf32>
    %c2 = arith.constant 2 : index
    %c0_15 = arith.constant 0 : index
    %33 = vector.load %arg3[%c2, %c0_15] : memref<8x128xf32, #tpu.memory_space<vmem>>, vector<1x128xf32>
    %34 = vector.broadcast %33 : vector<1x128xf32> to vector<2x128xf32>
    %35 = arith.addf %32, %34 : vector<2x128xf32>
    %cst_16 = arith.constant 0.000000e+00 : f32
    %36 = vector.broadcast %cst_16 : f32 to vector<2x128xf32>
    %37 = arith.maximumf %35, %36 : vector<2x128xf32>
    %38 = vector.extract_strided_slice %0 {offsets = [0, 8], sizes = [32, 8], strides = [1, 1]} : vector<32x24xf32> to vector<32x8xf32>
    %39 = arith.truncf %38 : vector<32x8xf32> to vector<32x8xbf16>
    %c736 = arith.constant 736 : index
    %c0_17 = arith.constant 0 : index
    %40 = vector.load %arg2[%c736, %c0_17] : memref<1136x128xbf16, #tpu.memory_space<vmem>>, vector<8x128xbf16>
    %cst_18 = arith.constant dense<0.000000e+00> : vector<32x128xf32>
    %41 = tpu.matmul %39, %40, %cst_18 {dimension_numbers = #tpu.dot_dimension_numbers<[1], [0], [0], [1], [0, 0, 1, 1], [], []>} : vector<32x8xbf16>, vector<8x128xbf16>, vector<32x128xf32> -> vector<32x128xf32>
    %c3 = arith.constant 3 : index
    %c0_19 = arith.constant 0 : index
    %42 = vector.load %arg3[%c3, %c0_19] : memref<8x128xf32, #tpu.memory_space<vmem>>, vector<1x128xf32>
    %43 = vector.broadcast %42 : vector<1x128xf32> to vector<32x128xf32>
    %44 = arith.addf %41, %43 : vector<32x128xf32>
    %45 = vector.shape_cast %44 : vector<32x128xf32> to vector<2x16x128xf32>
    %46 = tpu.transpose %45, [1, 0, 2] : vector<2x16x128xf32> -> vector<16x2x128xf32>
    %c752 = arith.constant 752 : index
    %c0_20 = arith.constant 0 : index
    %47 = vector.load %arg2[%c752, %c0_20] : memref<1136x128xbf16, #tpu.memory_space<vmem>>, vector<32x128xbf16>
    %c784 = arith.constant 784 : index
    %c0_21 = arith.constant 0 : index
    %48 = vector.load %arg2[%c784, %c0_21] : memref<1136x128xbf16, #tpu.memory_space<vmem>>, vector<64x128xbf16>
    %c4 = arith.constant 4 : index
    %c0_22 = arith.constant 0 : index
    %49 = vector.load %arg3[%c4, %c0_22] : memref<8x128xf32, #tpu.memory_space<vmem>>, vector<1x128xf32>
    %cst_23 = arith.constant 0.000000e+00 : f32
    %50 = vector.broadcast %cst_23 : f32 to vector<2x32xf32>
    %cst_24 = arith.constant 0.000000e+00 : f32
    %51 = vector.broadcast %cst_24 : f32 to vector<2x32xf32>
    %cst_25 = arith.constant 0.000000e+00 : f32
    %52 = vector.broadcast %cst_25 : f32 to vector<2x32xf32>
    %cst_26 = arith.constant 0.000000e+00 : f32
    %53 = vector.broadcast %cst_26 : f32 to vector<2x32xf32>
    %54 = vector.extract_strided_slice %46 {offsets = [0, 0, 0], sizes = [1, 2, 128], strides = [1, 1, 1]} : vector<16x2x128xf32> to vector<1x2x128xf32>
    %55 = vector.shape_cast %54 : vector<1x2x128xf32> to vector<2x128xf32>
    %56 = arith.truncf %50 : vector<2x32xf32> to vector<2x32xbf16>
    %cst_27 = arith.constant dense<0.000000e+00> : vector<2x128xf32>
    %57 = tpu.matmul %56, %47, %cst_27 {dimension_numbers = #tpu.dot_dimension_numbers<[1], [0], [0], [1], [0, 0, 1, 1], [], []>} : vector<2x32xbf16>, vector<32x128xbf16>, vector<2x128xf32> -> vector<2x128xf32>
    %58 = arith.addf %55, %57 : vector<2x128xf32>
    %59 = vector.extract_strided_slice %58 {offsets = [0, 0], sizes = [2, 96], strides = [1, 1]} : vector<2x128xf32> to vector<2x96xf32>
    %60 = arith.negf %59 : vector<2x96xf32>
    %61 = math.exp %60 : vector<2x96xf32>
    %cst_28 = arith.constant 1.000000e+00 : f32
    %62 = vector.broadcast %cst_28 : f32 to vector<2x96xf32>
    %63 = arith.addf %62, %61 : vector<2x96xf32>
    %64 = arith.divf %62, %63 : vector<2x96xf32>
    %65 = vector.extract_strided_slice %58 {offsets = [0, 96], sizes = [2, 32], strides = [1, 1]} : vector<2x128xf32> to vector<2x32xf32>
    %66 = math.tanh %65 : vector<2x32xf32>
    %67 = vector.extract_strided_slice %64 {offsets = [0, 32], sizes = [2, 32], strides = [1, 1]} : vector<2x96xf32> to vector<2x32xf32>
    %68 = arith.mulf %67, %52 : vector<2x32xf32>
    %69 = vector.extract_strided_slice %64 {offsets = [0, 0], sizes = [2, 32], strides = [1, 1]} : vector<2x96xf32> to vector<2x32xf32>
    %70 = arith.mulf %69, %66 : vector<2x32xf32>
    %71 = arith.addf %68, %70 : vector<2x32xf32>
    %72 = vector.extract_strided_slice %64 {offsets = [0, 64], sizes = [2, 32], strides = [1, 1]} : vector<2x96xf32> to vector<2x32xf32>
    %73 = math.tanh %71 : vector<2x32xf32>
    %74 = arith.mulf %72, %73 : vector<2x32xf32>
    %75 = vector.extract_strided_slice %46 {offsets = [1, 0, 0], sizes = [1, 2, 128], strides = [1, 1, 1]} : vector<16x2x128xf32> to vector<1x2x128xf32>
    %76 = vector.shape_cast %75 : vector<1x2x128xf32> to vector<2x128xf32>
    %77 = arith.truncf %74 : vector<2x32xf32> to vector<2x32xbf16>
    %cst_29 = arith.constant dense<0.000000e+00> : vector<2x128xf32>
    %78 = tpu.matmul %77, %47, %cst_29 {dimension_numbers = #tpu.dot_dimension_numbers<[1], [0], [0], [1], [0, 0, 1, 1], [], []>} : vector<2x32xbf16>, vector<32x128xbf16>, vector<2x128xf32> -> vector<2x128xf32>
    %79 = arith.addf %76, %78 : vector<2x128xf32>
    %80 = vector.extract_strided_slice %79 {offsets = [0, 0], sizes = [2, 96], strides = [1, 1]} : vector<2x128xf32> to vector<2x96xf32>
    %81 = arith.negf %80 : vector<2x96xf32>
    %82 = math.exp %81 : vector<2x96xf32>
    %cst_30 = arith.constant 1.000000e+00 : f32
    %83 = vector.broadcast %cst_30 : f32 to vector<2x96xf32>
    %84 = arith.addf %83, %82 : vector<2x96xf32>
    %85 = arith.divf %83, %84 : vector<2x96xf32>
    %86 = vector.extract_strided_slice %79 {offsets = [0, 96], sizes = [2, 32], strides = [1, 1]} : vector<2x128xf32> to vector<2x32xf32>
    %87 = math.tanh %86 : vector<2x32xf32>
    %88 = vector.extract_strided_slice %85 {offsets = [0, 32], sizes = [2, 32], strides = [1, 1]} : vector<2x96xf32> to vector<2x32xf32>
    %89 = arith.mulf %88, %71 : vector<2x32xf32>
    %90 = vector.extract_strided_slice %85 {offsets = [0, 0], sizes = [2, 32], strides = [1, 1]} : vector<2x96xf32> to vector<2x32xf32>
    %91 = arith.mulf %90, %87 : vector<2x32xf32>
    %92 = arith.addf %89, %91 : vector<2x32xf32>
    %93 = vector.extract_strided_slice %85 {offsets = [0, 64], sizes = [2, 32], strides = [1, 1]} : vector<2x96xf32> to vector<2x32xf32>
    %94 = math.tanh %92 : vector<2x32xf32>
    %95 = arith.mulf %93, %94 : vector<2x32xf32>
    %96 = tpu.concatenate %74, %51 in 1 : vector<2x32xf32>, vector<2x32xf32> -> vector<2x64xf32>
    %97 = arith.truncf %96 : vector<2x64xf32> to vector<2x64xbf16>
    %cst_31 = arith.constant dense<0.000000e+00> : vector<2x128xf32>
    %98 = tpu.matmul %97, %48, %cst_31 {dimension_numbers = #tpu.dot_dimension_numbers<[1], [0], [0], [1], [0, 0, 1, 1], [], []>} : vector<2x64xbf16>, vector<64x128xbf16>, vector<2x128xf32> -> vector<2x128xf32>
    %99 = vector.broadcast %49 : vector<1x128xf32> to vector<2x128xf32>
    %100 = arith.addf %98, %99 : vector<2x128xf32>
    %101 = vector.extract_strided_slice %100 {offsets = [0, 0], sizes = [2, 96], strides = [1, 1]} : vector<2x128xf32> to vector<2x96xf32>
    %102 = arith.negf %101 : vector<2x96xf32>
    %103 = math.exp %102 : vector<2x96xf32>
    %cst_32 = arith.constant 1.000000e+00 : f32
    %104 = vector.broadcast %cst_32 : f32 to vector<2x96xf32>
    %105 = arith.addf %104, %103 : vector<2x96xf32>
    %106 = arith.divf %104, %105 : vector<2x96xf32>
    %107 = vector.extract_strided_slice %100 {offsets = [0, 96], sizes = [2, 32], strides = [1, 1]} : vector<2x128xf32> to vector<2x32xf32>
    %108 = math.tanh %107 : vector<2x32xf32>
    %109 = vector.extract_strided_slice %106 {offsets = [0, 32], sizes = [2, 32], strides = [1, 1]} : vector<2x96xf32> to vector<2x32xf32>
    %110 = arith.mulf %109, %53 : vector<2x32xf32>
    %111 = vector.extract_strided_slice %106 {offsets = [0, 0], sizes = [2, 32], strides = [1, 1]} : vector<2x96xf32> to vector<2x32xf32>
    %112 = arith.mulf %111, %108 : vector<2x32xf32>
    %113 = arith.addf %110, %112 : vector<2x32xf32>
    %114 = vector.extract_strided_slice %106 {offsets = [0, 64], sizes = [2, 32], strides = [1, 1]} : vector<2x96xf32> to vector<2x32xf32>
    %115 = math.tanh %113 : vector<2x32xf32>
    %116 = arith.mulf %114, %115 : vector<2x32xf32>
    %117 = vector.extract_strided_slice %46 {offsets = [2, 0, 0], sizes = [1, 2, 128], strides = [1, 1, 1]} : vector<16x2x128xf32> to vector<1x2x128xf32>
    %118 = vector.shape_cast %117 : vector<1x2x128xf32> to vector<2x128xf32>
    %119 = arith.truncf %95 : vector<2x32xf32> to vector<2x32xbf16>
    %cst_33 = arith.constant dense<0.000000e+00> : vector<2x128xf32>
    %120 = tpu.matmul %119, %47, %cst_33 {dimension_numbers = #tpu.dot_dimension_numbers<[1], [0], [0], [1], [0, 0, 1, 1], [], []>} : vector<2x32xbf16>, vector<32x128xbf16>, vector<2x128xf32> -> vector<2x128xf32>
    %121 = arith.addf %118, %120 : vector<2x128xf32>
    %122 = vector.extract_strided_slice %121 {offsets = [0, 0], sizes = [2, 96], strides = [1, 1]} : vector<2x128xf32> to vector<2x96xf32>
    %123 = arith.negf %122 : vector<2x96xf32>
    %124 = math.exp %123 : vector<2x96xf32>
    %cst_34 = arith.constant 1.000000e+00 : f32
    %125 = vector.broadcast %cst_34 : f32 to vector<2x96xf32>
    %126 = arith.addf %125, %124 : vector<2x96xf32>
    %127 = arith.divf %125, %126 : vector<2x96xf32>
    %128 = vector.extract_strided_slice %121 {offsets = [0, 96], sizes = [2, 32], strides = [1, 1]} : vector<2x128xf32> to vector<2x32xf32>
    %129 = math.tanh %128 : vector<2x32xf32>
    %130 = vector.extract_strided_slice %127 {offsets = [0, 32], sizes = [2, 32], strides = [1, 1]} : vector<2x96xf32> to vector<2x32xf32>
    %131 = arith.mulf %130, %92 : vector<2x32xf32>
    %132 = vector.extract_strided_slice %127 {offsets = [0, 0], sizes = [2, 32], strides = [1, 1]} : vector<2x96xf32> to vector<2x32xf32>
    %133 = arith.mulf %132, %129 : vector<2x32xf32>
    %134 = arith.addf %131, %133 : vector<2x32xf32>
    %135 = vector.extract_strided_slice %127 {offsets = [0, 64], sizes = [2, 32], strides = [1, 1]} : vector<2x96xf32> to vector<2x32xf32>
    %136 = math.tanh %134 : vector<2x32xf32>
    %137 = arith.mulf %135, %136 : vector<2x32xf32>
    %138 = tpu.concatenate %95, %116 in 1 : vector<2x32xf32>, vector<2x32xf32> -> vector<2x64xf32>
    %139 = arith.truncf %138 : vector<2x64xf32> to vector<2x64xbf16>
    %cst_35 = arith.constant dense<0.000000e+00> : vector<2x128xf32>
    %140 = tpu.matmul %139, %48, %cst_35 {dimension_numbers = #tpu.dot_dimension_numbers<[1], [0], [0], [1], [0, 0, 1, 1], [], []>} : vector<2x64xbf16>, vector<64x128xbf16>, vector<2x128xf32> -> vector<2x128xf32>
    %141 = vector.broadcast %49 : vector<1x128xf32> to vector<2x128xf32>
    %142 = arith.addf %140, %141 : vector<2x128xf32>
    %143 = vector.extract_strided_slice %142 {offsets = [0, 0], sizes = [2, 96], strides = [1, 1]} : vector<2x128xf32> to vector<2x96xf32>
    %144 = arith.negf %143 : vector<2x96xf32>
    %145 = math.exp %144 : vector<2x96xf32>
    %cst_36 = arith.constant 1.000000e+00 : f32
    %146 = vector.broadcast %cst_36 : f32 to vector<2x96xf32>
    %147 = arith.addf %146, %145 : vector<2x96xf32>
    %148 = arith.divf %146, %147 : vector<2x96xf32>
    %149 = vector.extract_strided_slice %142 {offsets = [0, 96], sizes = [2, 32], strides = [1, 1]} : vector<2x128xf32> to vector<2x32xf32>
    %150 = math.tanh %149 : vector<2x32xf32>
    %151 = vector.extract_strided_slice %148 {offsets = [0, 32], sizes = [2, 32], strides = [1, 1]} : vector<2x96xf32> to vector<2x32xf32>
    %152 = arith.mulf %151, %113 : vector<2x32xf32>
    %153 = vector.extract_strided_slice %148 {offsets = [0, 0], sizes = [2, 32], strides = [1, 1]} : vector<2x96xf32> to vector<2x32xf32>
    %154 = arith.mulf %153, %150 : vector<2x32xf32>
    %155 = arith.addf %152, %154 : vector<2x32xf32>
    %156 = vector.extract_strided_slice %148 {offsets = [0, 64], sizes = [2, 32], strides = [1, 1]} : vector<2x96xf32> to vector<2x32xf32>
    %157 = math.tanh %155 : vector<2x32xf32>
    %158 = arith.mulf %156, %157 : vector<2x32xf32>
    %159 = vector.extract_strided_slice %46 {offsets = [3, 0, 0], sizes = [1, 2, 128], strides = [1, 1, 1]} : vector<16x2x128xf32> to vector<1x2x128xf32>
    %160 = vector.shape_cast %159 : vector<1x2x128xf32> to vector<2x128xf32>
    %161 = arith.truncf %137 : vector<2x32xf32> to vector<2x32xbf16>
    %cst_37 = arith.constant dense<0.000000e+00> : vector<2x128xf32>
    %162 = tpu.matmul %161, %47, %cst_37 {dimension_numbers = #tpu.dot_dimension_numbers<[1], [0], [0], [1], [0, 0, 1, 1], [], []>} : vector<2x32xbf16>, vector<32x128xbf16>, vector<2x128xf32> -> vector<2x128xf32>
    %163 = arith.addf %160, %162 : vector<2x128xf32>
    %164 = vector.extract_strided_slice %163 {offsets = [0, 0], sizes = [2, 96], strides = [1, 1]} : vector<2x128xf32> to vector<2x96xf32>
    %165 = arith.negf %164 : vector<2x96xf32>
    %166 = math.exp %165 : vector<2x96xf32>
    %cst_38 = arith.constant 1.000000e+00 : f32
    %167 = vector.broadcast %cst_38 : f32 to vector<2x96xf32>
    %168 = arith.addf %167, %166 : vector<2x96xf32>
    %169 = arith.divf %167, %168 : vector<2x96xf32>
    %170 = vector.extract_strided_slice %163 {offsets = [0, 96], sizes = [2, 32], strides = [1, 1]} : vector<2x128xf32> to vector<2x32xf32>
    %171 = math.tanh %170 : vector<2x32xf32>
    %172 = vector.extract_strided_slice %169 {offsets = [0, 32], sizes = [2, 32], strides = [1, 1]} : vector<2x96xf32> to vector<2x32xf32>
    %173 = arith.mulf %172, %134 : vector<2x32xf32>
    %174 = vector.extract_strided_slice %169 {offsets = [0, 0], sizes = [2, 32], strides = [1, 1]} : vector<2x96xf32> to vector<2x32xf32>
    %175 = arith.mulf %174, %171 : vector<2x32xf32>
    %176 = arith.addf %173, %175 : vector<2x32xf32>
    %177 = vector.extract_strided_slice %169 {offsets = [0, 64], sizes = [2, 32], strides = [1, 1]} : vector<2x96xf32> to vector<2x32xf32>
    %178 = math.tanh %176 : vector<2x32xf32>
    %179 = arith.mulf %177, %178 : vector<2x32xf32>
    %180 = tpu.concatenate %137, %158 in 1 : vector<2x32xf32>, vector<2x32xf32> -> vector<2x64xf32>
    %181 = arith.truncf %180 : vector<2x64xf32> to vector<2x64xbf16>
    %cst_39 = arith.constant dense<0.000000e+00> : vector<2x128xf32>
    %182 = tpu.matmul %181, %48, %cst_39 {dimension_numbers = #tpu.dot_dimension_numbers<[1], [0], [0], [1], [0, 0, 1, 1], [], []>} : vector<2x64xbf16>, vector<64x128xbf16>, vector<2x128xf32> -> vector<2x128xf32>
    %183 = vector.broadcast %49 : vector<1x128xf32> to vector<2x128xf32>
    %184 = arith.addf %182, %183 : vector<2x128xf32>
    %185 = vector.extract_strided_slice %184 {offsets = [0, 0], sizes = [2, 96], strides = [1, 1]} : vector<2x128xf32> to vector<2x96xf32>
    %186 = arith.negf %185 : vector<2x96xf32>
    %187 = math.exp %186 : vector<2x96xf32>
    %cst_40 = arith.constant 1.000000e+00 : f32
    %188 = vector.broadcast %cst_40 : f32 to vector<2x96xf32>
    %189 = arith.addf %188, %187 : vector<2x96xf32>
    %190 = arith.divf %188, %189 : vector<2x96xf32>
    %191 = vector.extract_strided_slice %184 {offsets = [0, 96], sizes = [2, 32], strides = [1, 1]} : vector<2x128xf32> to vector<2x32xf32>
    %192 = math.tanh %191 : vector<2x32xf32>
    %193 = vector.extract_strided_slice %190 {offsets = [0, 32], sizes = [2, 32], strides = [1, 1]} : vector<2x96xf32> to vector<2x32xf32>
    %194 = arith.mulf %193, %155 : vector<2x32xf32>
    %195 = vector.extract_strided_slice %190 {offsets = [0, 0], sizes = [2, 32], strides = [1, 1]} : vector<2x96xf32> to vector<2x32xf32>
    %196 = arith.mulf %195, %192 : vector<2x32xf32>
    %197 = arith.addf %194, %196 : vector<2x32xf32>
    %198 = vector.extract_strided_slice %190 {offsets = [0, 64], sizes = [2, 32], strides = [1, 1]} : vector<2x96xf32> to vector<2x32xf32>
    %199 = math.tanh %197 : vector<2x32xf32>
    %200 = arith.mulf %198, %199 : vector<2x32xf32>
    %201 = vector.extract_strided_slice %46 {offsets = [4, 0, 0], sizes = [1, 2, 128], strides = [1, 1, 1]} : vector<16x2x128xf32> to vector<1x2x128xf32>
    %202 = vector.shape_cast %201 : vector<1x2x128xf32> to vector<2x128xf32>
    %203 = arith.truncf %179 : vector<2x32xf32> to vector<2x32xbf16>
    %cst_41 = arith.constant dense<0.000000e+00> : vector<2x128xf32>
    %204 = tpu.matmul %203, %47, %cst_41 {dimension_numbers = #tpu.dot_dimension_numbers<[1], [0], [0], [1], [0, 0, 1, 1], [], []>} : vector<2x32xbf16>, vector<32x128xbf16>, vector<2x128xf32> -> vector<2x128xf32>
    %205 = arith.addf %202, %204 : vector<2x128xf32>
    %206 = vector.extract_strided_slice %205 {offsets = [0, 0], sizes = [2, 96], strides = [1, 1]} : vector<2x128xf32> to vector<2x96xf32>
    %207 = arith.negf %206 : vector<2x96xf32>
    %208 = math.exp %207 : vector<2x96xf32>
    %cst_42 = arith.constant 1.000000e+00 : f32
    %209 = vector.broadcast %cst_42 : f32 to vector<2x96xf32>
    %210 = arith.addf %209, %208 : vector<2x96xf32>
    %211 = arith.divf %209, %210 : vector<2x96xf32>
    %212 = vector.extract_strided_slice %205 {offsets = [0, 96], sizes = [2, 32], strides = [1, 1]} : vector<2x128xf32> to vector<2x32xf32>
    %213 = math.tanh %212 : vector<2x32xf32>
    %214 = vector.extract_strided_slice %211 {offsets = [0, 32], sizes = [2, 32], strides = [1, 1]} : vector<2x96xf32> to vector<2x32xf32>
    %215 = arith.mulf %214, %176 : vector<2x32xf32>
    %216 = vector.extract_strided_slice %211 {offsets = [0, 0], sizes = [2, 32], strides = [1, 1]} : vector<2x96xf32> to vector<2x32xf32>
    %217 = arith.mulf %216, %213 : vector<2x32xf32>
    %218 = arith.addf %215, %217 : vector<2x32xf32>
    %219 = vector.extract_strided_slice %211 {offsets = [0, 64], sizes = [2, 32], strides = [1, 1]} : vector<2x96xf32> to vector<2x32xf32>
    %220 = math.tanh %218 : vector<2x32xf32>
    %221 = arith.mulf %219, %220 : vector<2x32xf32>
    %222 = tpu.concatenate %179, %200 in 1 : vector<2x32xf32>, vector<2x32xf32> -> vector<2x64xf32>
    %223 = arith.truncf %222 : vector<2x64xf32> to vector<2x64xbf16>
    %cst_43 = arith.constant dense<0.000000e+00> : vector<2x128xf32>
    %224 = tpu.matmul %223, %48, %cst_43 {dimension_numbers = #tpu.dot_dimension_numbers<[1], [0], [0], [1], [0, 0, 1, 1], [], []>} : vector<2x64xbf16>, vector<64x128xbf16>, vector<2x128xf32> -> vector<2x128xf32>
    %225 = vector.broadcast %49 : vector<1x128xf32> to vector<2x128xf32>
    %226 = arith.addf %224, %225 : vector<2x128xf32>
    %227 = vector.extract_strided_slice %226 {offsets = [0, 0], sizes = [2, 96], strides = [1, 1]} : vector<2x128xf32> to vector<2x96xf32>
    %228 = arith.negf %227 : vector<2x96xf32>
    %229 = math.exp %228 : vector<2x96xf32>
    %cst_44 = arith.constant 1.000000e+00 : f32
    %230 = vector.broadcast %cst_44 : f32 to vector<2x96xf32>
    %231 = arith.addf %230, %229 : vector<2x96xf32>
    %232 = arith.divf %230, %231 : vector<2x96xf32>
    %233 = vector.extract_strided_slice %226 {offsets = [0, 96], sizes = [2, 32], strides = [1, 1]} : vector<2x128xf32> to vector<2x32xf32>
    %234 = math.tanh %233 : vector<2x32xf32>
    %235 = vector.extract_strided_slice %232 {offsets = [0, 32], sizes = [2, 32], strides = [1, 1]} : vector<2x96xf32> to vector<2x32xf32>
    %236 = arith.mulf %235, %197 : vector<2x32xf32>
    %237 = vector.extract_strided_slice %232 {offsets = [0, 0], sizes = [2, 32], strides = [1, 1]} : vector<2x96xf32> to vector<2x32xf32>
    %238 = arith.mulf %237, %234 : vector<2x32xf32>
    %239 = arith.addf %236, %238 : vector<2x32xf32>
    %240 = vector.extract_strided_slice %232 {offsets = [0, 64], sizes = [2, 32], strides = [1, 1]} : vector<2x96xf32> to vector<2x32xf32>
    %241 = math.tanh %239 : vector<2x32xf32>
    %242 = arith.mulf %240, %241 : vector<2x32xf32>
    %243 = vector.extract_strided_slice %46 {offsets = [5, 0, 0], sizes = [1, 2, 128], strides = [1, 1, 1]} : vector<16x2x128xf32> to vector<1x2x128xf32>
    %244 = vector.shape_cast %243 : vector<1x2x128xf32> to vector<2x128xf32>
    %245 = arith.truncf %221 : vector<2x32xf32> to vector<2x32xbf16>
    %cst_45 = arith.constant dense<0.000000e+00> : vector<2x128xf32>
    %246 = tpu.matmul %245, %47, %cst_45 {dimension_numbers = #tpu.dot_dimension_numbers<[1], [0], [0], [1], [0, 0, 1, 1], [], []>} : vector<2x32xbf16>, vector<32x128xbf16>, vector<2x128xf32> -> vector<2x128xf32>
    %247 = arith.addf %244, %246 : vector<2x128xf32>
    %248 = vector.extract_strided_slice %247 {offsets = [0, 0], sizes = [2, 96], strides = [1, 1]} : vector<2x128xf32> to vector<2x96xf32>
    %249 = arith.negf %248 : vector<2x96xf32>
    %250 = math.exp %249 : vector<2x96xf32>
    %cst_46 = arith.constant 1.000000e+00 : f32
    %251 = vector.broadcast %cst_46 : f32 to vector<2x96xf32>
    %252 = arith.addf %251, %250 : vector<2x96xf32>
    %253 = arith.divf %251, %252 : vector<2x96xf32>
    %254 = vector.extract_strided_slice %247 {offsets = [0, 96], sizes = [2, 32], strides = [1, 1]} : vector<2x128xf32> to vector<2x32xf32>
    %255 = math.tanh %254 : vector<2x32xf32>
    %256 = vector.extract_strided_slice %253 {offsets = [0, 32], sizes = [2, 32], strides = [1, 1]} : vector<2x96xf32> to vector<2x32xf32>
    %257 = arith.mulf %256, %218 : vector<2x32xf32>
    %258 = vector.extract_strided_slice %253 {offsets = [0, 0], sizes = [2, 32], strides = [1, 1]} : vector<2x96xf32> to vector<2x32xf32>
    %259 = arith.mulf %258, %255 : vector<2x32xf32>
    %260 = arith.addf %257, %259 : vector<2x32xf32>
    %261 = vector.extract_strided_slice %253 {offsets = [0, 64], sizes = [2, 32], strides = [1, 1]} : vector<2x96xf32> to vector<2x32xf32>
    %262 = math.tanh %260 : vector<2x32xf32>
    %263 = arith.mulf %261, %262 : vector<2x32xf32>
    %264 = tpu.concatenate %221, %242 in 1 : vector<2x32xf32>, vector<2x32xf32> -> vector<2x64xf32>
    %265 = arith.truncf %264 : vector<2x64xf32> to vector<2x64xbf16>
    %cst_47 = arith.constant dense<0.000000e+00> : vector<2x128xf32>
    %266 = tpu.matmul %265, %48, %cst_47 {dimension_numbers = #tpu.dot_dimension_numbers<[1], [0], [0], [1], [0, 0, 1, 1], [], []>} : vector<2x64xbf16>, vector<64x128xbf16>, vector<2x128xf32> -> vector<2x128xf32>
    %267 = vector.broadcast %49 : vector<1x128xf32> to vector<2x128xf32>
    %268 = arith.addf %266, %267 : vector<2x128xf32>
    %269 = vector.extract_strided_slice %268 {offsets = [0, 0], sizes = [2, 96], strides = [1, 1]} : vector<2x128xf32> to vector<2x96xf32>
    %270 = arith.negf %269 : vector<2x96xf32>
    %271 = math.exp %270 : vector<2x96xf32>
    %cst_48 = arith.constant 1.000000e+00 : f32
    %272 = vector.broadcast %cst_48 : f32 to vector<2x96xf32>
    %273 = arith.addf %272, %271 : vector<2x96xf32>
    %274 = arith.divf %272, %273 : vector<2x96xf32>
    %275 = vector.extract_strided_slice %268 {offsets = [0, 96], sizes = [2, 32], strides = [1, 1]} : vector<2x128xf32> to vector<2x32xf32>
    %276 = math.tanh %275 : vector<2x32xf32>
    %277 = vector.extract_strided_slice %274 {offsets = [0, 32], sizes = [2, 32], strides = [1, 1]} : vector<2x96xf32> to vector<2x32xf32>
    %278 = arith.mulf %277, %239 : vector<2x32xf32>
    %279 = vector.extract_strided_slice %274 {offsets = [0, 0], sizes = [2, 32], strides = [1, 1]} : vector<2x96xf32> to vector<2x32xf32>
    %280 = arith.mulf %279, %276 : vector<2x32xf32>
    %281 = arith.addf %278, %280 : vector<2x32xf32>
    %282 = vector.extract_strided_slice %274 {offsets = [0, 64], sizes = [2, 32], strides = [1, 1]} : vector<2x96xf32> to vector<2x32xf32>
    %283 = math.tanh %281 : vector<2x32xf32>
    %284 = arith.mulf %282, %283 : vector<2x32xf32>
    %285 = vector.extract_strided_slice %46 {offsets = [6, 0, 0], sizes = [1, 2, 128], strides = [1, 1, 1]} : vector<16x2x128xf32> to vector<1x2x128xf32>
    %286 = vector.shape_cast %285 : vector<1x2x128xf32> to vector<2x128xf32>
    %287 = arith.truncf %263 : vector<2x32xf32> to vector<2x32xbf16>
    %cst_49 = arith.constant dense<0.000000e+00> : vector<2x128xf32>
    %288 = tpu.matmul %287, %47, %cst_49 {dimension_numbers = #tpu.dot_dimension_numbers<[1], [0], [0], [1], [0, 0, 1, 1], [], []>} : vector<2x32xbf16>, vector<32x128xbf16>, vector<2x128xf32> -> vector<2x128xf32>
    %289 = arith.addf %286, %288 : vector<2x128xf32>
    %290 = vector.extract_strided_slice %289 {offsets = [0, 0], sizes = [2, 96], strides = [1, 1]} : vector<2x128xf32> to vector<2x96xf32>
    %291 = arith.negf %290 : vector<2x96xf32>
    %292 = math.exp %291 : vector<2x96xf32>
    %cst_50 = arith.constant 1.000000e+00 : f32
    %293 = vector.broadcast %cst_50 : f32 to vector<2x96xf32>
    %294 = arith.addf %293, %292 : vector<2x96xf32>
    %295 = arith.divf %293, %294 : vector<2x96xf32>
    %296 = vector.extract_strided_slice %289 {offsets = [0, 96], sizes = [2, 32], strides = [1, 1]} : vector<2x128xf32> to vector<2x32xf32>
    %297 = math.tanh %296 : vector<2x32xf32>
    %298 = vector.extract_strided_slice %295 {offsets = [0, 32], sizes = [2, 32], strides = [1, 1]} : vector<2x96xf32> to vector<2x32xf32>
    %299 = arith.mulf %298, %260 : vector<2x32xf32>
    %300 = vector.extract_strided_slice %295 {offsets = [0, 0], sizes = [2, 32], strides = [1, 1]} : vector<2x96xf32> to vector<2x32xf32>
    %301 = arith.mulf %300, %297 : vector<2x32xf32>
    %302 = arith.addf %299, %301 : vector<2x32xf32>
    %303 = vector.extract_strided_slice %295 {offsets = [0, 64], sizes = [2, 32], strides = [1, 1]} : vector<2x96xf32> to vector<2x32xf32>
    %304 = math.tanh %302 : vector<2x32xf32>
    %305 = arith.mulf %303, %304 : vector<2x32xf32>
    %306 = tpu.concatenate %263, %284 in 1 : vector<2x32xf32>, vector<2x32xf32> -> vector<2x64xf32>
    %307 = arith.truncf %306 : vector<2x64xf32> to vector<2x64xbf16>
    %cst_51 = arith.constant dense<0.000000e+00> : vector<2x128xf32>
    %308 = tpu.matmul %307, %48, %cst_51 {dimension_numbers = #tpu.dot_dimension_numbers<[1], [0], [0], [1], [0, 0, 1, 1], [], []>} : vector<2x64xbf16>, vector<64x128xbf16>, vector<2x128xf32> -> vector<2x128xf32>
    %309 = vector.broadcast %49 : vector<1x128xf32> to vector<2x128xf32>
    %310 = arith.addf %308, %309 : vector<2x128xf32>
    %311 = vector.extract_strided_slice %310 {offsets = [0, 0], sizes = [2, 96], strides = [1, 1]} : vector<2x128xf32> to vector<2x96xf32>
    %312 = arith.negf %311 : vector<2x96xf32>
    %313 = math.exp %312 : vector<2x96xf32>
    %cst_52 = arith.constant 1.000000e+00 : f32
    %314 = vector.broadcast %cst_52 : f32 to vector<2x96xf32>
    %315 = arith.addf %314, %313 : vector<2x96xf32>
    %316 = arith.divf %314, %315 : vector<2x96xf32>
    %317 = vector.extract_strided_slice %310 {offsets = [0, 96], sizes = [2, 32], strides = [1, 1]} : vector<2x128xf32> to vector<2x32xf32>
    %318 = math.tanh %317 : vector<2x32xf32>
    %319 = vector.extract_strided_slice %316 {offsets = [0, 32], sizes = [2, 32], strides = [1, 1]} : vector<2x96xf32> to vector<2x32xf32>
    %320 = arith.mulf %319, %281 : vector<2x32xf32>
    %321 = vector.extract_strided_slice %316 {offsets = [0, 0], sizes = [2, 32], strides = [1, 1]} : vector<2x96xf32> to vector<2x32xf32>
    %322 = arith.mulf %321, %318 : vector<2x32xf32>
    %323 = arith.addf %320, %322 : vector<2x32xf32>
    %324 = vector.extract_strided_slice %316 {offsets = [0, 64], sizes = [2, 32], strides = [1, 1]} : vector<2x96xf32> to vector<2x32xf32>
    %325 = math.tanh %323 : vector<2x32xf32>
    %326 = arith.mulf %324, %325 : vector<2x32xf32>
    %327 = vector.extract_strided_slice %46 {offsets = [7, 0, 0], sizes = [1, 2, 128], strides = [1, 1, 1]} : vector<16x2x128xf32> to vector<1x2x128xf32>
    %328 = vector.shape_cast %327 : vector<1x2x128xf32> to vector<2x128xf32>
    %329 = arith.truncf %305 : vector<2x32xf32> to vector<2x32xbf16>
    %cst_53 = arith.constant dense<0.000000e+00> : vector<2x128xf32>
    %330 = tpu.matmul %329, %47, %cst_53 {dimension_numbers = #tpu.dot_dimension_numbers<[1], [0], [0], [1], [0, 0, 1, 1], [], []>} : vector<2x32xbf16>, vector<32x128xbf16>, vector<2x128xf32> -> vector<2x128xf32>
    %331 = arith.addf %328, %330 : vector<2x128xf32>
    %332 = vector.extract_strided_slice %331 {offsets = [0, 0], sizes = [2, 96], strides = [1, 1]} : vector<2x128xf32> to vector<2x96xf32>
    %333 = arith.negf %332 : vector<2x96xf32>
    %334 = math.exp %333 : vector<2x96xf32>
    %cst_54 = arith.constant 1.000000e+00 : f32
    %335 = vector.broadcast %cst_54 : f32 to vector<2x96xf32>
    %336 = arith.addf %335, %334 : vector<2x96xf32>
    %337 = arith.divf %335, %336 : vector<2x96xf32>
    %338 = vector.extract_strided_slice %331 {offsets = [0, 96], sizes = [2, 32], strides = [1, 1]} : vector<2x128xf32> to vector<2x32xf32>
    %339 = math.tanh %338 : vector<2x32xf32>
    %340 = vector.extract_strided_slice %337 {offsets = [0, 32], sizes = [2, 32], strides = [1, 1]} : vector<2x96xf32> to vector<2x32xf32>
    %341 = arith.mulf %340, %302 : vector<2x32xf32>
    %342 = vector.extract_strided_slice %337 {offsets = [0, 0], sizes = [2, 32], strides = [1, 1]} : vector<2x96xf32> to vector<2x32xf32>
    %343 = arith.mulf %342, %339 : vector<2x32xf32>
    %344 = arith.addf %341, %343 : vector<2x32xf32>
    %345 = vector.extract_strided_slice %337 {offsets = [0, 64], sizes = [2, 32], strides = [1, 1]} : vector<2x96xf32> to vector<2x32xf32>
    %346 = math.tanh %344 : vector<2x32xf32>
    %347 = arith.mulf %345, %346 : vector<2x32xf32>
    %348 = tpu.concatenate %305, %326 in 1 : vector<2x32xf32>, vector<2x32xf32> -> vector<2x64xf32>
    %349 = arith.truncf %348 : vector<2x64xf32> to vector<2x64xbf16>
    %cst_55 = arith.constant dense<0.000000e+00> : vector<2x128xf32>
    %350 = tpu.matmul %349, %48, %cst_55 {dimension_numbers = #tpu.dot_dimension_numbers<[1], [0], [0], [1], [0, 0, 1, 1], [], []>} : vector<2x64xbf16>, vector<64x128xbf16>, vector<2x128xf32> -> vector<2x128xf32>
    %351 = vector.broadcast %49 : vector<1x128xf32> to vector<2x128xf32>
    %352 = arith.addf %350, %351 : vector<2x128xf32>
    %353 = vector.extract_strided_slice %352 {offsets = [0, 0], sizes = [2, 96], strides = [1, 1]} : vector<2x128xf32> to vector<2x96xf32>
    %354 = arith.negf %353 : vector<2x96xf32>
    %355 = math.exp %354 : vector<2x96xf32>
    %cst_56 = arith.constant 1.000000e+00 : f32
    %356 = vector.broadcast %cst_56 : f32 to vector<2x96xf32>
    %357 = arith.addf %356, %355 : vector<2x96xf32>
    %358 = arith.divf %356, %357 : vector<2x96xf32>
    %359 = vector.extract_strided_slice %352 {offsets = [0, 96], sizes = [2, 32], strides = [1, 1]} : vector<2x128xf32> to vector<2x32xf32>
    %360 = math.tanh %359 : vector<2x32xf32>
    %361 = vector.extract_strided_slice %358 {offsets = [0, 32], sizes = [2, 32], strides = [1, 1]} : vector<2x96xf32> to vector<2x32xf32>
    %362 = arith.mulf %361, %323 : vector<2x32xf32>
    %363 = vector.extract_strided_slice %358 {offsets = [0, 0], sizes = [2, 32], strides = [1, 1]} : vector<2x96xf32> to vector<2x32xf32>
    %364 = arith.mulf %363, %360 : vector<2x32xf32>
    %365 = arith.addf %362, %364 : vector<2x32xf32>
    %366 = vector.extract_strided_slice %358 {offsets = [0, 64], sizes = [2, 32], strides = [1, 1]} : vector<2x96xf32> to vector<2x32xf32>
    %367 = math.tanh %365 : vector<2x32xf32>
    %368 = arith.mulf %366, %367 : vector<2x32xf32>
    %369 = vector.extract_strided_slice %46 {offsets = [8, 0, 0], sizes = [1, 2, 128], strides = [1, 1, 1]} : vector<16x2x128xf32> to vector<1x2x128xf32>
    %370 = vector.shape_cast %369 : vector<1x2x128xf32> to vector<2x128xf32>
    %371 = arith.truncf %347 : vector<2x32xf32> to vector<2x32xbf16>
    %cst_57 = arith.constant dense<0.000000e+00> : vector<2x128xf32>
    %372 = tpu.matmul %371, %47, %cst_57 {dimension_numbers = #tpu.dot_dimension_numbers<[1], [0], [0], [1], [0, 0, 1, 1], [], []>} : vector<2x32xbf16>, vector<32x128xbf16>, vector<2x128xf32> -> vector<2x128xf32>
    %373 = arith.addf %370, %372 : vector<2x128xf32>
    %374 = vector.extract_strided_slice %373 {offsets = [0, 0], sizes = [2, 96], strides = [1, 1]} : vector<2x128xf32> to vector<2x96xf32>
    %375 = arith.negf %374 : vector<2x96xf32>
    %376 = math.exp %375 : vector<2x96xf32>
    %cst_58 = arith.constant 1.000000e+00 : f32
    %377 = vector.broadcast %cst_58 : f32 to vector<2x96xf32>
    %378 = arith.addf %377, %376 : vector<2x96xf32>
    %379 = arith.divf %377, %378 : vector<2x96xf32>
    %380 = vector.extract_strided_slice %373 {offsets = [0, 96], sizes = [2, 32], strides = [1, 1]} : vector<2x128xf32> to vector<2x32xf32>
    %381 = math.tanh %380 : vector<2x32xf32>
    %382 = vector.extract_strided_slice %379 {offsets = [0, 32], sizes = [2, 32], strides = [1, 1]} : vector<2x96xf32> to vector<2x32xf32>
    %383 = arith.mulf %382, %344 : vector<2x32xf32>
    %384 = vector.extract_strided_slice %379 {offsets = [0, 0], sizes = [2, 32], strides = [1, 1]} : vector<2x96xf32> to vector<2x32xf32>
    %385 = arith.mulf %384, %381 : vector<2x32xf32>
    %386 = arith.addf %383, %385 : vector<2x32xf32>
    %387 = vector.extract_strided_slice %379 {offsets = [0, 64], sizes = [2, 32], strides = [1, 1]} : vector<2x96xf32> to vector<2x32xf32>
    %388 = math.tanh %386 : vector<2x32xf32>
    %389 = arith.mulf %387, %388 : vector<2x32xf32>
    %390 = tpu.concatenate %347, %368 in 1 : vector<2x32xf32>, vector<2x32xf32> -> vector<2x64xf32>
    %391 = arith.truncf %390 : vector<2x64xf32> to vector<2x64xbf16>
    %cst_59 = arith.constant dense<0.000000e+00> : vector<2x128xf32>
    %392 = tpu.matmul %391, %48, %cst_59 {dimension_numbers = #tpu.dot_dimension_numbers<[1], [0], [0], [1], [0, 0, 1, 1], [], []>} : vector<2x64xbf16>, vector<64x128xbf16>, vector<2x128xf32> -> vector<2x128xf32>
    %393 = vector.broadcast %49 : vector<1x128xf32> to vector<2x128xf32>
    %394 = arith.addf %392, %393 : vector<2x128xf32>
    %395 = vector.extract_strided_slice %394 {offsets = [0, 0], sizes = [2, 96], strides = [1, 1]} : vector<2x128xf32> to vector<2x96xf32>
    %396 = arith.negf %395 : vector<2x96xf32>
    %397 = math.exp %396 : vector<2x96xf32>
    %cst_60 = arith.constant 1.000000e+00 : f32
    %398 = vector.broadcast %cst_60 : f32 to vector<2x96xf32>
    %399 = arith.addf %398, %397 : vector<2x96xf32>
    %400 = arith.divf %398, %399 : vector<2x96xf32>
    %401 = vector.extract_strided_slice %394 {offsets = [0, 96], sizes = [2, 32], strides = [1, 1]} : vector<2x128xf32> to vector<2x32xf32>
    %402 = math.tanh %401 : vector<2x32xf32>
    %403 = vector.extract_strided_slice %400 {offsets = [0, 32], sizes = [2, 32], strides = [1, 1]} : vector<2x96xf32> to vector<2x32xf32>
    %404 = arith.mulf %403, %365 : vector<2x32xf32>
    %405 = vector.extract_strided_slice %400 {offsets = [0, 0], sizes = [2, 32], strides = [1, 1]} : vector<2x96xf32> to vector<2x32xf32>
    %406 = arith.mulf %405, %402 : vector<2x32xf32>
    %407 = arith.addf %404, %406 : vector<2x32xf32>
    %408 = vector.extract_strided_slice %400 {offsets = [0, 64], sizes = [2, 32], strides = [1, 1]} : vector<2x96xf32> to vector<2x32xf32>
    %409 = math.tanh %407 : vector<2x32xf32>
    %410 = arith.mulf %408, %409 : vector<2x32xf32>
    %411 = vector.extract_strided_slice %46 {offsets = [9, 0, 0], sizes = [1, 2, 128], strides = [1, 1, 1]} : vector<16x2x128xf32> to vector<1x2x128xf32>
    %412 = vector.shape_cast %411 : vector<1x2x128xf32> to vector<2x128xf32>
    %413 = arith.truncf %389 : vector<2x32xf32> to vector<2x32xbf16>
    %cst_61 = arith.constant dense<0.000000e+00> : vector<2x128xf32>
    %414 = tpu.matmul %413, %47, %cst_61 {dimension_numbers = #tpu.dot_dimension_numbers<[1], [0], [0], [1], [0, 0, 1, 1], [], []>} : vector<2x32xbf16>, vector<32x128xbf16>, vector<2x128xf32> -> vector<2x128xf32>
    %415 = arith.addf %412, %414 : vector<2x128xf32>
    %416 = vector.extract_strided_slice %415 {offsets = [0, 0], sizes = [2, 96], strides = [1, 1]} : vector<2x128xf32> to vector<2x96xf32>
    %417 = arith.negf %416 : vector<2x96xf32>
    %418 = math.exp %417 : vector<2x96xf32>
    %cst_62 = arith.constant 1.000000e+00 : f32
    %419 = vector.broadcast %cst_62 : f32 to vector<2x96xf32>
    %420 = arith.addf %419, %418 : vector<2x96xf32>
    %421 = arith.divf %419, %420 : vector<2x96xf32>
    %422 = vector.extract_strided_slice %415 {offsets = [0, 96], sizes = [2, 32], strides = [1, 1]} : vector<2x128xf32> to vector<2x32xf32>
    %423 = math.tanh %422 : vector<2x32xf32>
    %424 = vector.extract_strided_slice %421 {offsets = [0, 32], sizes = [2, 32], strides = [1, 1]} : vector<2x96xf32> to vector<2x32xf32>
    %425 = arith.mulf %424, %386 : vector<2x32xf32>
    %426 = vector.extract_strided_slice %421 {offsets = [0, 0], sizes = [2, 32], strides = [1, 1]} : vector<2x96xf32> to vector<2x32xf32>
    %427 = arith.mulf %426, %423 : vector<2x32xf32>
    %428 = arith.addf %425, %427 : vector<2x32xf32>
    %429 = vector.extract_strided_slice %421 {offsets = [0, 64], sizes = [2, 32], strides = [1, 1]} : vector<2x96xf32> to vector<2x32xf32>
    %430 = math.tanh %428 : vector<2x32xf32>
    %431 = arith.mulf %429, %430 : vector<2x32xf32>
    %432 = tpu.concatenate %389, %410 in 1 : vector<2x32xf32>, vector<2x32xf32> -> vector<2x64xf32>
    %433 = arith.truncf %432 : vector<2x64xf32> to vector<2x64xbf16>
    %cst_63 = arith.constant dense<0.000000e+00> : vector<2x128xf32>
    %434 = tpu.matmul %433, %48, %cst_63 {dimension_numbers = #tpu.dot_dimension_numbers<[1], [0], [0], [1], [0, 0, 1, 1], [], []>} : vector<2x64xbf16>, vector<64x128xbf16>, vector<2x128xf32> -> vector<2x128xf32>
    %435 = vector.broadcast %49 : vector<1x128xf32> to vector<2x128xf32>
    %436 = arith.addf %434, %435 : vector<2x128xf32>
    %437 = vector.extract_strided_slice %436 {offsets = [0, 0], sizes = [2, 96], strides = [1, 1]} : vector<2x128xf32> to vector<2x96xf32>
    %438 = arith.negf %437 : vector<2x96xf32>
    %439 = math.exp %438 : vector<2x96xf32>
    %cst_64 = arith.constant 1.000000e+00 : f32
    %440 = vector.broadcast %cst_64 : f32 to vector<2x96xf32>
    %441 = arith.addf %440, %439 : vector<2x96xf32>
    %442 = arith.divf %440, %441 : vector<2x96xf32>
    %443 = vector.extract_strided_slice %436 {offsets = [0, 96], sizes = [2, 32], strides = [1, 1]} : vector<2x128xf32> to vector<2x32xf32>
    %444 = math.tanh %443 : vector<2x32xf32>
    %445 = vector.extract_strided_slice %442 {offsets = [0, 32], sizes = [2, 32], strides = [1, 1]} : vector<2x96xf32> to vector<2x32xf32>
    %446 = arith.mulf %445, %407 : vector<2x32xf32>
    %447 = vector.extract_strided_slice %442 {offsets = [0, 0], sizes = [2, 32], strides = [1, 1]} : vector<2x96xf32> to vector<2x32xf32>
    %448 = arith.mulf %447, %444 : vector<2x32xf32>
    %449 = arith.addf %446, %448 : vector<2x32xf32>
    %450 = vector.extract_strided_slice %442 {offsets = [0, 64], sizes = [2, 32], strides = [1, 1]} : vector<2x96xf32> to vector<2x32xf32>
    %451 = math.tanh %449 : vector<2x32xf32>
    %452 = arith.mulf %450, %451 : vector<2x32xf32>
    %453 = vector.extract_strided_slice %46 {offsets = [10, 0, 0], sizes = [1, 2, 128], strides = [1, 1, 1]} : vector<16x2x128xf32> to vector<1x2x128xf32>
    %454 = vector.shape_cast %453 : vector<1x2x128xf32> to vector<2x128xf32>
    %455 = arith.truncf %431 : vector<2x32xf32> to vector<2x32xbf16>
    %cst_65 = arith.constant dense<0.000000e+00> : vector<2x128xf32>
    %456 = tpu.matmul %455, %47, %cst_65 {dimension_numbers = #tpu.dot_dimension_numbers<[1], [0], [0], [1], [0, 0, 1, 1], [], []>} : vector<2x32xbf16>, vector<32x128xbf16>, vector<2x128xf32> -> vector<2x128xf32>
    %457 = arith.addf %454, %456 : vector<2x128xf32>
    %458 = vector.extract_strided_slice %457 {offsets = [0, 0], sizes = [2, 96], strides = [1, 1]} : vector<2x128xf32> to vector<2x96xf32>
    %459 = arith.negf %458 : vector<2x96xf32>
    %460 = math.exp %459 : vector<2x96xf32>
    %cst_66 = arith.constant 1.000000e+00 : f32
    %461 = vector.broadcast %cst_66 : f32 to vector<2x96xf32>
    %462 = arith.addf %461, %460 : vector<2x96xf32>
    %463 = arith.divf %461, %462 : vector<2x96xf32>
    %464 = vector.extract_strided_slice %457 {offsets = [0, 96], sizes = [2, 32], strides = [1, 1]} : vector<2x128xf32> to vector<2x32xf32>
    %465 = math.tanh %464 : vector<2x32xf32>
    %466 = vector.extract_strided_slice %463 {offsets = [0, 32], sizes = [2, 32], strides = [1, 1]} : vector<2x96xf32> to vector<2x32xf32>
    %467 = arith.mulf %466, %428 : vector<2x32xf32>
    %468 = vector.extract_strided_slice %463 {offsets = [0, 0], sizes = [2, 32], strides = [1, 1]} : vector<2x96xf32> to vector<2x32xf32>
    %469 = arith.mulf %468, %465 : vector<2x32xf32>
    %470 = arith.addf %467, %469 : vector<2x32xf32>
    %471 = vector.extract_strided_slice %463 {offsets = [0, 64], sizes = [2, 32], strides = [1, 1]} : vector<2x96xf32> to vector<2x32xf32>
    %472 = math.tanh %470 : vector<2x32xf32>
    %473 = arith.mulf %471, %472 : vector<2x32xf32>
    %474 = tpu.concatenate %431, %452 in 1 : vector<2x32xf32>, vector<2x32xf32> -> vector<2x64xf32>
    %475 = arith.truncf %474 : vector<2x64xf32> to vector<2x64xbf16>
    %cst_67 = arith.constant dense<0.000000e+00> : vector<2x128xf32>
    %476 = tpu.matmul %475, %48, %cst_67 {dimension_numbers = #tpu.dot_dimension_numbers<[1], [0], [0], [1], [0, 0, 1, 1], [], []>} : vector<2x64xbf16>, vector<64x128xbf16>, vector<2x128xf32> -> vector<2x128xf32>
    %477 = vector.broadcast %49 : vector<1x128xf32> to vector<2x128xf32>
    %478 = arith.addf %476, %477 : vector<2x128xf32>
    %479 = vector.extract_strided_slice %478 {offsets = [0, 0], sizes = [2, 96], strides = [1, 1]} : vector<2x128xf32> to vector<2x96xf32>
    %480 = arith.negf %479 : vector<2x96xf32>
    %481 = math.exp %480 : vector<2x96xf32>
    %cst_68 = arith.constant 1.000000e+00 : f32
    %482 = vector.broadcast %cst_68 : f32 to vector<2x96xf32>
    %483 = arith.addf %482, %481 : vector<2x96xf32>
    %484 = arith.divf %482, %483 : vector<2x96xf32>
    %485 = vector.extract_strided_slice %478 {offsets = [0, 96], sizes = [2, 32], strides = [1, 1]} : vector<2x128xf32> to vector<2x32xf32>
    %486 = math.tanh %485 : vector<2x32xf32>
    %487 = vector.extract_strided_slice %484 {offsets = [0, 32], sizes = [2, 32], strides = [1, 1]} : vector<2x96xf32> to vector<2x32xf32>
    %488 = arith.mulf %487, %449 : vector<2x32xf32>
    %489 = vector.extract_strided_slice %484 {offsets = [0, 0], sizes = [2, 32], strides = [1, 1]} : vector<2x96xf32> to vector<2x32xf32>
    %490 = arith.mulf %489, %486 : vector<2x32xf32>
    %491 = arith.addf %488, %490 : vector<2x32xf32>
    %492 = vector.extract_strided_slice %484 {offsets = [0, 64], sizes = [2, 32], strides = [1, 1]} : vector<2x96xf32> to vector<2x32xf32>
    %493 = math.tanh %491 : vector<2x32xf32>
    %494 = arith.mulf %492, %493 : vector<2x32xf32>
    %495 = vector.extract_strided_slice %46 {offsets = [11, 0, 0], sizes = [1, 2, 128], strides = [1, 1, 1]} : vector<16x2x128xf32> to vector<1x2x128xf32>
    %496 = vector.shape_cast %495 : vector<1x2x128xf32> to vector<2x128xf32>
    %497 = arith.truncf %473 : vector<2x32xf32> to vector<2x32xbf16>
    %cst_69 = arith.constant dense<0.000000e+00> : vector<2x128xf32>
    %498 = tpu.matmul %497, %47, %cst_69 {dimension_numbers = #tpu.dot_dimension_numbers<[1], [0], [0], [1], [0, 0, 1, 1], [], []>} : vector<2x32xbf16>, vector<32x128xbf16>, vector<2x128xf32> -> vector<2x128xf32>
    %499 = arith.addf %496, %498 : vector<2x128xf32>
    %500 = vector.extract_strided_slice %499 {offsets = [0, 0], sizes = [2, 96], strides = [1, 1]} : vector<2x128xf32> to vector<2x96xf32>
    %501 = arith.negf %500 : vector<2x96xf32>
    %502 = math.exp %501 : vector<2x96xf32>
    %cst_70 = arith.constant 1.000000e+00 : f32
    %503 = vector.broadcast %cst_70 : f32 to vector<2x96xf32>
    %504 = arith.addf %503, %502 : vector<2x96xf32>
    %505 = arith.divf %503, %504 : vector<2x96xf32>
    %506 = vector.extract_strided_slice %499 {offsets = [0, 96], sizes = [2, 32], strides = [1, 1]} : vector<2x128xf32> to vector<2x32xf32>
    %507 = math.tanh %506 : vector<2x32xf32>
    %508 = vector.extract_strided_slice %505 {offsets = [0, 32], sizes = [2, 32], strides = [1, 1]} : vector<2x96xf32> to vector<2x32xf32>
    %509 = arith.mulf %508, %470 : vector<2x32xf32>
    %510 = vector.extract_strided_slice %505 {offsets = [0, 0], sizes = [2, 32], strides = [1, 1]} : vector<2x96xf32> to vector<2x32xf32>
    %511 = arith.mulf %510, %507 : vector<2x32xf32>
    %512 = arith.addf %509, %511 : vector<2x32xf32>
    %513 = vector.extract_strided_slice %505 {offsets = [0, 64], sizes = [2, 32], strides = [1, 1]} : vector<2x96xf32> to vector<2x32xf32>
    %514 = math.tanh %512 : vector<2x32xf32>
    %515 = arith.mulf %513, %514 : vector<2x32xf32>
    %516 = tpu.concatenate %473, %494 in 1 : vector<2x32xf32>, vector<2x32xf32> -> vector<2x64xf32>
    %517 = arith.truncf %516 : vector<2x64xf32> to vector<2x64xbf16>
    %cst_71 = arith.constant dense<0.000000e+00> : vector<2x128xf32>
    %518 = tpu.matmul %517, %48, %cst_71 {dimension_numbers = #tpu.dot_dimension_numbers<[1], [0], [0], [1], [0, 0, 1, 1], [], []>} : vector<2x64xbf16>, vector<64x128xbf16>, vector<2x128xf32> -> vector<2x128xf32>
    %519 = vector.broadcast %49 : vector<1x128xf32> to vector<2x128xf32>
    %520 = arith.addf %518, %519 : vector<2x128xf32>
    %521 = vector.extract_strided_slice %520 {offsets = [0, 0], sizes = [2, 96], strides = [1, 1]} : vector<2x128xf32> to vector<2x96xf32>
    %522 = arith.negf %521 : vector<2x96xf32>
    %523 = math.exp %522 : vector<2x96xf32>
    %cst_72 = arith.constant 1.000000e+00 : f32
    %524 = vector.broadcast %cst_72 : f32 to vector<2x96xf32>
    %525 = arith.addf %524, %523 : vector<2x96xf32>
    %526 = arith.divf %524, %525 : vector<2x96xf32>
    %527 = vector.extract_strided_slice %520 {offsets = [0, 96], sizes = [2, 32], strides = [1, 1]} : vector<2x128xf32> to vector<2x32xf32>
    %528 = math.tanh %527 : vector<2x32xf32>
    %529 = vector.extract_strided_slice %526 {offsets = [0, 32], sizes = [2, 32], strides = [1, 1]} : vector<2x96xf32> to vector<2x32xf32>
    %530 = arith.mulf %529, %491 : vector<2x32xf32>
    %531 = vector.extract_strided_slice %526 {offsets = [0, 0], sizes = [2, 32], strides = [1, 1]} : vector<2x96xf32> to vector<2x32xf32>
    %532 = arith.mulf %531, %528 : vector<2x32xf32>
    %533 = arith.addf %530, %532 : vector<2x32xf32>
    %534 = vector.extract_strided_slice %526 {offsets = [0, 64], sizes = [2, 32], strides = [1, 1]} : vector<2x96xf32> to vector<2x32xf32>
    %535 = math.tanh %533 : vector<2x32xf32>
    %536 = arith.mulf %534, %535 : vector<2x32xf32>
    %537 = vector.extract_strided_slice %46 {offsets = [12, 0, 0], sizes = [1, 2, 128], strides = [1, 1, 1]} : vector<16x2x128xf32> to vector<1x2x128xf32>
    %538 = vector.shape_cast %537 : vector<1x2x128xf32> to vector<2x128xf32>
    %539 = arith.truncf %515 : vector<2x32xf32> to vector<2x32xbf16>
    %cst_73 = arith.constant dense<0.000000e+00> : vector<2x128xf32>
    %540 = tpu.matmul %539, %47, %cst_73 {dimension_numbers = #tpu.dot_dimension_numbers<[1], [0], [0], [1], [0, 0, 1, 1], [], []>} : vector<2x32xbf16>, vector<32x128xbf16>, vector<2x128xf32> -> vector<2x128xf32>
    %541 = arith.addf %538, %540 : vector<2x128xf32>
    %542 = vector.extract_strided_slice %541 {offsets = [0, 0], sizes = [2, 96], strides = [1, 1]} : vector<2x128xf32> to vector<2x96xf32>
    %543 = arith.negf %542 : vector<2x96xf32>
    %544 = math.exp %543 : vector<2x96xf32>
    %cst_74 = arith.constant 1.000000e+00 : f32
    %545 = vector.broadcast %cst_74 : f32 to vector<2x96xf32>
    %546 = arith.addf %545, %544 : vector<2x96xf32>
    %547 = arith.divf %545, %546 : vector<2x96xf32>
    %548 = vector.extract_strided_slice %541 {offsets = [0, 96], sizes = [2, 32], strides = [1, 1]} : vector<2x128xf32> to vector<2x32xf32>
    %549 = math.tanh %548 : vector<2x32xf32>
    %550 = vector.extract_strided_slice %547 {offsets = [0, 32], sizes = [2, 32], strides = [1, 1]} : vector<2x96xf32> to vector<2x32xf32>
    %551 = arith.mulf %550, %512 : vector<2x32xf32>
    %552 = vector.extract_strided_slice %547 {offsets = [0, 0], sizes = [2, 32], strides = [1, 1]} : vector<2x96xf32> to vector<2x32xf32>
    %553 = arith.mulf %552, %549 : vector<2x32xf32>
    %554 = arith.addf %551, %553 : vector<2x32xf32>
    %555 = vector.extract_strided_slice %547 {offsets = [0, 64], sizes = [2, 32], strides = [1, 1]} : vector<2x96xf32> to vector<2x32xf32>
    %556 = math.tanh %554 : vector<2x32xf32>
    %557 = arith.mulf %555, %556 : vector<2x32xf32>
    %558 = tpu.concatenate %515, %536 in 1 : vector<2x32xf32>, vector<2x32xf32> -> vector<2x64xf32>
    %559 = arith.truncf %558 : vector<2x64xf32> to vector<2x64xbf16>
    %cst_75 = arith.constant dense<0.000000e+00> : vector<2x128xf32>
    %560 = tpu.matmul %559, %48, %cst_75 {dimension_numbers = #tpu.dot_dimension_numbers<[1], [0], [0], [1], [0, 0, 1, 1], [], []>} : vector<2x64xbf16>, vector<64x128xbf16>, vector<2x128xf32> -> vector<2x128xf32>
    %561 = vector.broadcast %49 : vector<1x128xf32> to vector<2x128xf32>
    %562 = arith.addf %560, %561 : vector<2x128xf32>
    %563 = vector.extract_strided_slice %562 {offsets = [0, 0], sizes = [2, 96], strides = [1, 1]} : vector<2x128xf32> to vector<2x96xf32>
    %564 = arith.negf %563 : vector<2x96xf32>
    %565 = math.exp %564 : vector<2x96xf32>
    %cst_76 = arith.constant 1.000000e+00 : f32
    %566 = vector.broadcast %cst_76 : f32 to vector<2x96xf32>
    %567 = arith.addf %566, %565 : vector<2x96xf32>
    %568 = arith.divf %566, %567 : vector<2x96xf32>
    %569 = vector.extract_strided_slice %562 {offsets = [0, 96], sizes = [2, 32], strides = [1, 1]} : vector<2x128xf32> to vector<2x32xf32>
    %570 = math.tanh %569 : vector<2x32xf32>
    %571 = vector.extract_strided_slice %568 {offsets = [0, 32], sizes = [2, 32], strides = [1, 1]} : vector<2x96xf32> to vector<2x32xf32>
    %572 = arith.mulf %571, %533 : vector<2x32xf32>
    %573 = vector.extract_strided_slice %568 {offsets = [0, 0], sizes = [2, 32], strides = [1, 1]} : vector<2x96xf32> to vector<2x32xf32>
    %574 = arith.mulf %573, %570 : vector<2x32xf32>
    %575 = arith.addf %572, %574 : vector<2x32xf32>
    %576 = vector.extract_strided_slice %568 {offsets = [0, 64], sizes = [2, 32], strides = [1, 1]} : vector<2x96xf32> to vector<2x32xf32>
    %577 = math.tanh %575 : vector<2x32xf32>
    %578 = arith.mulf %576, %577 : vector<2x32xf32>
    %579 = vector.extract_strided_slice %46 {offsets = [13, 0, 0], sizes = [1, 2, 128], strides = [1, 1, 1]} : vector<16x2x128xf32> to vector<1x2x128xf32>
    %580 = vector.shape_cast %579 : vector<1x2x128xf32> to vector<2x128xf32>
    %581 = arith.truncf %557 : vector<2x32xf32> to vector<2x32xbf16>
    %cst_77 = arith.constant dense<0.000000e+00> : vector<2x128xf32>
    %582 = tpu.matmul %581, %47, %cst_77 {dimension_numbers = #tpu.dot_dimension_numbers<[1], [0], [0], [1], [0, 0, 1, 1], [], []>} : vector<2x32xbf16>, vector<32x128xbf16>, vector<2x128xf32> -> vector<2x128xf32>
    %583 = arith.addf %580, %582 : vector<2x128xf32>
    %584 = vector.extract_strided_slice %583 {offsets = [0, 0], sizes = [2, 96], strides = [1, 1]} : vector<2x128xf32> to vector<2x96xf32>
    %585 = arith.negf %584 : vector<2x96xf32>
    %586 = math.exp %585 : vector<2x96xf32>
    %cst_78 = arith.constant 1.000000e+00 : f32
    %587 = vector.broadcast %cst_78 : f32 to vector<2x96xf32>
    %588 = arith.addf %587, %586 : vector<2x96xf32>
    %589 = arith.divf %587, %588 : vector<2x96xf32>
    %590 = vector.extract_strided_slice %583 {offsets = [0, 96], sizes = [2, 32], strides = [1, 1]} : vector<2x128xf32> to vector<2x32xf32>
    %591 = math.tanh %590 : vector<2x32xf32>
    %592 = vector.extract_strided_slice %589 {offsets = [0, 32], sizes = [2, 32], strides = [1, 1]} : vector<2x96xf32> to vector<2x32xf32>
    %593 = arith.mulf %592, %554 : vector<2x32xf32>
    %594 = vector.extract_strided_slice %589 {offsets = [0, 0], sizes = [2, 32], strides = [1, 1]} : vector<2x96xf32> to vector<2x32xf32>
    %595 = arith.mulf %594, %591 : vector<2x32xf32>
    %596 = arith.addf %593, %595 : vector<2x32xf32>
    %597 = vector.extract_strided_slice %589 {offsets = [0, 64], sizes = [2, 32], strides = [1, 1]} : vector<2x96xf32> to vector<2x32xf32>
    %598 = math.tanh %596 : vector<2x32xf32>
    %599 = arith.mulf %597, %598 : vector<2x32xf32>
    %600 = tpu.concatenate %557, %578 in 1 : vector<2x32xf32>, vector<2x32xf32> -> vector<2x64xf32>
    %601 = arith.truncf %600 : vector<2x64xf32> to vector<2x64xbf16>
    %cst_79 = arith.constant dense<0.000000e+00> : vector<2x128xf32>
    %602 = tpu.matmul %601, %48, %cst_79 {dimension_numbers = #tpu.dot_dimension_numbers<[1], [0], [0], [1], [0, 0, 1, 1], [], []>} : vector<2x64xbf16>, vector<64x128xbf16>, vector<2x128xf32> -> vector<2x128xf32>
    %603 = vector.broadcast %49 : vector<1x128xf32> to vector<2x128xf32>
    %604 = arith.addf %602, %603 : vector<2x128xf32>
    %605 = vector.extract_strided_slice %604 {offsets = [0, 0], sizes = [2, 96], strides = [1, 1]} : vector<2x128xf32> to vector<2x96xf32>
    %606 = arith.negf %605 : vector<2x96xf32>
    %607 = math.exp %606 : vector<2x96xf32>
    %cst_80 = arith.constant 1.000000e+00 : f32
    %608 = vector.broadcast %cst_80 : f32 to vector<2x96xf32>
    %609 = arith.addf %608, %607 : vector<2x96xf32>
    %610 = arith.divf %608, %609 : vector<2x96xf32>
    %611 = vector.extract_strided_slice %604 {offsets = [0, 96], sizes = [2, 32], strides = [1, 1]} : vector<2x128xf32> to vector<2x32xf32>
    %612 = math.tanh %611 : vector<2x32xf32>
    %613 = vector.extract_strided_slice %610 {offsets = [0, 32], sizes = [2, 32], strides = [1, 1]} : vector<2x96xf32> to vector<2x32xf32>
    %614 = arith.mulf %613, %575 : vector<2x32xf32>
    %615 = vector.extract_strided_slice %610 {offsets = [0, 0], sizes = [2, 32], strides = [1, 1]} : vector<2x96xf32> to vector<2x32xf32>
    %616 = arith.mulf %615, %612 : vector<2x32xf32>
    %617 = arith.addf %614, %616 : vector<2x32xf32>
    %618 = vector.extract_strided_slice %610 {offsets = [0, 64], sizes = [2, 32], strides = [1, 1]} : vector<2x96xf32> to vector<2x32xf32>
    %619 = math.tanh %617 : vector<2x32xf32>
    %620 = arith.mulf %618, %619 : vector<2x32xf32>
    %621 = vector.extract_strided_slice %46 {offsets = [14, 0, 0], sizes = [1, 2, 128], strides = [1, 1, 1]} : vector<16x2x128xf32> to vector<1x2x128xf32>
    %622 = vector.shape_cast %621 : vector<1x2x128xf32> to vector<2x128xf32>
    %623 = arith.truncf %599 : vector<2x32xf32> to vector<2x32xbf16>
    %cst_81 = arith.constant dense<0.000000e+00> : vector<2x128xf32>
    %624 = tpu.matmul %623, %47, %cst_81 {dimension_numbers = #tpu.dot_dimension_numbers<[1], [0], [0], [1], [0, 0, 1, 1], [], []>} : vector<2x32xbf16>, vector<32x128xbf16>, vector<2x128xf32> -> vector<2x128xf32>
    %625 = arith.addf %622, %624 : vector<2x128xf32>
    %626 = vector.extract_strided_slice %625 {offsets = [0, 0], sizes = [2, 96], strides = [1, 1]} : vector<2x128xf32> to vector<2x96xf32>
    %627 = arith.negf %626 : vector<2x96xf32>
    %628 = math.exp %627 : vector<2x96xf32>
    %cst_82 = arith.constant 1.000000e+00 : f32
    %629 = vector.broadcast %cst_82 : f32 to vector<2x96xf32>
    %630 = arith.addf %629, %628 : vector<2x96xf32>
    %631 = arith.divf %629, %630 : vector<2x96xf32>
    %632 = vector.extract_strided_slice %625 {offsets = [0, 96], sizes = [2, 32], strides = [1, 1]} : vector<2x128xf32> to vector<2x32xf32>
    %633 = math.tanh %632 : vector<2x32xf32>
    %634 = vector.extract_strided_slice %631 {offsets = [0, 32], sizes = [2, 32], strides = [1, 1]} : vector<2x96xf32> to vector<2x32xf32>
    %635 = arith.mulf %634, %596 : vector<2x32xf32>
    %636 = vector.extract_strided_slice %631 {offsets = [0, 0], sizes = [2, 32], strides = [1, 1]} : vector<2x96xf32> to vector<2x32xf32>
    %637 = arith.mulf %636, %633 : vector<2x32xf32>
    %638 = arith.addf %635, %637 : vector<2x32xf32>
    %639 = vector.extract_strided_slice %631 {offsets = [0, 64], sizes = [2, 32], strides = [1, 1]} : vector<2x96xf32> to vector<2x32xf32>
    %640 = math.tanh %638 : vector<2x32xf32>
    %641 = arith.mulf %639, %640 : vector<2x32xf32>
    %642 = tpu.concatenate %599, %620 in 1 : vector<2x32xf32>, vector<2x32xf32> -> vector<2x64xf32>
    %643 = arith.truncf %642 : vector<2x64xf32> to vector<2x64xbf16>
    %cst_83 = arith.constant dense<0.000000e+00> : vector<2x128xf32>
    %644 = tpu.matmul %643, %48, %cst_83 {dimension_numbers = #tpu.dot_dimension_numbers<[1], [0], [0], [1], [0, 0, 1, 1], [], []>} : vector<2x64xbf16>, vector<64x128xbf16>, vector<2x128xf32> -> vector<2x128xf32>
    %645 = vector.broadcast %49 : vector<1x128xf32> to vector<2x128xf32>
    %646 = arith.addf %644, %645 : vector<2x128xf32>
    %647 = vector.extract_strided_slice %646 {offsets = [0, 0], sizes = [2, 96], strides = [1, 1]} : vector<2x128xf32> to vector<2x96xf32>
    %648 = arith.negf %647 : vector<2x96xf32>
    %649 = math.exp %648 : vector<2x96xf32>
    %cst_84 = arith.constant 1.000000e+00 : f32
    %650 = vector.broadcast %cst_84 : f32 to vector<2x96xf32>
    %651 = arith.addf %650, %649 : vector<2x96xf32>
    %652 = arith.divf %650, %651 : vector<2x96xf32>
    %653 = vector.extract_strided_slice %646 {offsets = [0, 96], sizes = [2, 32], strides = [1, 1]} : vector<2x128xf32> to vector<2x32xf32>
    %654 = math.tanh %653 : vector<2x32xf32>
    %655 = vector.extract_strided_slice %652 {offsets = [0, 32], sizes = [2, 32], strides = [1, 1]} : vector<2x96xf32> to vector<2x32xf32>
    %656 = arith.mulf %655, %617 : vector<2x32xf32>
    %657 = vector.extract_strided_slice %652 {offsets = [0, 0], sizes = [2, 32], strides = [1, 1]} : vector<2x96xf32> to vector<2x32xf32>
    %658 = arith.mulf %657, %654 : vector<2x32xf32>
    %659 = arith.addf %656, %658 : vector<2x32xf32>
    %660 = vector.extract_strided_slice %652 {offsets = [0, 64], sizes = [2, 32], strides = [1, 1]} : vector<2x96xf32> to vector<2x32xf32>
    %661 = math.tanh %659 : vector<2x32xf32>
    %662 = arith.mulf %660, %661 : vector<2x32xf32>
    %663 = vector.extract_strided_slice %46 {offsets = [15, 0, 0], sizes = [1, 2, 128], strides = [1, 1, 1]} : vector<16x2x128xf32> to vector<1x2x128xf32>
    %664 = vector.shape_cast %663 : vector<1x2x128xf32> to vector<2x128xf32>
    %665 = arith.truncf %641 : vector<2x32xf32> to vector<2x32xbf16>
    %cst_85 = arith.constant dense<0.000000e+00> : vector<2x128xf32>
    %666 = tpu.matmul %665, %47, %cst_85 {dimension_numbers = #tpu.dot_dimension_numbers<[1], [0], [0], [1], [0, 0, 1, 1], [], []>} : vector<2x32xbf16>, vector<32x128xbf16>, vector<2x128xf32> -> vector<2x128xf32>
    %667 = arith.addf %664, %666 : vector<2x128xf32>
    %668 = vector.extract_strided_slice %667 {offsets = [0, 0], sizes = [2, 96], strides = [1, 1]} : vector<2x128xf32> to vector<2x96xf32>
    %669 = arith.negf %668 : vector<2x96xf32>
    %670 = math.exp %669 : vector<2x96xf32>
    %cst_86 = arith.constant 1.000000e+00 : f32
    %671 = vector.broadcast %cst_86 : f32 to vector<2x96xf32>
    %672 = arith.addf %671, %670 : vector<2x96xf32>
    %673 = arith.divf %671, %672 : vector<2x96xf32>
    %674 = vector.extract_strided_slice %667 {offsets = [0, 96], sizes = [2, 32], strides = [1, 1]} : vector<2x128xf32> to vector<2x32xf32>
    %675 = math.tanh %674 : vector<2x32xf32>
    %676 = vector.extract_strided_slice %673 {offsets = [0, 32], sizes = [2, 32], strides = [1, 1]} : vector<2x96xf32> to vector<2x32xf32>
    %677 = arith.mulf %676, %638 : vector<2x32xf32>
    %678 = vector.extract_strided_slice %673 {offsets = [0, 0], sizes = [2, 32], strides = [1, 1]} : vector<2x96xf32> to vector<2x32xf32>
    %679 = arith.mulf %678, %675 : vector<2x32xf32>
    %680 = arith.addf %677, %679 : vector<2x32xf32>
    %681 = vector.extract_strided_slice %673 {offsets = [0, 64], sizes = [2, 32], strides = [1, 1]} : vector<2x96xf32> to vector<2x32xf32>
    %682 = math.tanh %680 : vector<2x32xf32>
    %683 = arith.mulf %681, %682 : vector<2x32xf32>
    %684 = tpu.concatenate %641, %662 in 1 : vector<2x32xf32>, vector<2x32xf32> -> vector<2x64xf32>
    %685 = arith.truncf %684 : vector<2x64xf32> to vector<2x64xbf16>
    %cst_87 = arith.constant dense<0.000000e+00> : vector<2x128xf32>
    %686 = tpu.matmul %685, %48, %cst_87 {dimension_numbers = #tpu.dot_dimension_numbers<[1], [0], [0], [1], [0, 0, 1, 1], [], []>} : vector<2x64xbf16>, vector<64x128xbf16>, vector<2x128xf32> -> vector<2x128xf32>
    %687 = vector.broadcast %49 : vector<1x128xf32> to vector<2x128xf32>
    %688 = arith.addf %686, %687 : vector<2x128xf32>
    %689 = vector.extract_strided_slice %688 {offsets = [0, 0], sizes = [2, 96], strides = [1, 1]} : vector<2x128xf32> to vector<2x96xf32>
    %690 = arith.negf %689 : vector<2x96xf32>
    %691 = math.exp %690 : vector<2x96xf32>
    %cst_88 = arith.constant 1.000000e+00 : f32
    %692 = vector.broadcast %cst_88 : f32 to vector<2x96xf32>
    %693 = arith.addf %692, %691 : vector<2x96xf32>
    %694 = arith.divf %692, %693 : vector<2x96xf32>
    %695 = vector.extract_strided_slice %688 {offsets = [0, 96], sizes = [2, 32], strides = [1, 1]} : vector<2x128xf32> to vector<2x32xf32>
    %696 = math.tanh %695 : vector<2x32xf32>
    %697 = vector.extract_strided_slice %694 {offsets = [0, 32], sizes = [2, 32], strides = [1, 1]} : vector<2x96xf32> to vector<2x32xf32>
    %698 = arith.mulf %697, %659 : vector<2x32xf32>
    %699 = vector.extract_strided_slice %694 {offsets = [0, 0], sizes = [2, 32], strides = [1, 1]} : vector<2x96xf32> to vector<2x32xf32>
    %700 = arith.mulf %699, %696 : vector<2x32xf32>
    %701 = arith.addf %698, %700 : vector<2x32xf32>
    %702 = vector.extract_strided_slice %694 {offsets = [0, 64], sizes = [2, 32], strides = [1, 1]} : vector<2x96xf32> to vector<2x32xf32>
    %703 = math.tanh %701 : vector<2x32xf32>
    %704 = arith.mulf %702, %703 : vector<2x32xf32>
    %705 = tpu.concatenate %683, %704 in 1 : vector<2x32xf32>, vector<2x32xf32> -> vector<2x64xf32>
    %706 = arith.truncf %705 : vector<2x64xf32> to vector<2x64xbf16>
    %cst_89 = arith.constant dense<0.000000e+00> : vector<2x128xf32>
    %707 = tpu.matmul %706, %48, %cst_89 {dimension_numbers = #tpu.dot_dimension_numbers<[1], [0], [0], [1], [0, 0, 1, 1], [], []>} : vector<2x64xbf16>, vector<64x128xbf16>, vector<2x128xf32> -> vector<2x128xf32>
    %708 = vector.broadcast %49 : vector<1x128xf32> to vector<2x128xf32>
    %709 = arith.addf %707, %708 : vector<2x128xf32>
    %710 = vector.extract_strided_slice %709 {offsets = [0, 0], sizes = [2, 96], strides = [1, 1]} : vector<2x128xf32> to vector<2x96xf32>
    %711 = arith.negf %710 : vector<2x96xf32>
    %712 = math.exp %711 : vector<2x96xf32>
    %cst_90 = arith.constant 1.000000e+00 : f32
    %713 = vector.broadcast %cst_90 : f32 to vector<2x96xf32>
    %714 = arith.addf %713, %712 : vector<2x96xf32>
    %715 = arith.divf %713, %714 : vector<2x96xf32>
    %716 = vector.extract_strided_slice %709 {offsets = [0, 96], sizes = [2, 32], strides = [1, 1]} : vector<2x128xf32> to vector<2x32xf32>
    %717 = math.tanh %716 : vector<2x32xf32>
    %718 = vector.extract_strided_slice %715 {offsets = [0, 32], sizes = [2, 32], strides = [1, 1]} : vector<2x96xf32> to vector<2x32xf32>
    %719 = arith.mulf %718, %701 : vector<2x32xf32>
    %720 = vector.extract_strided_slice %715 {offsets = [0, 0], sizes = [2, 32], strides = [1, 1]} : vector<2x96xf32> to vector<2x32xf32>
    %721 = arith.mulf %720, %717 : vector<2x32xf32>
    %722 = arith.addf %719, %721 : vector<2x32xf32>
    %723 = vector.extract_strided_slice %715 {offsets = [0, 64], sizes = [2, 32], strides = [1, 1]} : vector<2x96xf32> to vector<2x32xf32>
    %724 = math.tanh %722 : vector<2x32xf32>
    %725 = arith.mulf %723, %724 : vector<2x32xf32>
    %726 = arith.truncf %725 : vector<2x32xf32> to vector<2x32xbf16>
    %c848 = arith.constant 848 : index
    %c0_91 = arith.constant 0 : index
    %727 = vector.load %arg2[%c848, %c0_91] : memref<1136x128xbf16, #tpu.memory_space<vmem>>, vector<32x128xbf16>
    %cst_92 = arith.constant dense<0.000000e+00> : vector<2x128xf32>
    %728 = tpu.matmul %726, %727, %cst_92 {dimension_numbers = #tpu.dot_dimension_numbers<[1], [0], [0], [1], [0, 0, 1, 1], [], []>} : vector<2x32xbf16>, vector<32x128xbf16>, vector<2x128xf32> -> vector<2x128xf32>
    %c5 = arith.constant 5 : index
    %c0_93 = arith.constant 0 : index
    %729 = vector.load %arg3[%c5, %c0_93] : memref<8x128xf32, #tpu.memory_space<vmem>>, vector<1x128xf32>
    %730 = vector.broadcast %729 : vector<1x128xf32> to vector<2x128xf32>
    %731 = arith.addf %728, %730 : vector<2x128xf32>
    %732 = arith.truncf %37 : vector<2x128xf32> to vector<2x128xbf16>
    %c880 = arith.constant 880 : index
    %c0_94 = arith.constant 0 : index
    %733 = vector.load %arg2[%c880, %c0_94] : memref<1136x128xbf16, #tpu.memory_space<vmem>>, vector<128x128xbf16>
    %cst_95 = arith.constant dense<0.000000e+00> : vector<2x128xf32>
    %734 = tpu.matmul %732, %733, %cst_95 {dimension_numbers = #tpu.dot_dimension_numbers<[1], [0], [0], [1], [0, 0, 1, 1], [], []>} : vector<2x128xbf16>, vector<128x128xbf16>, vector<2x128xf32> -> vector<2x128xf32>
    %735 = arith.truncf %731 : vector<2x128xf32> to vector<2x128xbf16>
    %c1008 = arith.constant 1008 : index
    %c0_96 = arith.constant 0 : index
    %736 = vector.load %arg2[%c1008, %c0_96] : memref<1136x128xbf16, #tpu.memory_space<vmem>>, vector<128x128xbf16>
    %cst_97 = arith.constant dense<0.000000e+00> : vector<2x128xf32>
    %737 = tpu.matmul %735, %736, %cst_97 {dimension_numbers = #tpu.dot_dimension_numbers<[1], [0], [0], [1], [0, 0, 1, 1], [], []>} : vector<2x128xbf16>, vector<128x128xbf16>, vector<2x128xf32> -> vector<2x128xf32>
    %738 = arith.addf %734, %737 : vector<2x128xf32>
    %c6 = arith.constant 6 : index
    %c0_98 = arith.constant 0 : index
    %739 = vector.load %arg3[%c6, %c0_98] : memref<8x128xf32, #tpu.memory_space<vmem>>, vector<1x128xf32>
    %740 = vector.broadcast %739 : vector<1x128xf32> to vector<2x128xf32>
    %741 = arith.addf %738, %740 : vector<2x128xf32>
    %c0_99 = arith.constant 0 : index
    %c0_100 = arith.constant 0 : index
    %742 = vector.load %arg4[%c0_99, %c0_100] : memref<2x128xf32, #tpu.memory_space<vmem>>, vector<2x128xf32>
    tpu.vector_store %arg4[%c0_99, %c0_100], %741 {strides = array<i32>} : memref<2x128xf32, #tpu.memory_space<vmem>>, vector<2x128xf32>,
    return
  }
  func.func @transform_0(%arg0: i32) -> (i32, i32) {
    %c0_i32 = arith.constant 0 : i32
    %c0_i32_0 = arith.constant 0 : i32
    return %arg0, %c0_i32 : i32, i32
  }
  func.func @transform_1(%arg0: i32) -> (i32, i32) {
    %c0_i32 = arith.constant 0 : i32
    %c0_i32_0 = arith.constant 0 : i32
    %c0_i32_1 = arith.constant 0 : i32
    return %c0_i32, %c0_i32_0 : i32, i32
  }
  func.func @transform_2(%arg0: i32) -> (i32, i32) {
    %c0_i32 = arith.constant 0 : i32
    %c0_i32_0 = arith.constant 0 : i32
    %c0_i32_1 = arith.constant 0 : i32
    return %c0_i32, %c0_i32_0 : i32, i32
  }
  func.func @transform_3(%arg0: i32) -> (i32, i32) {
    %c0_i32 = arith.constant 0 : i32
    %c0_i32_0 = arith.constant 0 : i32
    return %arg0, %c0_i32 : i32, i32
  }
}

</mosaic_0001>

<bundles_post_ra>
// kernel: tpu_custom_call.1
= control target key start
LH: loop header
LB: loop body
LE: loop exit
PB: predicated region body
PF: predicated region fallthrough
CT: control target
= control target key end

     0   :  { %8 = vsyncpa [#allocation3], 0  ;;  %s5987_s0 = inlined_call_operand.vmem [shape: f32[32,24], index: 0, kind: input, shape index: {}]   ;;  %s5988_s1 = inlined_call_operand.hbm [shape: bf16[1136,128], index: 1, kind: input, shape index: {}]   ;;  %s5989_s2 = inlined_call_operand.vmem [shape: f32[8,128], index: 2, kind: input, shape index: {}]   ;;  %s5990_s3 = inlined_call_operand.hbm [shape: f32[2,128], index: 3, kind: output, shape index: {}]  }
   0x1   :  { %9 = vsyncpa [#allocation4], 0  ;;  %s5097_s12 = smov [#allocation2]  }
   0x2   :  { %s17_s13 = sshll.u32 %s5097_s12, 4  ;;  %s18_s13 = int_to_ptr.vmem [resolvable:$true] %s17_s13 }
   0x3   :  { %s5061_s14 = scalar_lea.vmem %s18_s13, 9088  ;;  %p5066_p1 = scmp.lt.s32.totalorder %s18_s13, %s18_s13 }
   0x4   :  { %p5062_p0 = scmp.ne.s32.totalorder %s18_s13, %s5061_s14  ;;  %p5067_p2 = scmp.lt.s32.totalorder %s5061_s14, %s5061_s14 }
   0x6   :  { %p5068_p3 = por %p5067_p2, %p5066_p1 }
   0x8   :  { %p5069_p4 = pnand %p5068_p3, %p5062_p0 }
   0xa   :  { %5072 = shalt.err (!%p5069_p4)
}
   0xb   :  { %s5098_s15 = smov 64   ;;  %s5099_s16 = smov 4  }
   0xc   :  { %23 = dma.hbm_to_vmem [thread:$0]  %s5988_s1, 9088, %s18_s13, [#allocation3], %s5098_s15, %s5098_s15, %s5099_s16  }
   0xd   :  { %5093 = dma.done.wait [#allocation3], 9088  }
   0xe   :  { %5094 = vsyncadd [#allocation3], 4294958208  ;;  %vm60_vm0 = vcmask 1043456   ;;  %v4713_v0 = vld [vmem:[#allocation2 + $0x8] ss:$0 sps:$4 sm:$0xff]   ;;  %v4714_v1 = vld [vmem:[#allocation2] sm:$0xff]   ;;  %v125_v23 = vlaneseq }
   0xf   :  { %v30_v2 = vld [vmem:[%s5987_s0] sm:$0xff]  ;;  %4693 = vmatprep.subr.msk.bf16.mxu0 %vm60_vm0, %v4713_v0  ;;  %v62_v3 = vsel %vm60_vm0, %v4713_v0, 0  ;;  %v31_v4 = vld [vmem:[%s5987_s0 + $0x8] sm:$0xff]  ;;  %vm53_vm1 = vcmask 195584   ;;  %v32_v5 = vld [vmem:[%s5987_s0 + $0x10] sm:$0xff]  ;;  %s5100_s26 = smov 120  }
  0x10   :  { %v33_v6 = vld [vmem:[%s5987_s0 + $0x18] sm:$0xff]  ;;  %4312 = vmatpush3.bf16.msra.mxu0 %v62_v3  ;;  %v5149_v7 = vpack.c.bf16 %v31_v4, %v30_v2  ;;  %v4715_v9 = vld [vmem:[#allocation2 + $0x48] sm:$0xff]   ;;  %v5101_v10 = vmov 0   ;;  %v4716_v11 = vld [vmem:[#allocation2 + $0x40] sm:$0xff]   ;;  %v5102_v21 = vmov 1983009808  }
  0x11   :  { %4313 = vmatprep.subr.bf16.mxu0 %v4714_v1  ;;  %v35_v8 = vpack.c.bf16 %v33_v6, %v32_v5  ;;  %496 = vmatprep.subr.bf16.mxu1 %v5101_v10  ;;  %v4717_v12 = vld [vmem:[#allocation2 + $0x38] sm:$0xff]   ;;  %v4718_v13 = vld [vmem:[#allocation2 + $0x30] sm:$0xff]   ;;  %v4719_v14 = vld [vmem:[#allocation2 + $0x28] sm:$0xff]   ;;  %v123_v22 = vunpack.c.l.s4 %v5102_v21  ;;  %v5165_v25 = vshrl.u32 %v125_v23, 7  ;;  %vm205_vm2 = vcmask 517120   ;;  %s5107_s5 = smov 32  }
  0x12   :  { %4315 = vmatprep.mubr.msk.bf16.mxu0 %vm53_vm1, %v5149_v7  ;;  %497 = vmatpush1.bf16.msra.mxu1 %v4715_v9  ;;  %v4720_v15 = vld [vmem:[#allocation2 + $0x20] sm:$0xff]   ;;  %v4721_v16 = vld [vmem:[#allocation2 + $0x18] sm:$0xff]   ;;  %v4722_v17 = vld [vmem:[#allocation2 + $0x10] sm:$0xff]   ;;  %vm334_vm3 = vcmask 1042434   ;;  %vm336_vm4 = vcmask 1043459   ;;  %vm338_vm5 = vcmask 1044484  }
  0x13   :  { %1042 = vrot.lane.b32.xlu1 %v35_v8, %s5100_s26  ;;  %498 = vmatprep.subr.bf16.mxu1 %v5101_v10  ;;  %v4723_v18 = vld [vmem:[#allocation2 + $0x68] sm:$0xff]   ;;  %v4724_v19 = vld [vmem:[#allocation2 + $0x60] sm:$0xff]   ;;  %v4725_v20 = vld [vmem:[#allocation2 + $0x58] sm:$0xff]   ;;  %v124_v24 = vunpack.c.0.s8 %v123_v22  ;;  %vm340_vm6 = vcmask 1045509   ;;  %vm342_vm7 = vcmask 1046534   ;;  %vm344_vm8 = vcmask 1047559  }
  0x14   :  { %4314 = vmatpush3.bf16.msra.mxu0 %v4714_v1  ;;  %v5170_v26 = vld [vmem:[%s5989_s2] ss:$0 sm:$0xff]  ;;  %vm356_vm9 = vcmask 1040384   ;;  %vm378_vm10 = vcmask 1045504   ;;  %vm365_vm11 = vcmask 1046528   ;;  %vm387_vm12 = vcmask 523264  }
  0x15   :  { %v5174_v29 = vsub.s32 %v124_v24, %v5165_v25  ;;  %vm1044_vm13 = vcmask 64512   ;;  %vm5104_vm14 = vmmov 0   ;;  %vm583_vm15 = vcmask 1041408   ;;  %s5108_s10 = smov 96   ;;  %s5109_s19 = smov [#allocation5]  }
  0x16   :  { %499 = vmatpush1.bf16.msra.mxu1 %v4716_v11  ;;  %s3956_s20 = sshll.u32 %s5109_s19, 4  ;;  %s3957_s20 = int_to_ptr.vmem [resolvable:$true] %s3956_s20 }
  0x17   :  { %4316 = vmatmul.mubr.msk.bf16.vlgmr.msra.gmra.mxu0 %vm53_vm1, %v35_v8  ;;  %500 = vmatprep.subr.bf16.mxu1 %v5101_v10  ;;  %vm1260_vm1 = vcmask 261120   ;;  %s5073_s21 = scalar_lea.vmem %s3957_s20, 32  ;;  %p5078_p6 = scmp.lt.s32.totalorder %s3957_s20, %s3957_s20 }
  0x18   :  { %p5074_p5 = scmp.ne.s32.totalorder %s3957_s20, %s5073_s21  ;;  %p5079_p7 = scmp.lt.s32.totalorder %s5073_s21, %s5073_s21 }
  0x1a   :  { %501 = vmatpush1.bf16.msra.mxu1 %v4717_v12  ;;  %p5080_p8 = por %p5079_p7, %p5078_p6 }
  0x1b   :  { %502 = vmatprep.subr.bf16.mxu1 %v5101_v10 }
  0x1c   :  { %p5081_p9 = pnand %p5080_p8, %p5074_p5 }
  0x1e   :  { %503 = vmatpush1.bf16.msra.mxu1 %v4718_v13 }
  0x1f   :  { %504 = vmatprep.subr.bf16.mxu1 %v5101_v10 }
  0x22   :  { %505 = vmatpush1.bf16.msra.mxu1 %v4719_v14 }
  0x23   :  { %506 = vmatprep.subr.bf16.mxu1 %v5101_v10 }
  0x26   :  { %507 = vmatpush1.bf16.msra.mxu1 %v4720_v15 }
  0x27   :  { %508 = vmatprep.subr.bf16.mxu1 %v5101_v10 }
  0x2a   :  { %509 = vmatpush1.bf16.msra.mxu1 %v4721_v16 }
  0x2b   :  { %510 = vmatprep.subr.bf16.mxu1 %v5101_v10 }
  0x2e   :  { %511 = vmatpush1.bf16.msra.mxu1 %v4722_v17 }
  0x2f   :  { %520 = vmatprep.subr.bf16.mxu1 %v5101_v10 }
  0x32   :  { %521 = vmatpush2.bf16.msra.mxu1 %v4723_v18 }
  0x33   :  { %522 = vmatprep.subr.bf16.mxu1 %v5101_v10 }
  0x36   :  { %523 = vmatpush2.bf16.msra.mxu1 %v4724_v19 }
  0x37   :  { %524 = vmatprep.subr.bf16.mxu1 %v5101_v10 }
  0x3a   :  { %525 = vmatpush2.bf16.msra.mxu1 %v4725_v20 }
  0x3b   :  { %526 = vmatprep.subr.bf16.mxu1 %v5101_v10 }
  0xd7   :  { %v4317_v27 = vpop.f32.mrf.mxu0 }
  0xd8   :  { %v107_v28 = vadd.f32 %v4317_v27, %v5170_v26 }
  0xd9   :  { %v98_v30 = vpop.f32.mrf.mxu0 }
  0xda   :  { %v115_v31 = vmax.f32 %v107_v28, 0.0  ;;  %v99_v32 = vadd.f32 %v5170_v26, %v98_v30 }
  0xdb   :  { %v4318_v36 = vpop.f32.mrf.mxu0 }
  0xdc   :  { %v155_v33 = vcombine.high %v115_v31, %v115_v31  ;;  %v162_v34 = vrot.slane %v115_v31, %v5174_v29  ;;  %v113_v35 = vmax.f32 %v99_v32, 0.0  ;;  %v110_v43 = vadd.f32 %v4318_v36, %v5170_v26 }
  0xdd   :  { %v101_v30 = vpop.f32.mrf.mxu0 }
  0xde   :  { %v169_v37 = vrot.slane %v155_v33, %v5174_v29  ;;  %v170_v38 = vcombine.high %v162_v34, %v162_v34  ;;  %v262_v39 = vsel %vm205_vm2, %v162_v34, -inf  ;;  %v121_v40 = vcombine.high %v113_v35, %v113_v35 }
  0xdf   :  { %v263_v41 = vrot.slane %v262_v39, 4  ;;  %v128_v42 = vrot.slane %v113_v35, %v5174_v29  ;;  %v116_v13 = vmax.f32 %v110_v43, 0.0 }
  0xe0   :  { %v171_v44 = vcombine.high %v169_v37, %v169_v37  ;;  %v269_v45 = vsel %vm205_vm2, %v170_v38, -inf  ;;  %v276_v46 = vsel %vm205_vm2, %v169_v37, -inf  ;;  %v135_v47 = vrot.slane %v121_v40, %v5174_v29 }
  0xe1   :  { %v264_v48 = vmax.f32 %v262_v39, %v263_v41  ;;  %v270_v49 = vrot.slane %v269_v45, 4  ;;  %v277_v50 = vrot.slane %v276_v46, 4  ;;  %v136_v51 = vcombine.high %v128_v42, %v128_v42 }
  0xe2   :  { %v283_v52 = vsel %vm205_vm2, %v171_v44, -inf  ;;  %v137_v53 = vcombine.high %v135_v47, %v135_v47  ;;  %v206_v54 = vsel %vm205_vm2, %v128_v42, -inf  ;;  %v220_v55 = vsel %vm205_vm2, %v135_v47, -inf }
  0xe3   :  { %v265_v56 = vrot.slane %v264_v48, 2  ;;  %v271_v57 = vmax.f32 %v269_v45, %v270_v49  ;;  %v278_v58 = vmax.f32 %v276_v46, %v277_v50  ;;  %v284_v59 = vrot.slane %v283_v52, 4 }
  0xe4   :  { %v207_v60 = vrot.slane %v206_v54, 4  ;;  %v213_v61 = vsel %vm205_vm2, %v136_v51, -inf  ;;  %v221_v62 = vrot.slane %v220_v55, 4  ;;  %v227_v63 = vsel %vm205_vm2, %v137_v53, -inf }
  0xe5   :  { %v266_v0 = vmax.f32 %v264_v48, %v265_v56  ;;  %v272_v1 = vrot.slane %v271_v57, 2  ;;  %v279_v2 = vrot.slane %v278_v58, 2  ;;  %v285_v3 = vmax.f32 %v283_v52, %v284_v59 }
  0xe6   :  { %v208_v4 = vmax.f32 %v206_v54, %v207_v60  ;;  %v214_v5 = vrot.slane %v213_v61, 4  ;;  %v222_v6 = vmax.f32 %v220_v55, %v221_v62  ;;  %v228_v8 = vrot.slane %v227_v63, 4 }
  0xe7   :  { %v273_v9 = vmax.f32 %v271_v57, %v272_v1  ;;  %v280_v11 = vmax.f32 %v278_v58, %v279_v2  ;;  %v286_v12 = vrot.slane %v285_v3, 2  ;;  %v267_v18 = vrot.slane %v266_v0, 1 }
  0xe8   :  { %v209_v14 = vrot.slane %v208_v4, 2  ;;  %v215_v15 = vmax.f32 %v213_v61, %v214_v5  ;;  %v223_v16 = vrot.slane %v222_v6, 2  ;;  %v229_v17 = vmax.f32 %v227_v63, %v228_v8 }
  0xe9   :  { %v274_v19 = vrot.slane %v273_v9, 1  ;;  %v287_v20 = vmax.f32 %v285_v3, %v286_v12  ;;  %v281_v21 = vrot.slane %v280_v11, 1  ;;  %v172_v28 = vcombine.high %v116_v13, %v116_v13 }
  0xea   :  { %v210_v22 = vmax.f32 %v208_v4, %v209_v14  ;;  %v216_v23 = vrot.slane %v215_v15, 2  ;;  %v224_v24 = vmax.f32 %v222_v6, %v223_v16  ;;  %v230_v32 = vrot.slane %v229_v17, 2 }
  0xeb   :  { %v275_v27 = vmax.f32 %v273_v9, %v274_v19  ;;  %v288_v31 = vrot.slane %v287_v20, 1  ;;  %v268_v33 = vmax.f32 %v266_v0, %v267_v18  ;;  %v179_v35 = vrot.slane %v116_v13, %v5174_v29 }
  0xec   :  { %v217_v34 = vmax.f32 %v215_v15, %v216_v23  ;;  %v186_v36 = vrot.slane %v172_v28, %v5174_v29  ;;  %v282_v37 = vmax.f32 %v280_v11, %v281_v21  ;;  %v211_v38 = vrot.slane %v210_v22, 1 }
  0xed   :  { %v225_v39 = vrot.slane %v224_v24, 1  ;;  %v102_v40 = vadd.f32 %v5170_v26, %v101_v30  ;;  %v346_v41 = vsel %vm334_vm3, %v275_v27, %v268_v33  ;;  %v187_v42 = vcombine.high %v179_v35, %v179_v35 }
  0xee   :  { %v188_v43 = vcombine.high %v186_v36, %v186_v36  ;;  %v290_v44 = vsel %vm205_vm2, %v179_v35, -inf  ;;  %v289_v45 = vmax.f32 %v287_v20, %v288_v31  ;;  %v231_v46 = vmax.f32 %v229_v17, %v230_v32 }
  0xef   :  { %v291_v47 = vrot.slane %v290_v44, 4  ;;  %v304_v48 = vsel %vm205_vm2, %v186_v36, -inf  ;;  %v218_v49 = vrot.slane %v217_v34, 1  ;;  %v297_v50 = vsel %vm205_vm2, %v187_v42, -inf }
  0xf0   :  { %v305_v51 = vrot.slane %v304_v48, 4  ;;  %v311_v52 = vsel %vm205_vm2, %v188_v43, -inf  ;;  %v347_v26 = vsel %vm336_vm4, %v282_v37, %v346_v41  ;;  %v298_v54 = vrot.slane %v297_v50, 4 }
  0xf1   :  { %v292_v53 = vmax.f32 %v290_v44, %v291_v47  ;;  %v312_v55 = vrot.slane %v311_v52, 4  ;;  %v212_v56 = vmax.f32 %v210_v22, %v211_v38  ;;  %v226_v57 = vmax.f32 %v224_v24, %v225_v39 }
  0xf2   :  { %v306_v58 = vmax.f32 %v304_v48, %v305_v51  ;;  %v114_v59 = vmax.f32 %v102_v40, 0.0  ;;  %v232_v60 = vrot.slane %v231_v46, 1  ;;  %v299_v62 = vmax.f32 %v297_v50, %v298_v54 }
  0xf3   :  { %v293_v61 = vrot.slane %v292_v53, 2  ;;  %v313_v63 = vmax.f32 %v311_v52, %v312_v55  ;;  %v219_v0 = vmax.f32 %v217_v34, %v218_v49  ;;  %v348_v8 = vsel %vm338_vm5, %v289_v45, %v347_v26  ;;  %v4726_v55 = vld [vmem:[#allocation2 + $0x50] sm:$0xff]  }
  0xf4   :  { %v307_v1 = vrot.slane %v306_v58, 2  ;;  %v138_v2 = vcombine.high %v114_v59, %v114_v59  ;;  %v145_v3 = vrot.slane %v114_v59, %v5174_v29  ;;  %v300_v5 = vrot.slane %v299_v62, 2  ;;  %527 = vmatpush2.bf16.msra.mxu1 %v4726_v55 }
  0xf5   :  { %v294_v4 = vmax.f32 %v292_v53, %v293_v61  ;;  %v314_v6 = vrot.slane %v313_v63, 2  ;;  %v335_v28 = vsel %vm334_vm3, %v219_v0, %v212_v56  ;;  %v233_v37 = vmax.f32 %v231_v46, %v232_v60  ;;  %v1032_v56 = vld [vmem:[#allocation2 + $0x170] sm:$0xf] }
  0xf6   :  { %v308_v9 = vmax.f32 %v306_v58, %v307_v1  ;;  %v152_v11 = vrot.slane %v138_v2, %v5174_v29  ;;  %v153_v12 = vcombine.high %v145_v3, %v145_v3  ;;  %v234_v13 = vsel %vm205_vm2, %v145_v3, -inf  ;;  %4694 = vmatprep.subr.msk.bf16.mxu1 %vm60_vm0, %v1032_v56 }
  0xf7   :  { %v295_v14 = vrot.slane %v294_v4, 1  ;;  %v301_v15 = vmax.f32 %v299_v62, %v300_v5  ;;  %v235_v16 = vrot.slane %v234_v13, 4  ;;  %v315_v17 = vmax.f32 %v313_v63, %v314_v6 }
  0xf8   :  { %v309_v18 = vrot.slane %v308_v9, 1  ;;  %v154_v19 = vcombine.high %v152_v11, %v152_v11  ;;  %v241_v20 = vsel %vm205_vm2, %v153_v12, -inf  ;;  %v248_v21 = vsel %vm205_vm2, %v152_v11, -inf }
  0xf9   :  { %v296_v22 = vmax.f32 %v294_v4, %v295_v14  ;;  %v302_v23 = vrot.slane %v301_v15, 1  ;;  %v236_v24 = vmax.f32 %v234_v13, %v235_v16  ;;  %v242_v27 = vrot.slane %v241_v20, 4 }
  0xfa   :  { %v249_v30 = vrot.slane %v248_v21, 4  ;;  %v255_v31 = vsel %vm205_vm2, %v154_v19, -inf  ;;  %v316_v32 = vrot.slane %v315_v17, 1  ;;  %v337_v40 = vsel %vm336_vm4, %v226_v57, %v335_v28 }
  0xfb   :  { %v303_v33 = vmax.f32 %v301_v15, %v302_v23  ;;  %v349_v34 = vsel %vm340_vm6, %v296_v22, %v348_v8  ;;  %v237_v35 = vrot.slane %v236_v24, 2  ;;  %v243_v36 = vmax.f32 %v241_v20, %v242_v27 }
  0xfc   :  { %v250_v38 = vmax.f32 %v248_v21, %v249_v30  ;;  %v256_v39 = vrot.slane %v255_v31, 4  ;;  %v310_v41 = vmax.f32 %v308_v9, %v309_v18  ;;  %v317_v50 = vmax.f32 %v315_v17, %v316_v32 }
  0xfd   :  { %v238_v42 = vmax.f32 %v236_v24, %v237_v35  ;;  %v244_v43 = vrot.slane %v243_v36, 2  ;;  %v350_v47 = vsel %vm342_vm7, %v303_v33, %v349_v34  ;;  %v339_v26 = vsel %vm338_vm5, %v233_v37, %v337_v40  ;;  %v1043_v34 = vpop.permute.xlu1 %1042  ;;  %v5231_v35 = vld [vmem:[#allocation2 + $0x178] sm:$0xff]   ;;  %v4730_v37 = vld [vmem:[#allocation2 + $0xa8] sm:$0xff]  }
  0xfe   :  { %v251_v44 = vrot.slane %v250_v38, 2  ;;  %v257_v45 = vmax.f32 %v255_v31, %v256_v39  ;;  %v351_v54 = vsel %vm344_vm8, %v310_v41, %v350_v47  ;;  %v360_v61 = vsel %vm356_vm9, %v317_v50, 0.0  ;;  %v4732_v39 = vld [vmem:[#allocation2 + $0xa0] sm:$0xff]   ;;  %v4734_v40 = vld [vmem:[#allocation2 + $0x98] sm:$0xff]   ;;  %v4735_v41 = vld [vmem:[#allocation2 + $0xd0] sm:$0xff]  }
  0xff   :  { %v239_v48 = vrot.slane %v238_v42, 1  ;;  %v245_v49 = vmax.f32 %v243_v36, %v244_v43  ;;  %v358_v0 = vsel %vm356_vm9, 0.0, %v351_v54  ;;  %v383_v4 = vrot.slane %v360_v61, 2  ;;  %v4729_v36 = vld [vmem:[#allocation2 + $0xe8] sm:$0xff]   ;;  %v4740_v47 = vld [vmem:[#allocation2 + $0x80] sm:$0xff]   ;;  %v4743_v50 = vld [vmem:[#allocation2 + $0xb0] sm:$0xff]  }
 0x100   :  { %v252_v51 = vmax.f32 %v250_v38, %v251_v44  ;;  %v258_v52 = vrot.slane %v257_v45, 2  ;;  %v382_v6 = vrot.slane %v358_v0, 2  ;;  %v369_v8 = vrot.slane %v358_v0, 1  ;;  %4115 = vmatprep.subr.bf16.mxu0 %v4729_v36  ;;  %v4731_v38 = vld [vmem:[#allocation2 + $0xe0] sm:$0xff]   ;;  %v4737_v43 = vld [vmem:[#allocation2 + $0xc8] sm:$0xff]  }
 0x101   :  { %v240_v46 = vmax.f32 %v238_v42, %v239_v48  ;;  %v246_v53 = vrot.slane %v245_v49, 1  ;;  %v370_v9 = vrot.slane %v360_v61, 1  ;;  %v1052_v31 = vsel %vm60_vm0, %v1032_v56, 0  ;;  %4116 = vmatpush3.bf16.msra.mxu0 %v4730_v37  ;;  %v4736_v42 = vld [vmem:[#allocation2 + $0x90] sm:$0xff]   ;;  %v4738_v44 = vld [vmem:[#allocation2 + $0x88] sm:$0xff]   ;;  %v4741_v48 = vld [vmem:[#allocation2 + $0xb8] sm:$0xff]  }
 0x102   :  { %v253_v57 = vrot.slane %v252_v51, 1  ;;  %v259_v58 = vmax.f32 %v257_v45, %v258_v52  ;;  %v384_v17 = vsel %vm378_vm10, %v382_v6, %v383_v4  ;;  %v5103_v33 = vmov 0.0   ;;  %4117 = vmatprep.subr.bf16.mxu0 %v4731_v38  ;;  %v4739_v45 = vld [vmem:[#allocation2 + $0xc0] sm:$0xff]   ;;  %v4745_v52 = vld [vmem:[#allocation2 + $0x168] sm:$0xff]  }
 0x103   :  { %v247_v59 = vmax.f32 %v245_v49, %v246_v53  ;;  %v341_v60 = vsel %vm340_vm6, %v240_v46, %v339_v26  ;;  %v371_v19 = vsel %vm365_vm11, %v369_v8, %v370_v9  ;;  %v4742_v49 = vld [vmem:[#allocation2 + $0x78] sm:$0xff]   ;;  %v3970_v26 = vld [vmem:[%s5989_s2 + $0x1] ss:$0 sm:$0xff]  ;;  %v5105_v53 = vmov 1934713408  }
 0x104   :  { %v254_v62 = vmax.f32 %v252_v51, %v253_v57  ;;  %v260_v63 = vrot.slane %v259_v58, 1  ;;  %v4744_v51 = vld [vmem:[#allocation2 + $0x70] sm:$0xff]   ;;  %v1136_v54 = vunpack.c.l.s4 %v5105_v53  ;;  %v5256_v9 = vld [vmem:[%s5989_s2 + $0x3] ss:$0 sm:$0xff]  ;;  %vm648_vm0 = vcmask 1041409  }
 0x105   :  { %v343_v1 = vsel %vm342_vm7, %v247_v59, %v341_v60  ;;  %4118 = vmatpush3.bf16.msra.mxu0 %v4732_v39 }
 0x106   :  { %v261_v2 = vmax.f32 %v259_v58, %v260_v63  ;;  %v345_v3 = vsel %vm344_vm8, %v254_v62, %v343_v1  ;;  %v1137_v59 = vunpack.c.0.s8 %v1136_v54 }
 0x107   :  { %v357_v5 = vsel %vm356_vm9, 0.0, %v345_v3 }
 0x108   :  { %v359_v11 = vsel %vm356_vm9, %v261_v2, 0.0  ;;  %v379_v12 = vrot.slane %v357_v5, 2  ;;  %v366_v13 = vrot.slane %v357_v5, 1 }
 0x109   :  { %v380_v14 = vrot.slane %v359_v11, 2  ;;  %v367_v15 = vrot.slane %v359_v11, 1  ;;  %v5259_v11 = vsub.s32 %v1137_v59, %v5165_v25 }
 0x10b   :  { %v381_v16 = vsel %vm378_vm10, %v379_v12, %v380_v14  ;;  %v368_v18 = vsel %vm365_vm11, %v366_v13, %v367_v15 }
 0x10c   :  { %v391_v20 = vpack.c.bf16 %v384_v17, %v381_v16  ;;  %v4708_v21 = vpack.i.bf16 %v371_v19, %v368_v18 }
 0x10e   :  { %3983 = vmatprep.mubr.msk.bf16.mxu1 %vm387_vm12, %v391_v20  ;;  %4709 = vrot.lane.b32.xlu0 %v4708_v21, %s5098_s15 }
 0x112   :  { %1040 = vrot.lane.b32.xlu0 %v5149_v7, %s5100_s26  ;;  %v5228_v7 = vld [vmem:[#allocation2 + $0x180] sm:$0xff]  }
 0x180   :  { %v4710_v22 = vpop.permute.xlu0 %4709 }
 0x181   :  { %v4712_v23 = vunpack.i.h.bf16 %v4710_v22  ;;  %v4711_v24 = vunpack.i.l.bf16 %v4710_v22 }
 0x183   :  { %v388_v27 = vsel %vm387_vm12, %v357_v5, %v4711_v24  ;;  %v389_v28 = vsel %vm387_vm12, %v358_v0, %v4712_v23  ;;  %v5106_v0 = vmov 1935823168  }
 0x184   :  { %v390_v30 = vpack.c.bf16 %v389_v28, %v388_v27  ;;  %v1041_v32 = vpop.permute.xlu0 %1040  ;;  %v5249_v1 = vunpack.c.l.s4 %v5106_v0 }
 0x186   :  { %529 = vmatmul.mubr.bf16.vlgmr.msra.gmra.mxu1 %v390_v30  ;;  %v659_v24 = vunpack.c.0.s8 %v5249_v1 }
 0x187   :  { %4320 = vmatpush3.bf16.msra.mxu1 %v1052_v31  ;;  %4321 = vmatprep.mubr.msk.bf16.mxu1 %vm1044_vm13, %v1041_v32 }
 0x188   :  { %4325 = vmatprep.subr.bf16.mxu1 %v5103_v33 }
 0x18e   :  { %4322 = vmatmul.mubr.msk.bf16.vlgmr.msra.gmra.mxu1 %vm1044_vm13, %v1043_v34 }
 0x18f   :  { %4326 = vmatpush3.bf16.msra.mxu1 %v5228_v7  ;;  %4329 = vmatprep.mubr.msk.bf16.mxu1 %vm5104_vm14, %v5103_v33 }
 0x190   :  { %4327 = vmatprep.subr.bf16.mxu1 %v5103_v33 }
 0x193   :  { %4328 = vmatpush3.bf16.msra.mxu1 %v5231_v35 }
 0x194   :  { %4333 = vmatprep.subr.bf16.mxu1 %v5103_v33 }
 0x196   :  { %4330 = vmatmul.mubr.bf16.vlgmr.msra.gmra.mxu1 %v5101_v10  ;;  %v4733_v10 = vld [vmem:[#allocation2 + $0xd8] sm:$0xff]  }
 0x197   :  { %4334 = vmatpush3.bf16.msra.mxu1 %v5228_v7  ;;  %4337 = vmatprep.mubr.msk.bf16.mxu1 %vm5104_vm14, %v5103_v33 }
 0x198   :  { %4335 = vmatprep.subr.bf16.mxu1 %v5103_v33  ;;  %4119 = vmatprep.subr.bf16.mxu0 %v4733_v10 }
 0x199   :  { %4120 = vmatpush3.bf16.msra.mxu0 %v4734_v40 }
 0x19a   :  { %4121 = vmatprep.subr.bf16.mxu0 %v4735_v41 }
 0x19b   :  { %4336 = vmatpush3.bf16.msra.mxu1 %v5231_v35 }
 0x19c   :  { %4353 = vmatprep.subr.bf16.mxu1 %v5103_v33 }
 0x19d   :  { %4122 = vmatpush3.bf16.msra.mxu0 %v4736_v42 }
 0x19e   :  { %4123 = vmatprep.subr.bf16.mxu0 %v4737_v43 }
 0x1a1   :  { %4124 = vmatpush3.bf16.msra.mxu0 %v4738_v44 }
 0x1a2   :  { %4125 = vmatprep.subr.bf16.mxu0 %v4739_v45 }
 0x1a5   :  { %4126 = vmatpush3.bf16.msra.mxu0 %v4740_v47 }
 0x1a6   :  { %4127 = vmatprep.subr.bf16.mxu0 %v4741_v48 }
 0x1a9   :  { %4128 = vmatpush3.bf16.msra.mxu0 %v4742_v49 }
 0x1aa   :  { %4129 = vmatprep.subr.bf16.mxu0 %v4743_v50 }
 0x1ad   :  { %4130 = vmatpush3.bf16.msra.mxu0 %v4744_v51 }
 0x1ae   :  { %4137 = vmatprep.subr.bf16.mxu0 %v4745_v52 }
 0x246   :  { %v530_v46 = vpop.f32.mrf.mxu1 }
 0x247   :  { %v531_v55 = vadd.f32 %v3970_v26, %v530_v46 }
 0x248   :  { %v532_v56 = vpop.f32.mrf.mxu1 }
 0x249   :  { %v537_v57 = vmax.f32 %v531_v55, 0.0 }
 0x24a   :  { %v533_v58 = vpop.f32.mrf.mxu1 }
 0x24b   :  { %v541_v60 = vcombine.high %v537_v57, %v537_v57  ;;  %v548_v61 = vrot.slane %v537_v57, %v5174_v29  ;;  %v534_v62 = vadd.f32 %v3970_v26, %v533_v58 }
 0x24c   :  { %v535_v63 = vpop.f32.mrf.mxu1 }
 0x24d   :  { %v555_v2 = vrot.slane %v541_v60, %v5174_v29  ;;  %v556_v3 = vcombine.high %v548_v61, %v548_v61  ;;  %v584_v4 = vsel %vm583_vm15, %v548_v61, -inf  ;;  %v538_v5 = vmax.f32 %v534_v62, 0.0 }
 0x24e   :  { %v585_v6 = vrot.slane %v584_v4, 4  ;;  %v4323_v8 = vpop.f32.mrf.mxu1 }
 0x24f   :  { %v557_v12 = vcombine.high %v555_v2, %v555_v2  ;;  %v591_v13 = vsel %vm583_vm15, %v556_v3, -inf  ;;  %v598_v14 = vsel %vm583_vm15, %v555_v2, -inf  ;;  %v558_v15 = vcombine.high %v538_v5, %v538_v5 }
 0x250   :  { %v586_v16 = vmax.f32 %v584_v4, %v585_v6  ;;  %v592_v17 = vrot.slane %v591_v13, 4  ;;  %v599_v18 = vrot.slane %v598_v14, 4  ;;  %v565_v19 = vrot.slane %v538_v5, %v5174_v29  ;;  %v1088_v20 = vpop.f32.mrf.mxu1 }
 0x251   :  { %v605_v21 = vsel %vm583_vm15, %v557_v12, -inf  ;;  %v572_v22 = vrot.slane %v558_v15, %v5174_v29  ;;  %v1097_v23 = vadd.f32 %v4323_v8, %v5256_v9  ;;  %v1089_v58 = vadd.f32 %v5256_v9, %v1088_v20 }
 0x252   :  { %v587_v27 = vrot.slane %v586_v16, 2  ;;  %v593_v28 = vmax.f32 %v591_v13, %v592_v17  ;;  %v600_v30 = vmax.f32 %v598_v14, %v599_v18  ;;  %v606_v31 = vrot.slane %v605_v21, 4  ;;  %v4324_v32 = vpop.f32.mrf.mxu1 }
 0x253   :  { %v573_v34 = vcombine.high %v565_v19, %v565_v19  ;;  %v574_v36 = vcombine.high %v572_v22, %v572_v22  ;;  %v612_v37 = vsel %vm583_vm15, %v565_v19, -inf  ;;  %v626_v38 = vsel %vm583_vm15, %v572_v22, -inf }
 0x254   :  { %v588_v39 = vmax.f32 %v586_v16, %v587_v27  ;;  %v594_v10 = vrot.slane %v593_v28, 2  ;;  %v601_v40 = vrot.slane %v600_v30, 2  ;;  %v607_v41 = vmax.f32 %v605_v21, %v606_v31  ;;  %v1091_v42 = vpop.f32.mrf.mxu1 }
 0x255   :  { %v613_v43 = vrot.slane %v612_v37, 4  ;;  %v619_v44 = vsel %vm583_vm15, %v573_v34, -inf  ;;  %v627_v45 = vrot.slane %v626_v38, 4  ;;  %v633_v47 = vsel %vm583_vm15, %v574_v36, -inf }
 0x256   :  { %v589_v48 = vrot.slane %v588_v39, 1  ;;  %v595_v49 = vmax.f32 %v593_v28, %v594_v10  ;;  %v602_v50 = vmax.f32 %v600_v30, %v601_v40  ;;  %v608_v51 = vrot.slane %v607_v41, 2  ;;  %v1298_v52 = vpop.f32.mrf.mxu1 }
 0x257   :  { %v614_v26 = vmax.f32 %v612_v37, %v613_v43  ;;  %v620_v46 = vrot.slane %v619_v44, 4  ;;  %v628_v53 = vmax.f32 %v626_v38, %v627_v45  ;;  %v634_v54 = vrot.slane %v633_v47, 4 }
 0x258   :  { %v596_v55 = vrot.slane %v595_v49, 1  ;;  %v603_v56 = vrot.slane %v602_v50, 1  ;;  %v609_v57 = vmax.f32 %v607_v41, %v608_v51  ;;  %v4331_v59 = vpop.f32.mrf.mxu1  ;;  %v590_v0 = vmax.f32 %v588_v39, %v589_v48 }
 0x259   :  { %v615_v60 = vrot.slane %v614_v26, 2  ;;  %v621_v61 = vmax.f32 %v619_v44, %v620_v46  ;;  %v629_v62 = vrot.slane %v628_v53, 2  ;;  %v635_v63 = vmax.f32 %v633_v47, %v634_v54 }
 0x25a   :  { %v597_v2 = vmax.f32 %v595_v49, %v596_v55  ;;  %v604_v3 = vmax.f32 %v602_v50, %v603_v56  ;;  %v610_v4 = vrot.slane %v609_v57, 1  ;;  %v1301_v5 = vpop.f32.mrf.mxu1  ;;  %v1118_v16 = vcombine.high %v1097_v23, %v5103_v33 }
 0x25b   :  { %v616_v6 = vmax.f32 %v614_v26, %v615_v60  ;;  %v622_v8 = vrot.slane %v621_v61, 2  ;;  %v630_v12 = vmax.f32 %v628_v53, %v629_v62  ;;  %v636_v13 = vrot.slane %v635_v63, 2 }
 0x25c   :  { %v611_v14 = vmax.f32 %v609_v57, %v610_v4  ;;  %v649_v15 = vsel %vm648_vm0, %v597_v2, %v590_v0  ;;  %v1125_v17 = vrot.slane %v1097_v23, %v5174_v29  ;;  %v4332_v18 = vpop.f32.mrf.mxu1  ;;  %v1103_v30 = vcombine.high %v1089_v58, %v5103_v33 }
 0x25d   :  { %v650_v19 = vsel %vm334_vm3, %v604_v3, %v649_v15  ;;  %v617_v20 = vrot.slane %v616_v6, 1  ;;  %v623_v21 = vmax.f32 %v621_v61, %v622_v8  ;;  %v631_v22 = vrot.slane %v630_v12, 1  ;;  %v4747_v15 = vld [vmem:[#allocation2 + $0x160] sm:$0xff]   ;;  %v4749_v18 = vld [vmem:[#allocation2 + $0x158] sm:$0xff]  }
 0x25e   :  { %v637_v27 = vmax.f32 %v635_v63, %v636_v13  ;;  %v651_v28 = vsel %vm336_vm4, %v611_v14, %v650_v19  ;;  %v1110_v31 = vrot.slane %v1089_v58, %v5174_v29  ;;  %v1100_v38 = vadd.f32 %v4324_v32, %v5256_v9  ;;  %v4751_v19 = vld [vmem:[#allocation2 + $0x150] sm:$0xff]  }
 0x25f   :  { %v618_v34 = vmax.f32 %v616_v6, %v617_v20  ;;  %v624_v36 = vrot.slane %v623_v21, 1  ;;  %v632_v37 = vmax.f32 %v630_v12, %v631_v22  ;;  %v1117_v23 = vrot.slane %v1103_v30, %v5174_v29  ;;  %v4746_v12 = vld [vmem:[#allocation2 + $0x128] sm:$0xff]   ;;  %v4752_v20 = vld [vmem:[#allocation2 + $0x110] sm:$0xff]   ;;  %v4757_v30 = vld [vmem:[#allocation2 + $0x138] sm:$0xff]  }
 0x260   :  { %v638_v39 = vrot.slane %v637_v27, 1  ;;  %v1092_v10 = vadd.f32 %v5256_v9, %v1091_v42  ;;  %v1133_v40 = vcombine.low %v1110_v31, %v1125_v17  ;;  %v1132_v44 = vrot.slane %v1118_v16, %v5174_v29  ;;  %v4754_v22 = vld [vmem:[#allocation2 + $0x108] sm:$0xff]  }
 0x261   :  { %v625_v41 = vmax.f32 %v623_v21, %v624_v36  ;;  %v652_v43 = vsel %vm338_vm5, %v618_v34, %v651_v28  ;;  %v662_v45 = vsub.s32 %v659_v24, %v5165_v25  ;;  %v1184_v9 = vcombine.high %v1100_v38, %v5103_v33  ;;  %v4753_v21 = vld [vmem:[#allocation2 + $0x148] sm:$0xff]   ;;  %v4756_v28 = vld [vmem:[#allocation2 + $0x100] sm:$0xff]   ;;  %v4759_v34 = vld [vmem:[#allocation2 + $0x130] sm:$0xff]  }
 0x262   :  { %v1169_v47 = vcombine.high %v1092_v10, %v5103_v33  ;;  %v1176_v48 = vrot.slane %v1092_v10, %v5174_v29  ;;  %v5291_v32 = vrot.slane %v1133_v40, %v5259_v11  ;;  %v639_v49 = vmax.f32 %v637_v27, %v638_v39  ;;  %v4755_v27 = vld [vmem:[#allocation2 + $0x140] sm:$0xff]   ;;  %v4760_v36 = vld [vmem:[#allocation2 + $0xf0] sm:$0xff]  }
 0x263   :  { %v653_v42 = vsel %vm340_vm6, %v625_v41, %v652_v43  ;;  %v1134_v50 = vcombine.high %v1110_v31, %v1125_v17  ;;  %v1149_v51 = vcombine.low %v1117_v23, %v1132_v44  ;;  %v1191_v26 = vrot.slane %v1100_v38, %v5174_v29  ;;  %v4748_v17 = vld [vmem:[#allocation2 + $0x120] sm:$0xff]   ;;  %v4758_v31 = vld [vmem:[#allocation2 + $0xf8] sm:$0xff]  }
 0x264   :  { %v1183_v46 = vrot.slane %v1169_v47, %v5174_v29  ;;  %v5298_v25 = vadd.f32 %v1298_v52, %v5291_v32  ;;  %v654_v1 = vsel %vm342_vm7, %v632_v37, %v653_v42  ;;  %v1150_v55 = vcombine.high %v1117_v23, %v1132_v44 }
 0x265   :  { %v655_v24 = vsel %vm344_vm8, %v639_v49, %v654_v1  ;;  %v5303_v53 = vrot.slane %v1134_v50, %v5259_v11  ;;  %v5306_v54 = vrot.slane %v1149_v51, %v5259_v11  ;;  %v1199_v57 = vcombine.low %v1176_v48, %v1191_v26  ;;  %v3984_v49 = vld [vmem:[%s5989_s2 + $0x2] ss:$0 sm:$0xff] }
 0x266   :  { %4783 = vtanh.f32 %v5298_v25  ;;  %v663_v56 = vrot.slane %v655_v24, %v662_v45  ;;  %v1198_v58 = vrot.slane %v1184_v9, %v5174_v29  ;;  %v5311_v52 = vrot.slane %v1150_v55, %v5259_v11 }
 0x267   :  { %v1200_v59 = vcombine.high %v1176_v48, %v1191_v26  ;;  %v5315_v62 = vrot.slane %v1199_v57, %v5259_v11  ;;  %v4022_v38 = vmul.f32 -1.442695, %v5298_v25  ;;  %v5344_v57 = vld [vmem:[#allocation2 + $0x198] sm:$0xff]  }
 0x268   :  { %v672_v60 = vrot.slane %v663_v56, %v5174_v29  ;;  %v665_v61 = vcombine.high %v663_v56, %v663_v56  ;;  %v1215_v0 = vcombine.low %v1183_v46, %v1198_v58  ;;  %v1216_v2 = vcombine.high %v1183_v46, %v1198_v58  ;;  %v5341_v56 = vld [vmem:[#allocation2 + $0x1a0] sm:$0xff]   ;;  %v5348_v58 = vld [vmem:[#allocation2 + $0x190] sm:$0xff]  }
 0x269   :  { %v5318_v63 = vrot.slane %v1200_v59, %v5259_v11  ;;  %4785 = vpow2.f32 %v4022_v38 }
 0x26a   :  { %v680_v3 = vcombine.high %v672_v60, %v672_v60  ;;  %v679_v4 = vrot.slane %v665_v61, %v5174_v29  ;;  %v5322_v5 = vrot.slane %v1215_v0, %v5259_v11  ;;  %v5325_v6 = vrot.slane %v1216_v2, %v5259_v11  ;;  %v4750_v11 = vld [vmem:[#allocation2 + $0x118] sm:$0xff]  }
 0x26b   :  { %v686_v14 = vpack.c.bf16 %v672_v60, %v672_v60  ;;  %v5354_v60 = vld [vmem:[#allocation2 + $0x188] sm:$0xff]  }
 0x26c   :  { %v687_v8 = vpack.c.bf16 %v680_v3, %v680_v3  ;;  %v681_v13 = vcombine.high %v679_v4, %v679_v4  ;;  %v688_v37 = vpack.c.bf16 %v679_v4, %v679_v4 }
 0x26e   :  { %983 = vmatprep.mubr.bf16.mxu0 %v687_v8  ;;  %v689_v16 = vpack.c.bf16 %v681_v13, %v681_v13  ;;  %v1165_v13 = vcombine.high %v5291_v32, %v5103_v33 }
 0x26f   :  { %984 = vmatmul.mubr.bf16.vlgmr.msra.gmra.mxu0 %v686_v14  ;;  %v5380_v14 = vld [vmem:[%s5989_s2 + $0x4] ss:$0 sm:$0xff] }
 0x270   :  { %4138 = vmatpush3.bf16.msra.mxu0 %v4746_v12  ;;  %1023 = vmatprep.mubr.bf16.mxu0 %v689_v16 }
 0x271   :  { %4139 = vmatprep.subr.bf16.mxu0 %v4747_v15 }
 0x273   :  { %v4784_v29 = vpop.eup %4783 }
 0x274   :  { %1314 = vrot.lane.b32.xlu1 %v4784_v29, %s5107_s5  ;;  %4140 = vmatpush3.bf16.msra.mxu0 %v4748_v17 }
 0x275   :  { %4141 = vmatprep.subr.bf16.mxu0 %v4749_v18 }
 0x276   :  { %v4786_v39 = vpop.eup %4785 }
 0x277   :  { %v1308_v23 = vadd.f32 1.0, %v4786_v39 }
 0x278   :  { %4142 = vmatpush3.bf16.msra.mxu0 %v4750_v11 }
 0x279   :  { %4143 = vmatprep.subr.bf16.mxu0 %v4751_v19  ;;  %4787 = vrcp.f32 %v1308_v23 }
 0x27c   :  { %4144 = vmatpush3.bf16.msra.mxu0 %v4752_v20 }
 0x27d   :  { %4145 = vmatprep.subr.bf16.mxu0 %v4753_v21 }
 0x280   :  { %4146 = vmatpush3.bf16.msra.mxu0 %v4754_v22 }
 0x281   :  { %4147 = vmatprep.subr.bf16.mxu0 %v4755_v27 }
 0x284   :  { %4148 = vmatpush3.bf16.msra.mxu0 %v4756_v28 }
 0x285   :  { %4149 = vmatprep.subr.bf16.mxu0 %v4757_v30 }
 0x286   :  { %v4788_v10 = vpop.eup %4787 }
 0x287   :  { %v1312_v1 = vmul.f32 0.0, %v4788_v10 }
 0x288   :  { %4150 = vmatpush3.bf16.msra.mxu0 %v4758_v31 }
 0x289   :  { %4151 = vmatprep.subr.bf16.mxu0 %v4759_v34 }
 0x28c   :  { %4152 = vmatpush3.bf16.msra.mxu0 %v4760_v36 }
 0x28d   :  { %4341 = vmatprep.subr.bf16.mxu0 %v5103_v33 }
 0x28f   :  { %1024 = vmatmul.mubr.bf16.vlgmr.msra.gmra.mxu0 %v688_v37 }
 0x290   :  { %4349 = vmatprep.mubr.msk.bf16.mxu0 %vm5104_vm14, %v5103_v33  ;;  %4342 = vmatpush3.bf16.msra.mxu0 %v5341_v56 }
 0x291   :  { %4343 = vmatprep.subr.bf16.mxu0 %v5103_v33 }
 0x294   :  { %4344 = vmatpush3.bf16.msra.mxu0 %v5344_v57 }
 0x295   :  { %4345 = vmatprep.subr.bf16.mxu0 %v5103_v33 }
 0x298   :  { %4346 = vmatpush3.bf16.msra.mxu0 %v5348_v58 }
 0x299   :  { %4347 = vmatprep.subr.bf16.mxu0 %v5103_v33 }
 0x29c   :  { %4348 = vmatpush3.bf16.msra.mxu0 %v5354_v60 }
 0x29d   :  { %4373 = vmatprep.subr.bf16.mxu0 %v5103_v33 }
 0x2e6   :  { %v1315_v40 = vpop.permute.xlu1 %1314 }
 0x2e7   :  { %v1317_v41 = vmul.f32 %v4788_v10, %v1315_v40 }
 0x2e9   :  { %1319 = vrot.lane.b32.xlu0 %v1317_v41, %s5107_s5 }
 0x32f   :  { %v4131_v43 = vpop.f32.mrf.mxu0 }
 0x331   :  { %v4132_v44 = vpop.f32.mrf.mxu0 }
 0x332   :  { %v4133_v45 = vadd.f32 %v4132_v44, %v4131_v43 }
 0x333   :  { %v4134_v47 = vpop.f32.mrf.mxu0 }
 0x334   :  { %v986_v50 = vadd.f32 %v4133_v45, %v3984_v49 }
 0x335   :  { %v4135_v48 = vpop.f32.mrf.mxu0 }
 0x34f   :  { %v4153_v9 = vpop.f32.mrf.mxu0 }
 0x351   :  { %v4154_v42 = vpop.f32.mrf.mxu0 }
 0x352   :  { %v4155_v51 = vadd.f32 %v4154_v42, %v4153_v9 }
 0x353   :  { %v4156_v26 = vpop.f32.mrf.mxu0 }
 0x354   :  { %v5336_v46 = vadd.f32 %v4155_v51, %v986_v50 }
 0x355   :  { %v4157_v25 = vpop.f32.mrf.mxu0 }
 0x35b   :  { %v1320_v24 = vpop.permute.xlu0 %1319 }
 0x35c   :  { %v5338_v55 = vadd.f32 %v1320_v24, %v1312_v1 }
 0x35e   :  { %4789 = vtanh.f32 %v5338_v55 }
 0x36b   :  { %v4790_v59 = vpop.eup %4789 }
 0x36c   :  { %1325 = vrot.lane.b32.xlu1 %v4790_v59, %s5107_s5 }
 0x3de   :  { %v1326_v61 = vpop.permute.xlu1 %1325 }
 0x3df   :  { %v1328_v0 = vmul.f32 %v4788_v10, %v1326_v61 }
 0x3e1   :  { %1402 = vrot.lane.b32.xlu1 %v1328_v0, %s5098_s15  ;;  %v1329_v2 = vpack.c.bf16 %v1328_v0, %v1328_v0 }
 0x3e3   :  { %1331 = vrot.lane.b32.xlu0 %v1329_v2, %s5098_s15 }
 0x453   :  { %v1403_v3 = vpop.permute.xlu1 %1402 }
 0x454   :  { %v1405_v4 = vsel %vm1260_vm1, %v1403_v3, 0.0 }
 0x455   :  { %v1406_v8 = vpack.c.bf16 %v1405_v4, %v1405_v4  ;;  %v1332_v12 = vpop.permute.xlu0 %1331 }
 0x456   :  { %4338 = vmatmul.mubr.msk.bf16.vlgmr.msra.gmra.mxu1 %vm1260_vm1, %v1332_v12 }
 0x457   :  { %4350 = vmatmul.mubr.msk.bf16.vlgmr.msra.gmra.mxu0 %vm387_vm12, %v1406_v8  ;;  %4354 = vmatpush3.bf16.msra.mxu1 %v5228_v7 }
 0x458   :  { %4355 = vmatprep.subr.bf16.mxu1 %v5103_v33  ;;  %4357 = vmatprep.mubr.msk.bf16.mxu1 %vm5104_vm14, %v5103_v33 }
 0x459   :  { %4374 = vmatpush3.bf16.msra.mxu0 %v5228_v7  ;;  %4377 = vmatprep.mubr.msk.bf16.mxu0 %vm5104_vm14, %v5103_v33 }
 0x45a   :  { %4375 = vmatprep.subr.bf16.mxu0 %v5103_v33 }
 0x45b   :  { %4356 = vmatpush3.bf16.msra.mxu1 %v5231_v35 }
 0x45c   :  { %4361 = vmatprep.subr.bf16.mxu1 %v5103_v33 }
 0x45d   :  { %4376 = vmatpush3.bf16.msra.mxu0 %v5231_v35 }
 0x45e   :  { %4381 = vmatprep.subr.bf16.mxu0 %v5103_v33 }
 0x516   :  { %v1370_v15 = vpop.f32.mrf.mxu1 }
 0x517   :  { %v1376_v16 = vadd.f32 %v1370_v15, %v1165_v13  ;;  %v1472_v17 = vpop.f32.mrf.mxu0 }
 0x518   :  { %v1473_v18 = vadd.f32 %v5380_v14, %v1472_v17  ;;  %v4339_v29 = vpop.f32.mrf.mxu1 }
 0x519   :  { %4791 = vtanh.f32 %v1376_v16  ;;  %v4351_v11 = vpop.f32.mrf.mxu0  ;;  %v4024_v28 = vmul.f32 -1.442695, %v1376_v16 }
 0x51a   :  { %4793 = vtanh.f32 %v1473_v18  ;;  %v1373_v19 = vpop.f32.mrf.mxu1  ;;  %v4031_v30 = vmul.f32 -1.442695, %v1473_v18 }
 0x51b   :  { %v1475_v20 = vpop.f32.mrf.mxu0  ;;  %4795 = vpow2.f32 %v4024_v28 }
 0x51c   :  { %v4340_v21 = vpop.f32.mrf.mxu1  ;;  %4797 = vpow2.f32 %v4031_v30 }
 0x51d   :  { %v4352_v22 = vpop.f32.mrf.mxu0 }
 0x526   :  { %v4792_v27 = vpop.eup %4791 }
 0x527   :  { %v4794_v32 = vpop.eup %4793  ;;  %1386 = vrot.lane.b32.xlu0 %v4792_v27, %s5107_s5 }
 0x528   :  { %1487 = vrot.lane.b32.xlu1 %v4794_v32, %s5107_s5  ;;  %v4796_v31 = vpop.eup %4795 }
 0x529   :  { %v4798_v34 = vpop.eup %4797  ;;  %v1380_v36 = vadd.f32 1.0, %v4796_v31 }
 0x52a   :  { %v1481_v37 = vadd.f32 1.0, %v4798_v34 }
 0x52b   :  { %4799 = vrcp.f32 %v1380_v36 }
 0x52c   :  { %4801 = vrcp.f32 %v1481_v37 }
 0x538   :  { %v4800_v38 = vpop.eup %4799 }
 0x539   :  { %v4802_v23 = vpop.eup %4801  ;;  %v1384_v43 = vmul.f32 %v4800_v38, %v5338_v55 }
 0x53a   :  { %v1485_v45 = vmul.f32 0.0, %v4802_v23 }
 0x599   :  { %v1387_v39 = vpop.permute.xlu0 %1386 }
 0x59a   :  { %v1389_v10 = vmul.f32 %v4800_v38, %v1387_v39  ;;  %v1488_v40 = vpop.permute.xlu1 %1487 }
 0x59b   :  { %v1490_v41 = vmul.f32 %v4802_v23, %v1488_v40 }
 0x59c   :  { %1391 = vrot.lane.b32.xlu0 %v1389_v10, %s5107_s5 }
 0x59d   :  { %1492 = vrot.lane.b32.xlu1 %v1490_v41, %s5107_s5 }
 0x60e   :  { %v1392_v44 = vpop.permute.xlu0 %1391 }
 0x60f   :  { %v5388_v47 = vadd.f32 %v1392_v44, %v1384_v43  ;;  %v1493_v48 = vpop.permute.xlu1 %1492 }
 0x610   :  { %v5390_v49 = vadd.f32 %v1493_v48, %v1485_v45 }
 0x611   :  { %4803 = vtanh.f32 %v5388_v47 }
 0x612   :  { %4805 = vtanh.f32 %v5390_v49 }
 0x61e   :  { %v4804_v9 = vpop.eup %4803 }
 0x61f   :  { %v4806_v42 = vpop.eup %4805  ;;  %1397 = vrot.lane.b32.xlu0 %v4804_v9, %s5107_s5 }
 0x620   :  { %1498 = vrot.lane.b32.xlu1 %v4806_v42, %s5107_s5 }
 0x691   :  { %v1398_v50 = vpop.permute.xlu0 %1397 }
 0x692   :  { %v1400_v51 = vmul.f32 %v4800_v38, %v1398_v50  ;;  %v1499_v25 = vpop.permute.xlu1 %1498 }
 0x693   :  { %v1501_v1 = vmul.f32 %v4802_v23, %v1499_v25 }
 0x694   :  { %1575 = vrot.lane.b32.xlu1 %v1400_v51, %s5098_s15  ;;  %v1502_v26 = vpack.c.bf16 %v1400_v51, %v1400_v51 }
 0x696   :  { %1504 = vrot.lane.b32.xlu0 %v1502_v26, %s5098_s15 }
 0x69a   :  { %1579 = vrot.lane.b32.xlu0 %v1501_v1, %s5108_s10  ;;  %v1166_v1 = vcombine.high %v5303_v53, %v5103_v33 }
 0x706   :  { %v1576_v59 = vpop.permute.xlu1 %1575 }
 0x708   :  { %v1505_v24 = vpop.permute.xlu0 %1504 }
 0x709   :  { %4358 = vmatmul.mubr.msk.bf16.vlgmr.msra.gmra.mxu1 %vm1260_vm1, %v1505_v24 }
 0x70a   :  { %4362 = vmatpush3.bf16.msra.mxu1 %v5341_v56  ;;  %4369 = vmatprep.mubr.msk.bf16.mxu1 %vm5104_vm14, %v5103_v33 }
 0x70b   :  { %4363 = vmatprep.subr.bf16.mxu1 %v5103_v33 }
 0x70c   :  { %v1580_v55 = vpop.permute.xlu0 %1579 }
 0x70d   :  { %v1582_v61 = vsel %vm1260_vm1, %v1576_v59, %v1580_v55 }
 0x70e   :  { %4364 = vmatpush3.bf16.msra.mxu1 %v5344_v57  ;;  %v1583_v0 = vpack.c.bf16 %v1582_v61, %v1582_v61 }
 0x70f   :  { %4365 = vmatprep.subr.bf16.mxu1 %v5103_v33 }
 0x712   :  { %4366 = vmatpush3.bf16.msra.mxu1 %v5348_v58 }
 0x713   :  { %4367 = vmatprep.subr.bf16.mxu1 %v5103_v33 }
 0x716   :  { %4368 = vmatpush3.bf16.msra.mxu1 %v5354_v60 }
 0x717   :  { %4393 = vmatprep.subr.bf16.mxu1 %v5103_v33 }
 0x719   :  { %4370 = vmatmul.mubr.msk.bf16.vlgmr.msra.gmra.mxu1 %vm387_vm12, %v1583_v0 }
 0x71a   :  { %4394 = vmatpush3.bf16.msra.mxu1 %v5228_v7  ;;  %4397 = vmatprep.mubr.msk.bf16.mxu1 %vm5104_vm14, %v5103_v33 }
 0x71b   :  { %4395 = vmatprep.subr.bf16.mxu1 %v5103_v33 }
 0x71e   :  { %4396 = vmatpush3.bf16.msra.mxu1 %v5231_v35 }
 0x71f   :  { %4401 = vmatprep.subr.bf16.mxu1 %v5103_v33 }
 0x7c9   :  { %v1543_v2 = vpop.f32.mrf.mxu1 }
 0x7ca   :  { %v1549_v3 = vadd.f32 %v1543_v2, %v5303_v53 }
 0x7cb   :  { %v4359_v4 = vpop.f32.mrf.mxu1 }
 0x7cc   :  { %4807 = vtanh.f32 %v1549_v3  ;;  %v4033_v19 = vmul.f32 -1.442695, %v1549_v3 }
 0x7cd   :  { %v1546_v8 = vpop.f32.mrf.mxu1 }
 0x7cf   :  { %v4360_v12 = vpop.f32.mrf.mxu1 }
 0x7d9   :  { %v4808_v13 = vpop.eup %4807  ;;  %v1621_v15 = vpop.f32.mrf.mxu1 }
 0x7da   :  { %v1622_v16 = vadd.f32 %v5380_v14, %v1621_v15  ;;  %1559 = vrot.lane.b32.xlu1 %v4808_v13, %s5107_s5 }
 0x7db   :  { %v4371_v17 = vpop.f32.mrf.mxu1 }
 0x7dc   :  { %4809 = vtanh.f32 %v1622_v16  ;;  %v4035_v20 = vmul.f32 -1.442695, %v1622_v16 }
 0x7dd   :  { %v1624_v18 = vpop.f32.mrf.mxu1  ;;  %4811 = vpow2.f32 %v4033_v19 }
 0x7de   :  { %4813 = vpow2.f32 %v4035_v20 }
 0x7df   :  { %v4372_v29 = vpop.f32.mrf.mxu1 }
 0x7e9   :  { %v4810_v11 = vpop.eup %4809 }
 0x7ea   :  { %1636 = vrot.lane.b32.xlu0 %v4810_v11, %s5107_s5  ;;  %v4812_v21 = vpop.eup %4811 }
 0x7eb   :  { %v1553_v22 = vadd.f32 1.0, %v4812_v21  ;;  %v4814_v27 = vpop.eup %4813 }
 0x7ec   :  { %v1630_v32 = vadd.f32 1.0, %v4814_v27 }
 0x7ed   :  { %4815 = vrcp.f32 %v1553_v22 }
 0x7ee   :  { %4817 = vrcp.f32 %v1630_v32 }
 0x7fa   :  { %v4816_v28 = vpop.eup %4815 }
 0x7fb   :  { %v4818_v34 = vpop.eup %4817  ;;  %v1557_v38 = vmul.f32 %v4816_v28, %v5388_v47 }
 0x7fc   :  { %v1634_v10 = vmul.f32 %v4818_v34, %v5390_v49 }
 0x84c   :  { %v1560_v30 = vpop.permute.xlu1 %1559 }
 0x84d   :  { %v1562_v31 = vmul.f32 %v4816_v28, %v1560_v30 }
 0x84f   :  { %1564 = vrot.lane.b32.xlu1 %v1562_v31, %s5107_s5 }
 0x85c   :  { %v1637_v36 = vpop.permute.xlu0 %1636 }
 0x85d   :  { %v1639_v37 = vmul.f32 %v4818_v34, %v1637_v36 }
 0x85f   :  { %1641 = vrot.lane.b32.xlu0 %v1639_v37, %s5107_s5 }
 0x8c1   :  { %v1565_v39 = vpop.permute.xlu1 %1564 }
 0x8c2   :  { %v5425_v23 = vadd.f32 %v1565_v39, %v1557_v38 }
 0x8c4   :  { %4819 = vtanh.f32 %v5425_v23 }
 0x8d1   :  { %v4820_v40 = vpop.eup %4819  ;;  %v1642_v41 = vpop.permute.xlu0 %1641 }
 0x8d2   :  { %v5429_v43 = vadd.f32 %v1642_v41, %v1634_v10  ;;  %1570 = vrot.lane.b32.xlu1 %v4820_v40, %s5107_s5 }
 0x8d4   :  { %4821 = vtanh.f32 %v5429_v43 }
 0x8e1   :  { %v4822_v44 = vpop.eup %4821 }
 0x8e2   :  { %1647 = vrot.lane.b32.xlu0 %v4822_v44, %s5107_s5 }
 0x944   :  { %v1571_v45 = vpop.permute.xlu1 %1570 }
 0x945   :  { %v1573_v47 = vmul.f32 %v4816_v28, %v1571_v45 }
 0x947   :  { %1724 = vrot.lane.b32.xlu0 %v1573_v47, %s5098_s15  ;;  %v1651_v48 = vpack.c.bf16 %v1573_v47, %v1573_v47 }
 0x949   :  { %1653 = vrot.lane.b32.xlu1 %v1651_v48, %s5098_s15  ;;  %v5489_v48 = vld [vmem:[#allocation2 + $0x180] sm:$0xff]  }
 0x954   :  { %v1648_v9 = vpop.permute.xlu0 %1647 }
 0x955   :  { %v1650_v49 = vmul.f32 %v4818_v34, %v1648_v9  ;;  %v5495_v9 = vld [vmem:[#allocation2 + $0x178] sm:$0xff]  }
 0x957   :  { %1728 = vrot.lane.b32.xlu1 %v1650_v49, %s5108_s10 }
 0x9b9   :  { %v1725_v50 = vpop.permute.xlu0 %1724 }
 0x9bb   :  { %v1654_v42 = vpop.permute.xlu1 %1653 }
 0x9bc   :  { %4378 = vmatmul.mubr.msk.bf16.vlgmr.msra.gmra.mxu0 %vm1260_vm1, %v1654_v42 }
 0x9bd   :  { %4382 = vmatpush3.bf16.msra.mxu0 %v5341_v56  ;;  %4389 = vmatprep.mubr.msk.bf16.mxu0 %vm5104_vm14, %v5103_v33 }
 0x9be   :  { %4383 = vmatprep.subr.bf16.mxu0 %v5103_v33 }
 0x9c1   :  { %4384 = vmatpush3.bf16.msra.mxu0 %v5344_v57 }
 0x9c2   :  { %4385 = vmatprep.subr.bf16.mxu0 %v5103_v33 }
 0x9c5   :  { %4386 = vmatpush3.bf16.msra.mxu0 %v5348_v58 }
 0x9c6   :  { %4387 = vmatprep.subr.bf16.mxu0 %v5103_v33 }
 0x9c9   :  { %v1729_v51 = vpop.permute.xlu1 %1728  ;;  %4388 = vmatpush3.bf16.msra.mxu0 %v5354_v60 }
 0x9ca   :  { %v1731_v26 = vsel %vm1260_vm1, %v1725_v50, %v1729_v51  ;;  %4413 = vmatprep.subr.bf16.mxu0 %v5103_v33 }
 0x9cb   :  { %v1732_v25 = vpack.c.bf16 %v1731_v26, %v1731_v26 }
 0x9cd   :  { %4390 = vmatmul.mubr.msk.bf16.vlgmr.msra.gmra.mxu0 %vm387_vm12, %v1732_v25 }
 0x9ce   :  { %4414 = vmatpush3.bf16.msra.mxu0 %v5228_v7  ;;  %4417 = vmatprep.mubr.msk.bf16.mxu0 %vm5104_vm14, %v5103_v33 }
 0x9cf   :  { %4415 = vmatprep.subr.bf16.mxu0 %v5103_v33 }
 0x9d2   :  { %4416 = vmatpush3.bf16.msra.mxu0 %v5231_v35 }
 0x9d3   :  { %4421 = vmatprep.subr.bf16.mxu0 %v5103_v33 }
 0xa7c   :  { %v1692_v24 = vpop.f32.mrf.mxu0 }
 0xa7d   :  { %v1698_v55 = vadd.f32 %v1692_v24, %v1166_v1 }
 0xa7e   :  { %v4379_v59 = vpop.f32.mrf.mxu0 }
 0xa7f   :  { %4823 = vtanh.f32 %v1698_v55  ;;  %v4037_v53 = vmul.f32 -1.442695, %v1698_v55 }
 0xa80   :  { %v1695_v61 = vpop.f32.mrf.mxu0 }
 0xa82   :  { %v4380_v0 = vpop.f32.mrf.mxu0 }
 0xa8c   :  { %v4824_v2 = vpop.eup %4823 }
 0xa8d   :  { %v1770_v7 = vpop.f32.mrf.mxu0  ;;  %1708 = vrot.lane.b32.xlu0 %v4824_v2, %s5107_s5 }
 0xa8e   :  { %v1771_v3 = vadd.f32 %v5380_v14, %v1770_v7 }
 0xa8f   :  { %v4391_v4 = vpop.f32.mrf.mxu0 }
 0xa90   :  { %4825 = vtanh.f32 %v1771_v3  ;;  %v4039_v15 = vmul.f32 -1.442695, %v1771_v3 }
 0xa91   :  { %v1773_v35 = vpop.f32.mrf.mxu0  ;;  %4827 = vpow2.f32 %v4037_v53 }
 0xa92   :  { %4829 = vpow2.f32 %v4039_v15 }
 0xa93   :  { %v4392_v8 = vpop.f32.mrf.mxu0 }
 0xa9d   :  { %v4826_v12 = vpop.eup %4825 }
 0xa9e   :  { %1785 = vrot.lane.b32.xlu1 %v4826_v12, %s5107_s5  ;;  %v4828_v13 = vpop.eup %4827 }
 0xa9f   :  { %v1702_v16 = vadd.f32 1.0, %v4828_v13  ;;  %v4830_v17 = vpop.eup %4829 }
 0xaa0   :  { %v1779_v29 = vadd.f32 1.0, %v4830_v17 }
 0xaa1   :  { %4831 = vrcp.f32 %v1702_v16 }
 0xaa2   :  { %4833 = vrcp.f32 %v1779_v29 }
 0xaae   :  { %v4832_v18 = vpop.eup %4831 }
 0xaaf   :  { %v4834_v20 = vpop.eup %4833  ;;  %v1706_v27 = vmul.f32 %v4832_v18, %v5425_v23 }
 0xab0   :  { %v1783_v31 = vmul.f32 %v4834_v20, %v5429_v43 }
 0xaff   :  { %v1709_v11 = vpop.permute.xlu0 %1708 }
 0xb00   :  { %v1711_v19 = vmul.f32 %v4832_v18, %v1709_v11 }
 0xb02   :  { %1713 = vrot.lane.b32.xlu0 %v1711_v19, %s5107_s5 }
 0xb10   :  { %v1786_v21 = vpop.permute.xlu1 %1785 }
 0xb11   :  { %v1788_v22 = vmul.f32 %v4834_v20, %v1786_v21 }
 0xb13   :  { %1790 = vrot.lane.b32.xlu1 %v1788_v22, %s5107_s5 }
 0xb74   :  { %v1714_v32 = vpop.permute.xlu0 %1713 }
 0xb75   :  { %v5464_v28 = vadd.f32 %v1714_v32, %v1706_v27 }
 0xb77   :  { %4835 = vtanh.f32 %v5464_v28 }
 0xb84   :  { %v4836_v30 = vpop.eup %4835 }
 0xb85   :  { %v1791_v34 = vpop.permute.xlu1 %1790  ;;  %1719 = vrot.lane.b32.xlu0 %v4836_v30, %s5107_s5 }
 0xb86   :  { %v5469_v36 = vadd.f32 %v1791_v34, %v1783_v31 }
 0xb88   :  { %4837 = vtanh.f32 %v5469_v36 }
 0xb95   :  { %v4838_v37 = vpop.eup %4837 }
 0xb96   :  { %1796 = vrot.lane.b32.xlu1 %v4838_v37, %s5107_s5 }
 0xbf7   :  { %v1720_v38 = vpop.permute.xlu0 %1719 }
 0xbf8   :  { %v1722_v39 = vmul.f32 %v4832_v18, %v1720_v38 }
 0xbfa   :  { %1873 = vrot.lane.b32.xlu1 %v1722_v39, %s5098_s15  ;;  %v1800_v23 = vpack.c.bf16 %v1722_v39, %v1722_v39 }
 0xbfc   :  { %1802 = vrot.lane.b32.xlu0 %v1800_v23, %s5098_s15 }
 0xc08   :  { %v1797_v10 = vpop.permute.xlu1 %1796 }
 0xc09   :  { %v1799_v40 = vmul.f32 %v4834_v20, %v1797_v10  ;;  %v1167_v10 = vcombine.high %v5306_v54, %v5103_v33 }
 0xc0b   :  { %1877 = vrot.lane.b32.xlu0 %v1799_v40, %s5108_s10 }
 0xc6c   :  { %v1874_v43 = vpop.permute.xlu1 %1873 }
 0xc6e   :  { %v1803_v41 = vpop.permute.xlu0 %1802 }
 0xc6f   :  { %4398 = vmatmul.mubr.msk.bf16.vlgmr.msra.gmra.mxu1 %vm1260_vm1, %v1803_v41 }
 0xc70   :  { %4402 = vmatpush3.bf16.msra.mxu1 %v5341_v56  ;;  %4409 = vmatprep.mubr.msk.bf16.mxu1 %vm5104_vm14, %v5103_v33 }
 0xc71   :  { %4403 = vmatprep.subr.bf16.mxu1 %v5103_v33 }
 0xc74   :  { %4404 = vmatpush3.bf16.msra.mxu1 %v5344_v57 }
 0xc75   :  { %4405 = vmatprep.subr.bf16.mxu1 %v5103_v33 }
 0xc78   :  { %4406 = vmatpush3.bf16.msra.mxu1 %v5348_v58 }
 0xc79   :  { %4407 = vmatprep.subr.bf16.mxu1 %v5103_v33 }
 0xc7c   :  { %4408 = vmatpush3.bf16.msra.mxu1 %v5354_v60 }
 0xc7d   :  { %v1878_v44 = vpop.permute.xlu0 %1877  ;;  %4433 = vmatprep.subr.bf16.mxu1 %v5103_v33 }
 0xc7e   :  { %v1880_v45 = vsel %vm1260_vm1, %v1874_v43, %v1878_v44 }
 0xc7f   :  { %v1881_v47 = vpack.c.bf16 %v1880_v45, %v1880_v45 }
 0xc81   :  { %4410 = vmatmul.mubr.msk.bf16.vlgmr.msra.gmra.mxu1 %vm387_vm12, %v1881_v47 }
 0xc82   :  { %4434 = vmatpush3.bf16.msra.mxu1 %v5489_v48  ;;  %4437 = vmatprep.mubr.msk.bf16.mxu1 %vm5104_vm14, %v5103_v33 }
 0xc83   :  { %4435 = vmatprep.subr.bf16.mxu1 %v5103_v33 }
 0xc86   :  { %4436 = vmatpush3.bf16.msra.mxu1 %v5495_v9 }
 0xc87   :  { %4441 = vmatprep.subr.bf16.mxu1 %v5103_v33 }
 0xd2f   :  { %v1841_v49 = vpop.f32.mrf.mxu1 }
 0xd30   :  { %v1847_v42 = vadd.f32 %v1841_v49, %v5306_v54 }
 0xd31   :  { %v4399_v50 = vpop.f32.mrf.mxu1 }
 0xd32   :  { %4839 = vtanh.f32 %v1847_v42  ;;  %v4041_v2 = vmul.f32 -1.442695, %v1847_v42 }
 0xd33   :  { %v1844_v51 = vpop.f32.mrf.mxu1 }
 0xd35   :  { %v4400_v26 = vpop.f32.mrf.mxu1 }
 0xd3f   :  { %v4840_v25 = vpop.eup %4839 }
 0xd40   :  { %1857 = vrot.lane.b32.xlu1 %v4840_v25, %s5107_s5 }
 0xd41   :  { %v1919_v1 = vpop.f32.mrf.mxu1 }
 0xd42   :  { %v1920_v24 = vadd.f32 %v5380_v14, %v1919_v1 }
 0xd43   :  { %v4411_v55 = vpop.f32.mrf.mxu1 }
 0xd44   :  { %4841 = vtanh.f32 %v1920_v24  ;;  %v4043_v3 = vmul.f32 -1.442695, %v1920_v24 }
 0xd45   :  { %v1922_v59 = vpop.f32.mrf.mxu1  ;;  %4843 = vpow2.f32 %v4041_v2 }
 0xd46   :  { %4845 = vpow2.f32 %v4043_v3 }
 0xd47   :  { %v4412_v61 = vpop.f32.mrf.mxu1 }
 0xd51   :  { %v4842_v0 = vpop.eup %4841 }
 0xd52   :  { %1934 = vrot.lane.b32.xlu0 %v4842_v0, %s5107_s5  ;;  %v4844_v7 = vpop.eup %4843 }
 0xd53   :  { %v1851_v4 = vadd.f32 1.0, %v4844_v7  ;;  %v4846_v35 = vpop.eup %4845 }
 0xd54   :  { %v1928_v13 = vadd.f32 1.0, %v4846_v35 }
 0xd55   :  { %4847 = vrcp.f32 %v1851_v4 }
 0xd56   :  { %4849 = vrcp.f32 %v1928_v13 }
 0xd62   :  { %v4848_v8 = vpop.eup %4847 }
 0xd63   :  { %v4850_v15 = vpop.eup %4849  ;;  %v1855_v18 = vmul.f32 %v4848_v8, %v5464_v28 }
 0xd64   :  { %v1932_v20 = vmul.f32 %v4850_v15, %v5469_v36 }
 0xdb2   :  { %v1858_v12 = vpop.permute.xlu1 %1857 }
 0xdb3   :  { %v1860_v53 = vmul.f32 %v4848_v8, %v1858_v12 }
 0xdb5   :  { %1862 = vrot.lane.b32.xlu1 %v1860_v53, %s5107_s5 }
 0xdc4   :  { %v1935_v16 = vpop.permute.xlu0 %1934 }
 0xdc5   :  { %v1937_v17 = vmul.f32 %v4850_v15, %v1935_v16 }
 0xdc7   :  { %1939 = vrot.lane.b32.xlu0 %v1937_v17, %s5107_s5 }
 0xe27   :  { %v1863_v29 = vpop.permute.xlu1 %1862 }
 0xe28   :  { %v5506_v11 = vadd.f32 %v1863_v29, %v1855_v18 }
 0xe2a   :  { %4851 = vtanh.f32 %v5506_v11 }
 0xe37   :  { %v4852_v19 = vpop.eup %4851 }
 0xe38   :  { %1868 = vrot.lane.b32.xlu1 %v4852_v19, %s5107_s5 }
 0xe39   :  { %v1940_v21 = vpop.permute.xlu0 %1939 }
 0xe3a   :  { %v5511_v22 = vadd.f32 %v1940_v21, %v1932_v20 }
 0xe3c   :  { %4853 = vtanh.f32 %v5511_v22 }
 0xe49   :  { %v4854_v27 = vpop.eup %4853 }
 0xe4a   :  { %1945 = vrot.lane.b32.xlu0 %v4854_v27, %s5107_s5 }
 0xeaa   :  { %v1869_v32 = vpop.permute.xlu1 %1868 }
 0xeab   :  { %v1871_v28 = vmul.f32 %v4848_v8, %v1869_v32 }
 0xead   :  { %2022 = vrot.lane.b32.xlu0 %v1871_v28, %s5098_s15  ;;  %v1949_v30 = vpack.c.bf16 %v1871_v28, %v1871_v28 }
 0xeaf   :  { %1951 = vrot.lane.b32.xlu1 %v1949_v30, %s5098_s15 }
 0xebc   :  { %v1946_v31 = vpop.permute.xlu0 %1945 }
 0xebd   :  { %v1948_v34 = vmul.f32 %v4850_v15, %v1946_v31 }
 0xebf   :  { %2026 = vrot.lane.b32.xlu1 %v1948_v34, %s5108_s10 }
 0xf1f   :  { %v2023_v37 = vpop.permute.xlu0 %2022 }
 0xf21   :  { %v1952_v36 = vpop.permute.xlu1 %1951 }
 0xf22   :  { %4418 = vmatmul.mubr.msk.bf16.vlgmr.msra.gmra.mxu0 %vm1260_vm1, %v1952_v36 }
 0xf23   :  { %4422 = vmatpush3.bf16.msra.mxu0 %v5341_v56  ;;  %4429 = vmatprep.mubr.msk.bf16.mxu0 %vm5104_vm14, %v5103_v33 }
 0xf24   :  { %4423 = vmatprep.subr.bf16.mxu0 %v5103_v33 }
 0xf27   :  { %4424 = vmatpush3.bf16.msra.mxu0 %v5344_v57 }
 0xf28   :  { %4425 = vmatprep.subr.bf16.mxu0 %v5103_v33 }
 0xf2b   :  { %4426 = vmatpush3.bf16.msra.mxu0 %v5348_v58 }
 0xf2c   :  { %4427 = vmatprep.subr.bf16.mxu0 %v5103_v33 }
 0xf2f   :  { %4428 = vmatpush3.bf16.msra.mxu0 %v5354_v60 }
 0xf30   :  { %4453 = vmatprep.subr.bf16.mxu0 %v5103_v33 }
 0xf31   :  { %v2027_v38 = vpop.permute.xlu1 %2026 }
 0xf32   :  { %v2029_v39 = vsel %vm1260_vm1, %v2023_v37, %v2027_v38 }
 0xf33   :  { %v2030_v23 = vpack.c.bf16 %v2029_v39, %v2029_v39 }
 0xf35   :  { %4430 = vmatmul.mubr.msk.bf16.vlgmr.msra.gmra.mxu0 %vm387_vm12, %v2030_v23 }
 0xf36   :  { %4454 = vmatpush3.bf16.msra.mxu0 %v5489_v48  ;;  %4457 = vmatprep.mubr.msk.bf16.mxu0 %vm5104_vm14, %v5103_v33 }
 0xf37   :  { %4455 = vmatprep.subr.bf16.mxu0 %v5103_v33 }
 0xf3a   :  { %4456 = vmatpush3.bf16.msra.mxu0 %v5495_v9 }
 0xf3b   :  { %4461 = vmatprep.subr.bf16.mxu0 %v5103_v33 }
 0xfe2   :  { %v1990_v40 = vpop.f32.mrf.mxu0 }
 0xfe3   :  { %v1996_v41 = vadd.f32 %v1990_v40, %v1167_v10 }
 0xfe4   :  { %v4419_v43 = vpop.f32.mrf.mxu0 }
 0xfe5   :  { %4855 = vtanh.f32 %v1996_v41  ;;  %v4045_v54 = vmul.f32 -1.442695, %v1996_v41 }
 0xfe6   :  { %v1993_v44 = vpop.f32.mrf.mxu0 }
 0xfe8   :  { %v4420_v45 = vpop.f32.mrf.mxu0 }
 0xff2   :  { %v4856_v47 = vpop.eup %4855 }
 0xff3   :  { %2006 = vrot.lane.b32.xlu0 %v4856_v47, %s5107_s5 }
 0xff5   :  { %v2068_v49 = vpop.f32.mrf.mxu0 }
 0xff6   :  { %v2069_v42 = vadd.f32 %v5380_v14, %v2068_v49 }
 0xff7   :  { %v4431_v50 = vpop.f32.mrf.mxu0 }
 0xff8   :  { %4857 = vtanh.f32 %v2069_v42  ;;  %v4047_v55 = vmul.f32 -1.442695, %v2069_v42 }
 0xff9   :  { %v2071_v51 = vpop.f32.mrf.mxu0  ;;  %4859 = vpow2.f32 %v4045_v54 }
 0xffb   :  { %v4432_v26 = vpop.f32.mrf.mxu0 }
0x1005   :  { %v4858_v25 = vpop.eup %4857 }
0x1006   :  { %2083 = vrot.lane.b32.xlu1 %v4858_v25, %s5107_s5  ;;  %v4860_v1 = vpop.eup %4859 }
0x1007   :  { %v2000_v24 = vadd.f32 1.0, %v4860_v1 }
0x1009   :  { %4861 = vrcp.f32 %v2000_v24 }
0x100a   :  { %4863 = vpow2.f32 %v4047_v55 }
0x1016   :  { %v4862_v59 = vpop.eup %4861 }
0x1017   :  { %v4864_v61 = vpop.eup %4863  ;;  %v2004_v8 = vmul.f32 %v4862_v59, %v5506_v11 }
0x1018   :  { %v2077_v7 = vadd.f32 1.0, %v4864_v61 }
0x101a   :  { %4865 = vrcp.f32 %v2077_v7 }
0x1027   :  { %v4866_v3 = vpop.eup %4865 }
0x1028   :  { %v2081_v15 = vmul.f32 %v4866_v3, %v5511_v22 }
0x1065   :  { %v2007_v0 = vpop.permute.xlu0 %2006 }
0x1066   :  { %v2009_v2 = vmul.f32 %v4862_v59, %v2007_v0 }
0x1068   :  { %2011 = vrot.lane.b32.xlu0 %v2009_v2, %s5107_s5 }
0x1078   :  { %v2084_v4 = vpop.permute.xlu1 %2083 }
0x1079   :  { %v2086_v35 = vmul.f32 %v4866_v3, %v2084_v4 }
0x107b   :  { %2088 = vrot.lane.b32.xlu1 %v2086_v35, %s5107_s5 }
0x10da   :  { %v2012_v12 = vpop.permute.xlu0 %2011 }
0x10db   :  { %v5545_v53 = vadd.f32 %v2012_v12, %v2004_v8 }
0x10dd   :  { %4867 = vtanh.f32 %v5545_v53 }
0x10ea   :  { %v4868_v13 = vpop.eup %4867 }
0x10eb   :  { %2017 = vrot.lane.b32.xlu0 %v4868_v13, %s5107_s5 }
0x10ed   :  { %v2089_v16 = vpop.permute.xlu1 %2088 }
0x10ee   :  { %v5550_v17 = vadd.f32 %v2089_v16, %v2081_v15 }
0x10f0   :  { %4869 = vtanh.f32 %v5550_v17 }
0x10fd   :  { %v4870_v18 = vpop.eup %4869 }
0x10fe   :  { %2094 = vrot.lane.b32.xlu1 %v4870_v18, %s5107_s5 }
0x115d   :  { %v2018_v29 = vpop.permute.xlu0 %2017 }
0x115e   :  { %v2020_v11 = vmul.f32 %v4862_v59, %v2018_v29 }
0x1160   :  { %2171 = vrot.lane.b32.xlu1 %v2020_v11, %s5098_s15  ;;  %v2098_v19 = vpack.c.bf16 %v2020_v11, %v2020_v11 }
0x1162   :  { %2100 = vrot.lane.b32.xlu0 %v2098_v19, %s5098_s15 }
0x1170   :  { %v2095_v20 = vpop.permute.xlu1 %2094 }
0x1171   :  { %v2097_v21 = vmul.f32 %v4866_v3, %v2095_v20 }
0x1173   :  { %2175 = vrot.lane.b32.xlu0 %v2097_v21, %s5108_s10 }
0x11d2   :  { %v2172_v27 = vpop.permute.xlu1 %2171 }
0x11d4   :  { %v2101_v22 = vpop.permute.xlu0 %2100 }
0x11d5   :  { %4438 = vmatmul.mubr.msk.bf16.vlgmr.msra.gmra.mxu1 %vm1260_vm1, %v2101_v22 }
0x11d6   :  { %4442 = vmatpush3.bf16.msra.mxu1 %v5341_v56  ;;  %4449 = vmatprep.mubr.msk.bf16.mxu1 %vm5104_vm14, %v5103_v33 }
0x11d7   :  { %4443 = vmatprep.subr.bf16.mxu1 %v5103_v33 }
0x11da   :  { %4444 = vmatpush3.bf16.msra.mxu1 %v5344_v57 }
0x11db   :  { %4445 = vmatprep.subr.bf16.mxu1 %v5103_v33 }
0x11de   :  { %4446 = vmatpush3.bf16.msra.mxu1 %v5348_v58 }
0x11df   :  { %4447 = vmatprep.subr.bf16.mxu1 %v5103_v33 }
0x11e2   :  { %4448 = vmatpush3.bf16.msra.mxu1 %v5354_v60 }
0x11e3   :  { %4473 = vmatprep.subr.bf16.mxu1 %v5103_v33 }
0x11e5   :  { %v2176_v32 = vpop.permute.xlu0 %2175 }
0x11e6   :  { %v2178_v28 = vsel %vm1260_vm1, %v2172_v27, %v2176_v32 }
0x11e7   :  { %v2179_v30 = vpack.c.bf16 %v2178_v28, %v2178_v28 }
0x11e9   :  { %4450 = vmatmul.mubr.msk.bf16.vlgmr.msra.gmra.mxu1 %vm387_vm12, %v2179_v30 }
0x11ea   :  { %4474 = vmatpush3.bf16.msra.mxu1 %v5489_v48  ;;  %4477 = vmatprep.mubr.msk.bf16.mxu1 %vm5104_vm14, %v5103_v33 }
0x11eb   :  { %4475 = vmatprep.subr.bf16.mxu1 %v5103_v33 }
0x11ee   :  { %4476 = vmatpush3.bf16.msra.mxu1 %v5495_v9 }
0x11ef   :  { %4481 = vmatprep.subr.bf16.mxu1 %v5103_v33 }
0x1295   :  { %v2139_v31 = vpop.f32.mrf.mxu1 }
0x1296   :  { %v2145_v34 = vadd.f32 %v2139_v31, %v5311_v52 }
0x1297   :  { %v4439_v36 = vpop.f32.mrf.mxu1 }
0x1298   :  { %4871 = vtanh.f32 %v2145_v34  ;;  %v4049_v45 = vmul.f32 -1.442695, %v2145_v34 }
0x1299   :  { %v2142_v37 = vpop.f32.mrf.mxu1 }
0x129b   :  { %v4440_v38 = vpop.f32.mrf.mxu1 }
0x12a5   :  { %v4872_v39 = vpop.eup %4871 }
0x12a6   :  { %2155 = vrot.lane.b32.xlu1 %v4872_v39, %s5107_s5 }
0x12a9   :  { %v2217_v23 = vpop.f32.mrf.mxu1 }
0x12aa   :  { %v2218_v10 = vadd.f32 %v5380_v14, %v2217_v23 }
0x12ab   :  { %v4451_v40 = vpop.f32.mrf.mxu1 }
0x12ac   :  { %4873 = vtanh.f32 %v2218_v10  ;;  %v4051_v42 = vmul.f32 -1.442695, %v2218_v10 }
0x12ad   :  { %v2220_v41 = vpop.f32.mrf.mxu1  ;;  %4875 = vpow2.f32 %v4049_v45 }
0x12af   :  { %v4452_v43 = vpop.f32.mrf.mxu1 }
0x12b9   :  { %v4874_v44 = vpop.eup %4873 }
0x12ba   :  { %2232 = vrot.lane.b32.xlu0 %v4874_v44, %s5107_s5  ;;  %v4876_v47 = vpop.eup %4875 }
0x12bb   :  { %v2149_v49 = vadd.f32 1.0, %v4876_v47 }
0x12bd   :  { %4877 = vrcp.f32 %v2149_v49 }
0x12be   :  { %4879 = vpow2.f32 %v4051_v42 }
0x12ca   :  { %v4878_v50 = vpop.eup %4877 }
0x12cb   :  { %v4880_v26 = vpop.eup %4879  ;;  %v2153_v59 = vmul.f32 %v4878_v50, %v5545_v53 }
0x12cc   :  { %v2226_v54 = vadd.f32 1.0, %v4880_v26 }
0x12ce   :  { %4881 = vrcp.f32 %v2226_v54 }
0x12db   :  { %v4882_v1 = vpop.eup %4881 }
0x12dc   :  { %v2230_v7 = vmul.f32 %v4882_v1, %v5550_v17 }
0x1318   :  { %v2156_v51 = vpop.permute.xlu1 %2155 }
0x1319   :  { %v2158_v25 = vmul.f32 %v4878_v50, %v2156_v51 }
0x131b   :  { %2160 = vrot.lane.b32.xlu1 %v2158_v25, %s5107_s5 }
0x132c   :  { %v2233_v24 = vpop.permute.xlu0 %2232 }
0x132d   :  { %v2235_v55 = vmul.f32 %v4882_v1, %v2233_v24 }
0x132f   :  { %2237 = vrot.lane.b32.xlu0 %v2235_v55, %s5107_s5 }
0x138d   :  { %v2161_v61 = vpop.permute.xlu1 %2160 }
0x138e   :  { %v5583_v0 = vadd.f32 %v2161_v61, %v2153_v59  ;;  %v5635_v61 = vld [vmem:[#allocation2 + $0x1a0] sm:$0xff]  }
0x1390   :  { %4883 = vtanh.f32 %v5583_v0 }
0x139d   :  { %v4884_v2 = vpop.eup %4883 }
0x139e   :  { %2166 = vrot.lane.b32.xlu1 %v4884_v2, %s5107_s5  ;;  %v5645_v2 = vld [vmem:[#allocation2 + $0x190] sm:$0xff]  }
0x13a1   :  { %v2238_v3 = vpop.permute.xlu0 %2237 }
0x13a2   :  { %v5588_v4 = vadd.f32 %v2238_v3, %v2230_v7  ;;  %v5649_v7 = vld [vmem:[#allocation2 + $0x188] sm:$0xff]  }
0x13a4   :  { %4885 = vtanh.f32 %v5588_v4 }
0x13b1   :  { %v4886_v35 = vpop.eup %4885 }
0x13b2   :  { %2243 = vrot.lane.b32.xlu0 %v4886_v35, %s5107_s5 }
0x1410   :  { %v2167_v8 = vpop.permute.xlu1 %2166 }
0x1411   :  { %v2169_v12 = vmul.f32 %v4878_v50, %v2167_v8 }
0x1413   :  { %2320 = vrot.lane.b32.xlu0 %v2169_v12, %s5098_s15  ;;  %v2247_v53 = vpack.c.bf16 %v2169_v12, %v2169_v12 }
0x1415   :  { %2249 = vrot.lane.b32.xlu1 %v2247_v53, %s5098_s15 }
0x1424   :  { %v2244_v13 = vpop.permute.xlu0 %2243 }
0x1425   :  { %v2246_v15 = vmul.f32 %v4882_v1, %v2244_v13 }
0x1427   :  { %2324 = vrot.lane.b32.xlu1 %v2246_v15, %s5108_s10 }
0x1485   :  { %v2321_v17 = vpop.permute.xlu0 %2320 }
0x1487   :  { %v2250_v16 = vpop.permute.xlu1 %2249 }
0x1488   :  { %4458 = vmatmul.mubr.msk.bf16.vlgmr.msra.gmra.mxu0 %vm1260_vm1, %v2250_v16 }
0x1489   :  { %4462 = vmatpush3.bf16.msra.mxu0 %v5341_v56  ;;  %4469 = vmatprep.mubr.msk.bf16.mxu0 %vm5104_vm14, %v5103_v33 }
0x148a   :  { %4463 = vmatprep.subr.bf16.mxu0 %v5103_v33 }
0x148d   :  { %4464 = vmatpush3.bf16.msra.mxu0 %v5344_v57  ;;  %v1168_v57 = vcombine.high %v5311_v52, %v5103_v33 }
0x148e   :  { %4465 = vmatprep.subr.bf16.mxu0 %v5103_v33 }
0x1491   :  { %4466 = vmatpush3.bf16.msra.mxu0 %v5348_v58 }
0x1492   :  { %4467 = vmatprep.subr.bf16.mxu0 %v5103_v33 }
0x1495   :  { %4468 = vmatpush3.bf16.msra.mxu0 %v5354_v60 }
0x1496   :  { %4493 = vmatprep.subr.bf16.mxu0 %v5103_v33 }
0x1499   :  { %v2325_v18 = vpop.permute.xlu1 %2324 }
0x149a   :  { %v2327_v56 = vsel %vm1260_vm1, %v2321_v17, %v2325_v18 }
0x149b   :  { %v2328_v29 = vpack.c.bf16 %v2327_v56, %v2327_v56  ;;  %v5666_v56 = vld [vmem:[%s5989_s2 + $0x4] ss:$0 sm:$0xff] }
0x149d   :  { %4470 = vmatmul.mubr.msk.bf16.vlgmr.msra.gmra.mxu0 %vm387_vm12, %v2328_v29 }
0x149e   :  { %4494 = vmatpush3.bf16.msra.mxu0 %v5489_v48  ;;  %4497 = vmatprep.mubr.msk.bf16.mxu0 %vm5104_vm14, %v5103_v33 }
0x149f   :  { %4495 = vmatprep.subr.bf16.mxu0 %v5103_v33 }
0x14a2   :  { %4496 = vmatpush3.bf16.msra.mxu0 %v5495_v9 }
0x14a3   :  { %4501 = vmatprep.subr.bf16.mxu0 %v5103_v33 }
0x1548   :  { %v2288_v58 = vpop.f32.mrf.mxu0 }
0x1549   :  { %v2294_v60 = vadd.f32 %v2288_v58, %v1168_v57 }
0x154a   :  { %v4459_v11 = vpop.f32.mrf.mxu0 }
0x154b   :  { %4887 = vtanh.f32 %v2294_v60  ;;  %v4053_v52 = vmul.f32 -1.442695, %v2294_v60 }
0x154c   :  { %v2291_v19 = vpop.f32.mrf.mxu0 }
0x154e   :  { %v4460_v20 = vpop.f32.mrf.mxu0 }
0x1558   :  { %v4888_v21 = vpop.eup %4887 }
0x1559   :  { %2304 = vrot.lane.b32.xlu0 %v4888_v21, %s5107_s5 }
0x155d   :  { %v2366_v22 = vpop.f32.mrf.mxu0 }
0x155e   :  { %v2367_v27 = vadd.f32 %v5380_v14, %v2366_v22 }
0x155f   :  { %v4471_v32 = vpop.f32.mrf.mxu0 }
0x1560   :  { %4889 = vtanh.f32 %v2367_v27  ;;  %v4055_v37 = vmul.f32 -1.442695, %v2367_v27 }
0x1561   :  { %v2369_v28 = vpop.f32.mrf.mxu0  ;;  %4891 = vpow2.f32 %v4053_v52 }
0x1563   :  { %v4472_v30 = vpop.f32.mrf.mxu0 }
0x156d   :  { %v4890_v31 = vpop.eup %4889 }
0x156e   :  { %2381 = vrot.lane.b32.xlu1 %v4890_v31, %s5107_s5  ;;  %v4892_v34 = vpop.eup %4891 }
0x156f   :  { %v2298_v36 = vadd.f32 1.0, %v4892_v34 }
0x1571   :  { %4893 = vrcp.f32 %v2298_v36 }
0x1572   :  { %4895 = vpow2.f32 %v4055_v37 }
0x157e   :  { %v4894_v38 = vpop.eup %4893 }
0x157f   :  { %v4896_v10 = vpop.eup %4895  ;;  %v2302_v44 = vmul.f32 %v4894_v38, %v5583_v0  ;;  %v5641_v0 = vld [vmem:[#allocation2 + $0x198] sm:$0xff]  }
0x1580   :  { %v2375_v14 = vadd.f32 1.0, %v4896_v10 }
0x1582   :  { %4897 = vrcp.f32 %v2375_v14 }
0x158f   :  { %v4898_v40 = vpop.eup %4897 }
0x1590   :  { %v2379_v42 = vmul.f32 %v4898_v40, %v5588_v4 }
0x15cb   :  { %v2305_v39 = vpop.permute.xlu0 %2304 }
0x15cc   :  { %v2307_v23 = vmul.f32 %v4894_v38, %v2305_v39 }
0x15ce   :  { %2309 = vrot.lane.b32.xlu0 %v2307_v23, %s5107_s5 }
0x15e0   :  { %v2382_v41 = vpop.permute.xlu1 %2381 }
0x15e1   :  { %v2384_v43 = vmul.f32 %v4898_v40, %v2382_v41 }
0x15e3   :  { %2386 = vrot.lane.b32.xlu1 %v2384_v43, %s5107_s5 }
0x1640   :  { %v2310_v45 = vpop.permute.xlu0 %2309 }
0x1641   :  { %v5622_v47 = vadd.f32 %v2310_v45, %v2302_v44 }
0x1643   :  { %4899 = vtanh.f32 %v5622_v47 }
0x1650   :  { %v4900_v49 = vpop.eup %4899 }
0x1651   :  { %2315 = vrot.lane.b32.xlu0 %v4900_v49, %s5107_s5 }
0x1655   :  { %v2387_v50 = vpop.permute.xlu1 %2386 }
0x1656   :  { %v5627_v51 = vadd.f32 %v2387_v50, %v2379_v42 }
0x1658   :  { %4901 = vtanh.f32 %v5627_v51 }
0x1665   :  { %v4902_v26 = vpop.eup %4901 }
0x1666   :  { %2392 = vrot.lane.b32.xlu1 %v4902_v26, %s5107_s5 }
0x16c3   :  { %v2316_v25 = vpop.permute.xlu0 %2315 }
0x16c4   :  { %v2318_v54 = vmul.f32 %v4894_v38, %v2316_v25 }
0x16c6   :  { %2469 = vrot.lane.b32.xlu1 %v2318_v54, %s5098_s15  ;;  %v2396_v1 = vpack.c.bf16 %v2318_v54, %v2318_v54  ;;  %v1231_v54 = vcombine.high %v5315_v62, %v5103_v33 }
0x16c8   :  { %2398 = vrot.lane.b32.xlu0 %v2396_v1, %s5098_s15 }
0x16d8   :  { %v2393_v24 = vpop.permute.xlu1 %2392 }
0x16d9   :  { %v2395_v55 = vmul.f32 %v4898_v40, %v2393_v24 }
0x16db   :  { %2473 = vrot.lane.b32.xlu0 %v2395_v55, %s5108_s10 }
0x1738   :  { %v2470_v3 = vpop.permute.xlu1 %2469 }
0x173a   :  { %v2399_v59 = vpop.permute.xlu0 %2398 }
0x173b   :  { %4478 = vmatmul.mubr.msk.bf16.vlgmr.msra.gmra.mxu1 %vm1260_vm1, %v2399_v59 }
0x173c   :  { %4482 = vmatpush3.bf16.msra.mxu1 %v5635_v61  ;;  %4489 = vmatprep.mubr.msk.bf16.mxu1 %vm5104_vm14, %v5103_v33 }
0x173d   :  { %4483 = vmatprep.subr.bf16.mxu1 %v5103_v33 }
0x1740   :  { %4484 = vmatpush3.bf16.msra.mxu1 %v5641_v0 }
0x1741   :  { %4485 = vmatprep.subr.bf16.mxu1 %v5103_v33 }
0x1744   :  { %4486 = vmatpush3.bf16.msra.mxu1 %v5645_v2 }
0x1745   :  { %4487 = vmatprep.subr.bf16.mxu1 %v5103_v33 }
0x1748   :  { %4488 = vmatpush3.bf16.msra.mxu1 %v5649_v7 }
0x1749   :  { %4513 = vmatprep.subr.bf16.mxu1 %v5103_v33 }
0x174d   :  { %v2474_v4 = vpop.permute.xlu0 %2473 }
0x174e   :  { %v2476_v35 = vsel %vm1260_vm1, %v2470_v3, %v2474_v4 }
0x174f   :  { %v2477_v8 = vpack.c.bf16 %v2476_v35, %v2476_v35 }
0x1751   :  { %4490 = vmatmul.mubr.msk.bf16.vlgmr.msra.gmra.mxu1 %vm387_vm12, %v2477_v8 }
0x1752   :  { %4514 = vmatpush3.bf16.msra.mxu1 %v5489_v48  ;;  %4517 = vmatprep.mubr.msk.bf16.mxu1 %vm5104_vm14, %v5103_v33 }
0x1753   :  { %4515 = vmatprep.subr.bf16.mxu1 %v5103_v33 }
0x1756   :  { %4516 = vmatpush3.bf16.msra.mxu1 %v5495_v9 }
0x1757   :  { %4521 = vmatprep.subr.bf16.mxu1 %v5103_v33 }
0x17fb   :  { %v2437_v12 = vpop.f32.mrf.mxu1 }
0x17fc   :  { %v2443_v53 = vadd.f32 %v2437_v12, %v5315_v62 }
0x17fd   :  { %v4479_v13 = vpop.f32.mrf.mxu1 }
0x17fe   :  { %4903 = vtanh.f32 %v2443_v53  ;;  %v4057_v19 = vmul.f32 -1.442695, %v2443_v53 }
0x17ff   :  { %v2440_v15 = vpop.f32.mrf.mxu1 }
0x1801   :  { %v4480_v16 = vpop.f32.mrf.mxu1 }
0x180b   :  { %v4904_v17 = vpop.eup %4903 }
0x180c   :  { %2453 = vrot.lane.b32.xlu1 %v4904_v17, %s5107_s5 }
0x1811   :  { %v2515_v18 = vpop.f32.mrf.mxu1 }
0x1812   :  { %v2516_v29 = vadd.f32 %v5666_v56, %v2515_v18 }
0x1813   :  { %v4491_v57 = vpop.f32.mrf.mxu1 }
0x1814   :  { %4905 = vtanh.f32 %v2516_v29  ;;  %v4059_v22 = vmul.f32 -1.442695, %v2516_v29 }
0x1815   :  { %v2518_v58 = vpop.f32.mrf.mxu1  ;;  %4907 = vpow2.f32 %v4057_v19 }
0x1817   :  { %v4492_v60 = vpop.f32.mrf.mxu1 }
0x1821   :  { %v4906_v11 = vpop.eup %4905 }
0x1822   :  { %2530 = vrot.lane.b32.xlu0 %v4906_v11, %s5107_s5  ;;  %v4908_v20 = vpop.eup %4907 }
0x1823   :  { %v2447_v21 = vadd.f32 1.0, %v4908_v20 }
0x1825   :  { %4909 = vrcp.f32 %v2447_v21 }
0x1826   :  { %4911 = vpow2.f32 %v4059_v22 }
0x1832   :  { %v4910_v27 = vpop.eup %4909 }
0x1833   :  { %v4912_v30 = vpop.eup %4911  ;;  %v2451_v37 = vmul.f32 %v4910_v27, %v5622_v47 }
0x1834   :  { %v2524_v31 = vadd.f32 1.0, %v4912_v30 }
0x1836   :  { %4913 = vrcp.f32 %v2524_v31 }
0x1843   :  { %v4914_v52 = vpop.eup %4913 }
0x1844   :  { %v2528_v10 = vmul.f32 %v4914_v52, %v5627_v51 }
0x187e   :  { %v2454_v32 = vpop.permute.xlu1 %2453 }
0x187f   :  { %v2456_v28 = vmul.f32 %v4910_v27, %v2454_v32 }
0x1881   :  { %2458 = vrot.lane.b32.xlu1 %v2456_v28, %s5107_s5 }
0x1894   :  { %v2531_v34 = vpop.permute.xlu0 %2530 }
0x1895   :  { %v2533_v36 = vmul.f32 %v4914_v52, %v2531_v34 }
0x1897   :  { %2535 = vrot.lane.b32.xlu0 %v2533_v36, %s5107_s5 }
0x18f3   :  { %v2459_v38 = vpop.permute.xlu1 %2458 }
0x18f4   :  { %v5673_v39 = vadd.f32 %v2459_v38, %v2451_v37 }
0x18f6   :  { %4915 = vtanh.f32 %v5673_v39 }
0x1903   :  { %v4916_v23 = vpop.eup %4915 }
0x1904   :  { %2464 = vrot.lane.b32.xlu1 %v4916_v23, %s5107_s5 }
0x1909   :  { %v2536_v14 = vpop.permute.xlu0 %2535 }
0x190a   :  { %v5678_v40 = vadd.f32 %v2536_v14, %v2528_v10 }
0x190c   :  { %4917 = vtanh.f32 %v5678_v40 }
0x1919   :  { %v4918_v41 = vpop.eup %4917 }
0x191a   :  { %2541 = vrot.lane.b32.xlu0 %v4918_v41, %s5107_s5 }
0x1976   :  { %v2465_v43 = vpop.permute.xlu1 %2464 }
0x1977   :  { %v2467_v44 = vmul.f32 %v4910_v27, %v2465_v43 }
0x1979   :  { %2618 = vrot.lane.b32.xlu0 %v2467_v44, %s5098_s15  ;;  %v2545_v45 = vpack.c.bf16 %v2467_v44, %v2467_v44 }
0x197b   :  { %2547 = vrot.lane.b32.xlu1 %v2545_v45, %s5098_s15 }
0x198c   :  { %v2542_v47 = vpop.permute.xlu0 %2541 }
0x198d   :  { %v2544_v49 = vmul.f32 %v4914_v52, %v2542_v47 }
0x198f   :  { %2622 = vrot.lane.b32.xlu1 %v2544_v49, %s5108_s10 }
0x19eb   :  { %v2619_v50 = vpop.permute.xlu0 %2618 }
0x19ed   :  { %v2548_v42 = vpop.permute.xlu1 %2547 }
0x19ee   :  { %4498 = vmatmul.mubr.msk.bf16.vlgmr.msra.gmra.mxu0 %vm1260_vm1, %v2548_v42 }
0x19ef   :  { %4502 = vmatpush3.bf16.msra.mxu0 %v5635_v61  ;;  %4509 = vmatprep.mubr.msk.bf16.mxu0 %vm5104_vm14, %v5103_v33 }
0x19f0   :  { %4503 = vmatprep.subr.bf16.mxu0 %v5103_v33 }
0x19f3   :  { %4504 = vmatpush3.bf16.msra.mxu0 %v5641_v0 }
0x19f4   :  { %4505 = vmatprep.subr.bf16.mxu0 %v5103_v33 }
0x19f7   :  { %4506 = vmatpush3.bf16.msra.mxu0 %v5645_v2 }
0x19f8   :  { %4507 = vmatprep.subr.bf16.mxu0 %v5103_v33 }
0x19fb   :  { %4508 = vmatpush3.bf16.msra.mxu0 %v5649_v7 }
0x19fc   :  { %4533 = vmatprep.subr.bf16.mxu0 %v5103_v33 }
0x1a01   :  { %v2623_v51 = vpop.permute.xlu1 %2622 }
0x1a02   :  { %v2625_v26 = vsel %vm1260_vm1, %v2619_v50, %v2623_v51 }
0x1a03   :  { %v2626_v25 = vpack.c.bf16 %v2625_v26, %v2625_v26 }
0x1a05   :  { %4510 = vmatmul.mubr.msk.bf16.vlgmr.msra.gmra.mxu0 %vm387_vm12, %v2626_v25 }
0x1a06   :  { %4534 = vmatpush3.bf16.msra.mxu0 %v5489_v48  ;;  %4537 = vmatprep.mubr.msk.bf16.mxu0 %vm5104_vm14, %v5103_v33 }
0x1a07   :  { %4535 = vmatprep.subr.bf16.mxu0 %v5103_v33 }
0x1a0a   :  { %4536 = vmatpush3.bf16.msra.mxu0 %v5495_v9 }
0x1a0b   :  { %4541 = vmatprep.subr.bf16.mxu0 %v5103_v33 }
0x1aae   :  { %v2586_v1 = vpop.f32.mrf.mxu0 }
0x1aaf   :  { %v2592_v24 = vadd.f32 %v2586_v1, %v1231_v54 }
0x1ab0   :  { %v4499_v55 = vpop.f32.mrf.mxu0 }
0x1ab1   :  { %4919 = vtanh.f32 %v2592_v24  ;;  %v4061_v62 = vmul.f32 -1.442695, %v2592_v24 }
0x1ab2   :  { %v2589_v59 = vpop.f32.mrf.mxu0 }
0x1ab4   :  { %v4500_v3 = vpop.f32.mrf.mxu0 }
0x1abe   :  { %v4920_v4 = vpop.eup %4919 }
0x1abf   :  { %2602 = vrot.lane.b32.xlu0 %v4920_v4, %s5107_s5 }
0x1ac5   :  { %v2664_v35 = vpop.f32.mrf.mxu0 }
0x1ac6   :  { %v2665_v8 = vadd.f32 %v5666_v56, %v2664_v35 }
0x1ac7   :  { %v4511_v12 = vpop.f32.mrf.mxu0 }
0x1ac8   :  { %4921 = vtanh.f32 %v2665_v8  ;;  %v4063_v18 = vmul.f32 -1.442695, %v2665_v8 }
0x1ac9   :  { %v2667_v53 = vpop.f32.mrf.mxu0  ;;  %4923 = vpow2.f32 %v4061_v62 }
0x1acb   :  { %v4512_v13 = vpop.f32.mrf.mxu0 }
0x1ad5   :  { %v4922_v15 = vpop.eup %4921 }
0x1ad6   :  { %2679 = vrot.lane.b32.xlu1 %v4922_v15, %s5107_s5  ;;  %v4924_v16 = vpop.eup %4923 }
0x1ad7   :  { %v2596_v17 = vadd.f32 1.0, %v4924_v16 }
0x1ad9   :  { %4925 = vrcp.f32 %v2596_v17 }
0x1ada   :  { %4927 = vpow2.f32 %v4063_v18 }
0x1ae6   :  { %v4926_v29 = vpop.eup %4925 }
0x1ae7   :  { %v4928_v60 = vpop.eup %4927  ;;  %v2600_v22 = vmul.f32 %v4926_v29, %v5673_v39 }
0x1ae8   :  { %v2673_v11 = vadd.f32 1.0, %v4928_v60 }
0x1aea   :  { %4929 = vrcp.f32 %v2673_v11 }
0x1af7   :  { %v4930_v19 = vpop.eup %4929 }
0x1af8   :  { %v2677_v30 = vmul.f32 %v4930_v19, %v5678_v40 }
0x1b31   :  { %v2603_v57 = vpop.permute.xlu0 %2602 }
0x1b32   :  { %v2605_v58 = vmul.f32 %v4926_v29, %v2603_v57 }
0x1b34   :  { %2607 = vrot.lane.b32.xlu0 %v2605_v58, %s5107_s5 }
0x1b48   :  { %v2680_v20 = vpop.permute.xlu1 %2679 }
0x1b49   :  { %v2682_v21 = vmul.f32 %v4930_v19, %v2680_v20 }
0x1b4b   :  { %2684 = vrot.lane.b32.xlu1 %v2682_v21, %s5107_s5 }
0x1ba6   :  { %v2608_v27 = vpop.permute.xlu0 %2607 }
0x1ba7   :  { %v5712_v32 = vadd.f32 %v2608_v27, %v2600_v22 }
0x1ba9   :  { %4931 = vtanh.f32 %v5712_v32 }
0x1bb6   :  { %v4932_v28 = vpop.eup %4931 }
0x1bb7   :  { %2613 = vrot.lane.b32.xlu0 %v4932_v28, %s5107_s5 }
0x1bbd   :  { %v2685_v31 = vpop.permute.xlu1 %2684 }
0x1bbe   :  { %v5717_v52 = vadd.f32 %v2685_v31, %v2677_v30 }
0x1bc0   :  { %4933 = vtanh.f32 %v5717_v52 }
0x1bcd   :  { %v4934_v34 = vpop.eup %4933 }
0x1bce   :  { %2690 = vrot.lane.b32.xlu1 %v4934_v34, %s5107_s5  ;;  %v5781_v34 = vld [vmem:[#allocation2 + $0x178] sm:$0xff]  }
0x1c29   :  { %v2614_v36 = vpop.permute.xlu0 %2613 }
0x1c2a   :  { %v2616_v37 = vmul.f32 %v4926_v29, %v2614_v36  ;;  %v1232_v36 = vcombine.high %v5318_v63, %v5103_v33 }
0x1c2c   :  { %2767 = vrot.lane.b32.xlu1 %v2616_v37, %s5098_s15  ;;  %v2694_v38 = vpack.c.bf16 %v2616_v37, %v2616_v37 }
0x1c2e   :  { %2696 = vrot.lane.b32.xlu0 %v2694_v38, %s5098_s15 }
0x1c40   :  { %v2691_v39 = vpop.permute.xlu1 %2690 }
0x1c41   :  { %v2693_v23 = vmul.f32 %v4930_v19, %v2691_v39 }
0x1c43   :  { %2771 = vrot.lane.b32.xlu0 %v2693_v23, %s5108_s10 }
0x1c9e   :  { %v2768_v14 = vpop.permute.xlu1 %2767 }
0x1ca0   :  { %v2697_v10 = vpop.permute.xlu0 %2696 }
0x1ca1   :  { %4518 = vmatmul.mubr.msk.bf16.vlgmr.msra.gmra.mxu1 %vm1260_vm1, %v2697_v10 }
0x1ca2   :  { %4522 = vmatpush3.bf16.msra.mxu1 %v5635_v61  ;;  %4529 = vmatprep.mubr.msk.bf16.mxu1 %vm5104_vm14, %v5103_v33 }
0x1ca3   :  { %4523 = vmatprep.subr.bf16.mxu1 %v5103_v33 }
0x1ca6   :  { %4524 = vmatpush3.bf16.msra.mxu1 %v5641_v0 }
0x1ca7   :  { %4525 = vmatprep.subr.bf16.mxu1 %v5103_v33 }
0x1caa   :  { %4526 = vmatpush3.bf16.msra.mxu1 %v5645_v2 }
0x1cab   :  { %4527 = vmatprep.subr.bf16.mxu1 %v5103_v33 }
0x1cae   :  { %4528 = vmatpush3.bf16.msra.mxu1 %v5649_v7 }
0x1caf   :  { %4553 = vmatprep.subr.bf16.mxu1 %v5103_v33 }
0x1cb5   :  { %v2772_v40 = vpop.permute.xlu0 %2771 }
0x1cb6   :  { %v2774_v41 = vsel %vm1260_vm1, %v2768_v14, %v2772_v40 }
0x1cb7   :  { %v2775_v43 = vpack.c.bf16 %v2774_v41, %v2774_v41 }
0x1cb9   :  { %4530 = vmatmul.mubr.msk.bf16.vlgmr.msra.gmra.mxu1 %vm387_vm12, %v2775_v43 }
0x1cba   :  { %4554 = vmatpush3.bf16.msra.mxu1 %v5489_v48  ;;  %4557 = vmatprep.mubr.msk.bf16.mxu1 %vm5104_vm14, %v5103_v33 }
0x1cbb   :  { %4555 = vmatprep.subr.bf16.mxu1 %v5103_v33 }
0x1cbe   :  { %4556 = vmatpush3.bf16.msra.mxu1 %v5495_v9 }
0x1cbf   :  { %4561 = vmatprep.subr.bf16.mxu1 %v5103_v33 }
0x1d61   :  { %v2735_v44 = vpop.f32.mrf.mxu1 }
0x1d62   :  { %v2741_v45 = vadd.f32 %v2735_v44, %v5318_v63 }
0x1d63   :  { %v4519_v47 = vpop.f32.mrf.mxu1 }
0x1d64   :  { %4935 = vtanh.f32 %v2741_v45  ;;  %v4065_v1 = vmul.f32 -1.442695, %v2741_v45 }
0x1d65   :  { %v2738_v49 = vpop.f32.mrf.mxu1 }
0x1d67   :  { %v4520_v42 = vpop.f32.mrf.mxu1 }
0x1d71   :  { %v4936_v50 = vpop.eup %4935 }
0x1d72   :  { %2751 = vrot.lane.b32.xlu1 %v4936_v50, %s5107_s5 }
0x1d79   :  { %v2813_v48 = vpop.f32.mrf.mxu1 }
0x1d7a   :  { %v2814_v51 = vadd.f32 %v5666_v56, %v2813_v48 }
0x1d7b   :  { %v4531_v26 = vpop.f32.mrf.mxu1 }
0x1d7c   :  { %4937 = vtanh.f32 %v2814_v51  ;;  %v4067_v59 = vmul.f32 -1.442695, %v2814_v51 }
0x1d7d   :  { %v2816_v25 = vpop.f32.mrf.mxu1  ;;  %4939 = vpow2.f32 %v4065_v1 }
0x1d7f   :  { %v4532_v54 = vpop.f32.mrf.mxu1 }
0x1d89   :  { %v4938_v9 = vpop.eup %4937 }
0x1d8a   :  { %2828 = vrot.lane.b32.xlu0 %v4938_v9, %s5107_s5  ;;  %v4940_v24 = vpop.eup %4939 }
0x1d8b   :  { %v2745_v55 = vadd.f32 1.0, %v4940_v24 }
0x1d8d   :  { %4941 = vrcp.f32 %v2745_v55 }
0x1d8e   :  { %4943 = vpow2.f32 %v4067_v59 }
0x1d9a   :  { %v4942_v3 = vpop.eup %4941 }
0x1d9b   :  { %v4944_v8 = vpop.eup %4943  ;;  %v2749_v62 = vmul.f32 %v4942_v3, %v5712_v32 }
0x1d9c   :  { %v2822_v12 = vadd.f32 1.0, %v4944_v8 }
0x1d9e   :  { %4945 = vrcp.f32 %v2822_v12 }
0x1dab   :  { %v4946_v53 = vpop.eup %4945 }
0x1dac   :  { %v2826_v29 = vmul.f32 %v4946_v53, %v5717_v52  ;;  %v5775_v52 = vld [vmem:[#allocation2 + $0x180] sm:$0xff]  }
0x1de4   :  { %v2752_v4 = vpop.permute.xlu1 %2751 }
0x1de5   :  { %v2754_v35 = vmul.f32 %v4942_v3, %v2752_v4 }
0x1de7   :  { %2756 = vrot.lane.b32.xlu1 %v2754_v35, %s5107_s5 }
0x1dfc   :  { %v2829_v13 = vpop.permute.xlu0 %2828 }
0x1dfd   :  { %v2831_v15 = vmul.f32 %v4946_v53, %v2829_v13 }
0x1dff   :  { %2833 = vrot.lane.b32.xlu0 %v2831_v15, %s5107_s5 }
0x1e59   :  { %v2757_v16 = vpop.permute.xlu1 %2756 }
0x1e5a   :  { %v5750_v17 = vadd.f32 %v2757_v16, %v2749_v62 }
0x1e5c   :  { %4947 = vtanh.f32 %v5750_v17 }
0x1e69   :  { %v4948_v18 = vpop.eup %4947 }
0x1e6a   :  { %2762 = vrot.lane.b32.xlu1 %v4948_v18, %s5107_s5 }
0x1e71   :  { %v2834_v57 = vpop.permute.xlu0 %2833 }
0x1e72   :  { %v5755_v58 = vadd.f32 %v2834_v57, %v2826_v29 }
0x1e74   :  { %4949 = vtanh.f32 %v5755_v58 }
0x1e81   :  { %v4950_v60 = vpop.eup %4949 }
0x1e82   :  { %2839 = vrot.lane.b32.xlu0 %v4950_v60, %s5107_s5 }
0x1edc   :  { %v2763_v11 = vpop.permute.xlu1 %2762 }
0x1edd   :  { %v2765_v19 = vmul.f32 %v4942_v3, %v2763_v11 }
0x1edf   :  { %2916 = vrot.lane.b32.xlu0 %v2765_v19, %s5098_s15  ;;  %v2843_v20 = vpack.c.bf16 %v2765_v19, %v2765_v19 }
0x1ee1   :  { %2845 = vrot.lane.b32.xlu1 %v2843_v20, %s5098_s15 }
0x1ef4   :  { %v2840_v21 = vpop.permute.xlu0 %2839 }
0x1ef5   :  { %v2842_v22 = vmul.f32 %v4946_v53, %v2840_v21 }
0x1ef7   :  { %2920 = vrot.lane.b32.xlu1 %v2842_v22, %s5108_s10 }
0x1f51   :  { %v2917_v32 = vpop.permute.xlu0 %2916 }
0x1f53   :  { %v2846_v27 = vpop.permute.xlu1 %2845 }
0x1f54   :  { %4538 = vmatmul.mubr.msk.bf16.vlgmr.msra.gmra.mxu0 %vm1260_vm1, %v2846_v27 }
0x1f55   :  { %4542 = vmatpush3.bf16.msra.mxu0 %v5635_v61  ;;  %4549 = vmatprep.mubr.msk.bf16.mxu0 %vm5104_vm14, %v5103_v33 }
0x1f56   :  { %4543 = vmatprep.subr.bf16.mxu0 %v5103_v33 }
0x1f59   :  { %4544 = vmatpush3.bf16.msra.mxu0 %v5641_v0 }
0x1f5a   :  { %4545 = vmatprep.subr.bf16.mxu0 %v5103_v33 }
0x1f5d   :  { %4546 = vmatpush3.bf16.msra.mxu0 %v5645_v2 }
0x1f5e   :  { %4547 = vmatprep.subr.bf16.mxu0 %v5103_v33 }
0x1f61   :  { %4548 = vmatpush3.bf16.msra.mxu0 %v5649_v7 }
0x1f62   :  { %4573 = vmatprep.subr.bf16.mxu0 %v5103_v33 }
0x1f69   :  { %v2921_v28 = vpop.permute.xlu1 %2920 }
0x1f6a   :  { %v2923_v30 = vsel %vm1260_vm1, %v2917_v32, %v2921_v28 }
0x1f6b   :  { %v2924_v31 = vpack.c.bf16 %v2923_v30, %v2923_v30 }
0x1f6d   :  { %4550 = vmatmul.mubr.msk.bf16.vlgmr.msra.gmra.mxu0 %vm387_vm12, %v2924_v31 }
0x1f6e   :  { %4574 = vmatpush3.bf16.msra.mxu0 %v5775_v52  ;;  %4577 = vmatprep.mubr.msk.bf16.mxu0 %vm5104_vm14, %v5103_v33 }
0x1f6f   :  { %4575 = vmatprep.subr.bf16.mxu0 %v5103_v33 }
0x1f72   :  { %4576 = vmatpush3.bf16.msra.mxu0 %v5781_v34 }
0x1f73   :  { %4581 = vmatprep.subr.bf16.mxu0 %v5103_v33 }
0x2014   :  { %v2884_v37 = vpop.f32.mrf.mxu0 }
0x2015   :  { %v2890_v38 = vadd.f32 %v2884_v37, %v1232_v36 }
0x2016   :  { %v4539_v39 = vpop.f32.mrf.mxu0 }
0x2017   :  { %4951 = vtanh.f32 %v2890_v38  ;;  %v4069_v63 = vmul.f32 -1.442695, %v2890_v38 }
0x2018   :  { %v2887_v23 = vpop.f32.mrf.mxu0 }
0x201a   :  { %v4540_v10 = vpop.f32.mrf.mxu0 }
0x2024   :  { %v4952_v14 = vpop.eup %4951 }
0x2025   :  { %2900 = vrot.lane.b32.xlu0 %v4952_v14, %s5107_s5 }
0x202d   :  { %v2962_v40 = vpop.f32.mrf.mxu0 }
0x202e   :  { %v2963_v41 = vadd.f32 %v5666_v56, %v2962_v40 }
0x202f   :  { %v4551_v43 = vpop.f32.mrf.mxu0 }
0x2030   :  { %4953 = vtanh.f32 %v2963_v41  ;;  %v4071_v50 = vmul.f32 -1.442695, %v2963_v41 }
0x2031   :  { %v2965_v44 = vpop.f32.mrf.mxu0  ;;  %4955 = vpow2.f32 %v4069_v63 }
0x2033   :  { %v4552_v45 = vpop.f32.mrf.mxu0 }
0x203d   :  { %v4954_v47 = vpop.eup %4953 }
0x203e   :  { %2977 = vrot.lane.b32.xlu1 %v4954_v47, %s5107_s5  ;;  %v4956_v49 = vpop.eup %4955 }
0x203f   :  { %v2894_v42 = vadd.f32 1.0, %v4956_v49 }
0x2041   :  { %4957 = vrcp.f32 %v2894_v42 }
0x2042   :  { %4959 = vpow2.f32 %v4071_v50 }
0x204e   :  { %v4958_v48 = vpop.eup %4957 }
0x204f   :  { %v4960_v25 = vpop.eup %4959  ;;  %v2898_v55 = vmul.f32 %v4958_v48, %v5750_v17 }
0x2050   :  { %v2971_v54 = vadd.f32 1.0, %v4960_v25 }
0x2052   :  { %4961 = vrcp.f32 %v2971_v54 }
0x205f   :  { %v4962_v9 = vpop.eup %4961 }
0x2060   :  { %v2975_v35 = vmul.f32 %v4962_v9, %v5755_v58 }
0x2097   :  { %v2901_v51 = vpop.permute.xlu0 %2900 }
0x2098   :  { %v2903_v26 = vmul.f32 %v4958_v48, %v2901_v51 }
0x209a   :  { %2905 = vrot.lane.b32.xlu0 %v2903_v26, %s5107_s5 }
0x20b0   :  { %v2978_v1 = vpop.permute.xlu1 %2977 }
0x20b1   :  { %v2980_v24 = vmul.f32 %v4962_v9, %v2978_v1 }
0x20b3   :  { %2982 = vrot.lane.b32.xlu1 %v2980_v24, %s5107_s5 }
0x210c   :  { %v2906_v59 = vpop.permute.xlu0 %2905 }
0x210d   :  { %v5793_v3 = vadd.f32 %v2906_v59, %v2898_v55 }
0x210f   :  { %4963 = vtanh.f32 %v5793_v3 }
0x211c   :  { %v4964_v4 = vpop.eup %4963 }
0x211d   :  { %2911 = vrot.lane.b32.xlu0 %v4964_v4, %s5107_s5 }
0x2125   :  { %v2983_v8 = vpop.permute.xlu1 %2982 }
0x2126   :  { %v5798_v12 = vadd.f32 %v2983_v8, %v2975_v35 }
0x2128   :  { %4965 = vtanh.f32 %v5798_v12 }
0x2135   :  { %v4966_v53 = vpop.eup %4965 }
0x2136   :  { %2988 = vrot.lane.b32.xlu1 %v4966_v53, %s5107_s5  ;;  %v1233_v53 = vcombine.high %v5322_v5, %v5103_v33 }
0x218f   :  { %v2912_v13 = vpop.permute.xlu0 %2911 }
0x2190   :  { %v2914_v15 = vmul.f32 %v4958_v48, %v2912_v13 }
0x2192   :  { %v2992_v62 = vpack.c.bf16 %v2914_v15, %v2914_v15  ;;  %3065 = vrot.lane.b32.xlu1 %v2914_v15, %s5098_s15 }
0x2194   :  { %2994 = vrot.lane.b32.xlu0 %v2992_v62, %s5098_s15 }
0x21a8   :  { %v2989_v16 = vpop.permute.xlu1 %2988 }
0x21a9   :  { %v2991_v17 = vmul.f32 %v4962_v9, %v2989_v16 }
0x21ab   :  { %3069 = vrot.lane.b32.xlu0 %v2991_v17, %s5108_s10 }
0x2204   :  { %v3066_v29 = vpop.permute.xlu1 %3065 }
0x2206   :  { %v2995_v18 = vpop.permute.xlu0 %2994 }
0x2207   :  { %4558 = vmatmul.mubr.msk.bf16.vlgmr.msra.gmra.mxu1 %vm1260_vm1, %v2995_v18 }
0x2208   :  { %4562 = vmatpush3.bf16.msra.mxu1 %v5635_v61  ;;  %4569 = vmatprep.mubr.msk.bf16.mxu1 %vm5104_vm14, %v5103_v33 }
0x2209   :  { %4563 = vmatprep.subr.bf16.mxu1 %v5103_v33 }
0x220c   :  { %4564 = vmatpush3.bf16.msra.mxu1 %v5641_v0 }
0x220d   :  { %4565 = vmatprep.subr.bf16.mxu1 %v5103_v33 }
0x2210   :  { %4566 = vmatpush3.bf16.msra.mxu1 %v5645_v2 }
0x2211   :  { %4567 = vmatprep.subr.bf16.mxu1 %v5103_v33 }
0x2214   :  { %4568 = vmatpush3.bf16.msra.mxu1 %v5649_v7 }
0x2215   :  { %4593 = vmatprep.subr.bf16.mxu1 %v5103_v33 }
0x221d   :  { %v3070_v57 = vpop.permute.xlu0 %3069 }
0x221e   :  { %v3072_v58 = vsel %vm1260_vm1, %v3066_v29, %v3070_v57 }
0x221f   :  { %v3073_v60 = vpack.c.bf16 %v3072_v58, %v3072_v58 }
0x2221   :  { %4570 = vmatmul.mubr.msk.bf16.vlgmr.msra.gmra.mxu1 %vm387_vm12, %v3073_v60 }
0x2222   :  { %4594 = vmatpush3.bf16.msra.mxu1 %v5775_v52  ;;  %4597 = vmatprep.mubr.msk.bf16.mxu1 %vm5104_vm14, %v5103_v33 }
0x2223   :  { %4595 = vmatprep.subr.bf16.mxu1 %v5103_v33 }
0x2226   :  { %4596 = vmatpush3.bf16.msra.mxu1 %v5781_v34 }
0x2227   :  { %4601 = vmatprep.subr.bf16.mxu1 %v5103_v33 }
0x22c7   :  { %v3033_v11 = vpop.f32.mrf.mxu1 }
0x22c8   :  { %v3039_v19 = vadd.f32 %v3033_v11, %v5322_v5 }
0x22c9   :  { %v4559_v20 = vpop.f32.mrf.mxu1 }
0x22ca   :  { %4967 = vtanh.f32 %v3039_v19  ;;  %v4073_v38 = vmul.f32 -1.442695, %v3039_v19 }
0x22cb   :  { %v3036_v21 = vpop.f32.mrf.mxu1 }
0x22cd   :  { %v4560_v22 = vpop.f32.mrf.mxu1 }
0x22d7   :  { %v4968_v27 = vpop.eup %4967 }
0x22d8   :  { %3049 = vrot.lane.b32.xlu1 %v4968_v27, %s5107_s5 }
0x22e1   :  { %v3111_v32 = vpop.f32.mrf.mxu1 }
0x22e2   :  { %v3112_v28 = vadd.f32 %v5666_v56, %v3111_v32 }
0x22e3   :  { %v4571_v30 = vpop.f32.mrf.mxu1 }
0x22e4   :  { %4969 = vtanh.f32 %v3112_v28  ;;  %v4075_v10 = vmul.f32 -1.442695, %v3112_v28 }
0x22e5   :  { %v3114_v31 = vpop.f32.mrf.mxu1  ;;  %4971 = vpow2.f32 %v4073_v38 }
0x22e7   :  { %v4572_v36 = vpop.f32.mrf.mxu1 }
0x22f1   :  { %v4970_v37 = vpop.eup %4969 }
0x22f2   :  { %3126 = vrot.lane.b32.xlu0 %v4970_v37, %s5107_s5  ;;  %v4972_v39 = vpop.eup %4971 }
0x22f3   :  { %v3043_v23 = vadd.f32 1.0, %v4972_v39 }
0x22f5   :  { %4973 = vrcp.f32 %v3043_v23 }
0x22f6   :  { %4975 = vpow2.f32 %v4075_v10 }
0x2302   :  { %v4974_v14 = vpop.eup %4973 }
0x2303   :  { %v4976_v43 = vpop.eup %4975  ;;  %v3047_v49 = vmul.f32 %v4974_v14, %v5793_v3 }
0x2304   :  { %v3120_v44 = vadd.f32 1.0, %v4976_v43 }
0x2306   :  { %4977 = vrcp.f32 %v3120_v44 }
0x2313   :  { %v4978_v45 = vpop.eup %4977 }
0x2314   :  { %v3124_v51 = vmul.f32 %v4978_v45, %v5798_v12 }
0x234a   :  { %v3050_v40 = vpop.permute.xlu1 %3049 }
0x234b   :  { %v3052_v41 = vmul.f32 %v4974_v14, %v3050_v40 }
0x234d   :  { %3054 = vrot.lane.b32.xlu1 %v3052_v41, %s5107_s5 }
0x2364   :  { %v3127_v47 = vpop.permute.xlu0 %3126 }
0x2365   :  { %v3129_v63 = vmul.f32 %v4978_v45, %v3127_v47 }
0x2367   :  { %3131 = vrot.lane.b32.xlu0 %v3129_v63, %s5107_s5 }
0x23bf   :  { %v3055_v42 = vpop.permute.xlu1 %3054 }
0x23c0   :  { %v5831_v50 = vadd.f32 %v3055_v42, %v3047_v49 }
0x23c2   :  { %4979 = vtanh.f32 %v5831_v50 }
0x23cf   :  { %v4980_v48 = vpop.eup %4979 }
0x23d0   :  { %3060 = vrot.lane.b32.xlu1 %v4980_v48, %s5107_s5 }
0x23d9   :  { %v3132_v26 = vpop.permute.xlu0 %3131 }
0x23da   :  { %v5836_v25 = vadd.f32 %v3132_v26, %v3124_v51 }
0x23dc   :  { %4981 = vtanh.f32 %v5836_v25 }
0x23e9   :  { %v4982_v54 = vpop.eup %4981 }
0x23ea   :  { %3137 = vrot.lane.b32.xlu0 %v4982_v54, %s5107_s5 }
0x2442   :  { %v3061_v9 = vpop.permute.xlu1 %3060 }
0x2443   :  { %v3063_v1 = vmul.f32 %v4974_v14, %v3061_v9 }
0x2445   :  { %v3141_v24 = vpack.c.bf16 %v3063_v1, %v3063_v1  ;;  %3214 = vrot.lane.b32.xlu0 %v3063_v1, %s5098_s15 }
0x2447   :  { %3143 = vrot.lane.b32.xlu1 %v3141_v24, %s5098_s15 }
0x245c   :  { %v3138_v55 = vpop.permute.xlu0 %3137 }
0x245d   :  { %v3140_v59 = vmul.f32 %v4978_v45, %v3138_v55 }
0x245f   :  { %3218 = vrot.lane.b32.xlu1 %v3140_v59, %s5108_s10 }
0x24b7   :  { %v3215_v4 = vpop.permute.xlu0 %3214 }
0x24b9   :  { %v3144_v3 = vpop.permute.xlu1 %3143 }
0x24ba   :  { %4578 = vmatmul.mubr.msk.bf16.vlgmr.msra.gmra.mxu0 %vm1260_vm1, %v3144_v3 }
0x24bb   :  { %4582 = vmatpush3.bf16.msra.mxu0 %v5635_v61  ;;  %4589 = vmatprep.mubr.msk.bf16.mxu0 %vm5104_vm14, %v5103_v33 }
0x24bc   :  { %4583 = vmatprep.subr.bf16.mxu0 %v5103_v33 }
0x24bf   :  { %4584 = vmatpush3.bf16.msra.mxu0 %v5641_v0 }
0x24c0   :  { %4585 = vmatprep.subr.bf16.mxu0 %v5103_v33 }
0x24c3   :  { %4586 = vmatpush3.bf16.msra.mxu0 %v5645_v2 }
0x24c4   :  { %4587 = vmatprep.subr.bf16.mxu0 %v5103_v33 }
0x24c7   :  { %4588 = vmatpush3.bf16.msra.mxu0 %v5649_v7 }
0x24c8   :  { %4613 = vmatprep.subr.bf16.mxu0 %v5103_v33 }
0x24d1   :  { %v3219_v35 = vpop.permute.xlu1 %3218 }
0x24d2   :  { %v3221_v8 = vsel %vm1260_vm1, %v3215_v4, %v3219_v35 }
0x24d3   :  { %v3222_v12 = vpack.c.bf16 %v3221_v8, %v3221_v8 }
0x24d5   :  { %4590 = vmatmul.mubr.msk.bf16.vlgmr.msra.gmra.mxu0 %vm387_vm12, %v3222_v12 }
0x24d6   :  { %4614 = vmatpush3.bf16.msra.mxu0 %v5775_v52  ;;  %4617 = vmatprep.mubr.msk.bf16.mxu0 %vm5104_vm14, %v5103_v33 }
0x24d7   :  { %4615 = vmatprep.subr.bf16.mxu0 %v5103_v33 }
0x24da   :  { %4616 = vmatpush3.bf16.msra.mxu0 %v5781_v34 }
0x24db   :  { %4621 = vmatprep.subr.bf16.mxu0 %v5103_v33 }
0x257a   :  { %v3182_v13 = vpop.f32.mrf.mxu0 }
0x257b   :  { %v3188_v15 = vadd.f32 %v3182_v13, %v1233_v53 }
0x257c   :  { %v4579_v62 = vpop.f32.mrf.mxu0 }
0x257d   :  { %4983 = vtanh.f32 %v3188_v15  ;;  %v4077_v5 = vmul.f32 -1.442695, %v3188_v15 }
0x257e   :  { %v3185_v16 = vpop.f32.mrf.mxu0 }
0x2580   :  { %v4580_v17 = vpop.f32.mrf.mxu0 }
0x258a   :  { %v4984_v18 = vpop.eup %4983 }
0x258b   :  { %3198 = vrot.lane.b32.xlu0 %v4984_v18, %s5107_s5 }
0x2595   :  { %v3260_v52 = vpop.f32.mrf.mxu0 }
0x2596   :  { %v3261_v29 = vadd.f32 %v5666_v56, %v3260_v52 }
0x2597   :  { %v4591_v57 = vpop.f32.mrf.mxu0 }
0x2598   :  { %4985 = vtanh.f32 %v3261_v29  ;;  %v4079_v20 = vmul.f32 -1.442695, %v3261_v29 }
0x2599   :  { %v3263_v34 = vpop.f32.mrf.mxu0  ;;  %4987 = vpow2.f32 %v4077_v5 }
0x259b   :  { %v4592_v58 = vpop.f32.mrf.mxu0 }
0x25a5   :  { %v4986_v60 = vpop.eup %4985 }
0x25a6   :  { %3275 = vrot.lane.b32.xlu1 %v4986_v60, %s5107_s5  ;;  %v4988_v11 = vpop.eup %4987 }
0x25a7   :  { %v3192_v19 = vadd.f32 1.0, %v4988_v11 }
0x25a9   :  { %4989 = vrcp.f32 %v3192_v19 }
0x25aa   :  { %4991 = vpow2.f32 %v4079_v20 }
0x25b6   :  { %v4990_v21 = vpop.eup %4989 }
0x25b7   :  { %v4992_v32 = vpop.eup %4991  ;;  %v3196_v37 = vmul.f32 %v4990_v21, %v5831_v50 }
0x25b8   :  { %v3269_v28 = vadd.f32 1.0, %v4992_v32  ;;  %v5048_v32 = vld [vmem:[#allocation2 + $0x1a0] sm:$0xff]  }
0x25ba   :  { %4993 = vrcp.f32 %v3269_v28  ;;  %v5049_v28 = vld [vmem:[#allocation2 + $0x198] sm:$0xff]  }
0x25c7   :  { %v4994_v30 = vpop.eup %4993 }
0x25c8   :  { %v3273_v10 = vmul.f32 %v4994_v30, %v5836_v25 }
0x25fd   :  { %v3199_v22 = vpop.permute.xlu0 %3198 }
0x25fe   :  { %v3201_v27 = vmul.f32 %v4990_v21, %v3199_v22 }
0x2600   :  { %3203 = vrot.lane.b32.xlu0 %v3201_v27, %s5107_s5 }
0x2618   :  { %v3276_v31 = vpop.permute.xlu1 %3275 }
0x2619   :  { %v3278_v36 = vmul.f32 %v4994_v30, %v3276_v31  ;;  %v5051_v31 = vld [vmem:[#allocation2 + $0x188] sm:$0xff]  }
0x261b   :  { %3280 = vrot.lane.b32.xlu1 %v3278_v36, %s5107_s5 }
0x2672   :  { %v3204_v38 = vpop.permute.xlu0 %3203 }
0x2673   :  { %v5870_v39 = vadd.f32 %v3204_v38, %v3196_v37 }
0x2675   :  { %4995 = vtanh.f32 %v5870_v39 }
0x2682   :  { %v4996_v23 = vpop.eup %4995 }
0x2683   :  { %3209 = vrot.lane.b32.xlu0 %v4996_v23, %s5107_s5  ;;  %v1234_v23 = vcombine.high %v5325_v6, %v5103_v33 }
0x268d   :  { %v3281_v14 = vpop.permute.xlu1 %3280 }
0x268e   :  { %v5875_v40 = vadd.f32 %v3281_v14, %v3273_v10 }
0x2690   :  { %4997 = vtanh.f32 %v5875_v40 }
0x269d   :  { %v4998_v41 = vpop.eup %4997 }
0x269e   :  { %3286 = vrot.lane.b32.xlu1 %v4998_v41, %s5107_s5 }
0x26f5   :  { %v3210_v43 = vpop.permute.xlu0 %3209 }
0x26f6   :  { %v3212_v44 = vmul.f32 %v4990_v21, %v3210_v43 }
0x26f8   :  { %v3290_v45 = vpack.c.bf16 %v3212_v44, %v3212_v44  ;;  %3363 = vrot.lane.b32.xlu1 %v3212_v44, %s5098_s15 }
0x26fa   :  { %3292 = vrot.lane.b32.xlu0 %v3290_v45, %s5098_s15 }
0x2710   :  { %v3287_v47 = vpop.permute.xlu1 %3286 }
0x2711   :  { %v3289_v63 = vmul.f32 %v4994_v30, %v3287_v47  ;;  %v5050_v30 = vld [vmem:[#allocation2 + $0x190] sm:$0xff]   ;;  %v5052_v47 = vld [vmem:[%s5989_s2 + $0x4] ss:$0 sm:$0xff] }
0x2713   :  { %3367 = vrot.lane.b32.xlu0 %v3289_v63, %s5108_s10 }
0x276a   :  { %v3364_v42 = vpop.permute.xlu1 %3363 }
0x276c   :  { %v3293_v49 = vpop.permute.xlu0 %3292 }
0x276d   :  { %4598 = vmatmul.mubr.msk.bf16.vlgmr.msra.gmra.mxu1 %vm1260_vm1, %v3293_v49 }
0x276e   :  { %4602 = vmatpush3.bf16.msra.mxu1 %v5635_v61  ;;  %4609 = vmatprep.mubr.msk.bf16.mxu1 %vm5104_vm14, %v5103_v33 }
0x276f   :  { %4603 = vmatprep.subr.bf16.mxu1 %v5103_v33 }
0x2772   :  { %4604 = vmatpush3.bf16.msra.mxu1 %v5641_v0 }
0x2773   :  { %4605 = vmatprep.subr.bf16.mxu1 %v5103_v33 }
0x2776   :  { %4606 = vmatpush3.bf16.msra.mxu1 %v5645_v2 }
0x2777   :  { %4607 = vmatprep.subr.bf16.mxu1 %v5103_v33 }
0x277a   :  { %4608 = vmatpush3.bf16.msra.mxu1 %v5649_v7 }
0x277b   :  { %4633 = vmatprep.subr.bf16.mxu1 %v5103_v33 }
0x2785   :  { %v3368_v50 = vpop.permute.xlu0 %3367 }
0x2786   :  { %v3370_v48 = vsel %vm1260_vm1, %v3364_v42, %v3368_v50 }
0x2787   :  { %v3371_v51 = vpack.c.bf16 %v3370_v48, %v3370_v48 }
0x2789   :  { %4610 = vmatmul.mubr.msk.bf16.vlgmr.msra.gmra.mxu1 %vm387_vm12, %v3371_v51 }
0x278a   :  { %4634 = vmatpush3.bf16.msra.mxu1 %v5635_v61  ;;  %4641 = vmatprep.mubr.msk.bf16.mxu1 %vm5104_vm14, %v5103_v33 }
0x278b   :  { %4635 = vmatprep.subr.bf16.mxu1 %v5103_v33 }
0x278e   :  { %4636 = vmatpush3.bf16.msra.mxu1 %v5641_v0 }
0x278f   :  { %4637 = vmatprep.subr.bf16.mxu1 %v5103_v33 }
0x2792   :  { %4638 = vmatpush3.bf16.msra.mxu1 %v5645_v2 }
0x2793   :  { %4639 = vmatprep.subr.bf16.mxu1 %v5103_v33 }
0x2796   :  { %4640 = vmatpush3.bf16.msra.mxu1 %v5649_v7 }
0x2797   :  { %4653 = vmatprep.subr.bf16.mxu1 %v5103_v33 }
0x282d   :  { %v3331_v26 = vpop.f32.mrf.mxu1 }
0x282e   :  { %v3337_v61 = vadd.f32 %v3331_v26, %v5325_v6 }
0x282f   :  { %v4599_v25 = vpop.f32.mrf.mxu1 }
0x2830   :  { %4999 = vtanh.f32 %v3337_v61  ;;  %v4081_v3 = vmul.f32 -1.442695, %v3337_v61 }
0x2831   :  { %v3334_v54 = vpop.f32.mrf.mxu1 }
0x2833   :  { %v4600_v9 = vpop.f32.mrf.mxu1 }
0x283d   :  { %v5000_v1 = vpop.eup %4999 }
0x283e   :  { %3347 = vrot.lane.b32.xlu1 %v5000_v1, %s5107_s5 }
0x2849   :  { %v3409_v0 = vpop.f32.mrf.mxu1 }
0x284a   :  { %v3410_v24 = vadd.f32 %v5666_v56, %v3409_v0 }
0x284b   :  { %v4611_v2 = vpop.f32.mrf.mxu1 }
0x284c   :  { %5001 = vtanh.f32 %v3410_v24  ;;  %v4083_v8 = vmul.f32 -1.442695, %v3410_v24 }
0x284d   :  { %v3412_v55 = vpop.f32.mrf.mxu1  ;;  %5003 = vpow2.f32 %v4081_v3 }
0x284f   :  { %v4612_v59 = vpop.f32.mrf.mxu1 }
0x2859   :  { %v5002_v7 = vpop.eup %5001 }
0x285a   :  { %3424 = vrot.lane.b32.xlu0 %v5002_v7, %s5107_s5  ;;  %v5004_v4 = vpop.eup %5003 }
0x285b   :  { %v3341_v35 = vadd.f32 1.0, %v5004_v4 }
0x285d   :  { %5005 = vrcp.f32 %v3341_v35 }
0x285e   :  { %5007 = vpow2.f32 %v4083_v8 }
0x286a   :  { %v5006_v12 = vpop.eup %5005 }
0x286b   :  { %v5008_v56 = vpop.eup %5007  ;;  %v3345_v18 = vmul.f32 %v5006_v12, %v5870_v39 }
0x286c   :  { %v3418_v15 = vadd.f32 1.0, %v5008_v56 }
0x286e   :  { %5009 = vrcp.f32 %v3418_v15 }
0x287b   :  { %v5010_v62 = vpop.eup %5009 }
0x287c   :  { %v3422_v34 = vmul.f32 %v5010_v62, %v5875_v40 }
0x28b0   :  { %v3348_v53 = vpop.permute.xlu1 %3347 }
0x28b1   :  { %v3350_v13 = vmul.f32 %v5006_v12, %v3348_v53 }
0x28b3   :  { %3352 = vrot.lane.b32.xlu1 %v3350_v13, %s5107_s5 }
0x28cc   :  { %v3425_v16 = vpop.permute.xlu0 %3424 }
0x28cd   :  { %v3427_v17 = vmul.f32 %v5010_v62, %v3425_v16 }
0x28cf   :  { %3429 = vrot.lane.b32.xlu0 %v3427_v17, %s5107_s5 }
0x2925   :  { %v3353_v52 = vpop.permute.xlu1 %3352 }
0x2926   :  { %v5912_v29 = vadd.f32 %v3353_v52, %v3345_v18 }
0x2928   :  { %5011 = vtanh.f32 %v5912_v29 }
0x2935   :  { %v5012_v57 = vpop.eup %5011 }
0x2936   :  { %3358 = vrot.lane.b32.xlu1 %v5012_v57, %s5107_s5 }
0x2941   :  { %v3430_v58 = vpop.permute.xlu0 %3429 }
0x2942   :  { %v5917_v60 = vadd.f32 %v3430_v58, %v3422_v34 }
0x2944   :  { %5013 = vtanh.f32 %v5917_v60 }
0x2951   :  { %v5014_v5 = vpop.eup %5013 }
0x2952   :  { %3435 = vrot.lane.b32.xlu0 %v5014_v5, %s5107_s5 }
0x29a8   :  { %v3359_v11 = vpop.permute.xlu1 %3358 }
0x29a9   :  { %v3361_v19 = vmul.f32 %v5006_v12, %v3359_v11 }
0x29ab   :  { %v3439_v20 = vpack.c.bf16 %v3361_v19, %v3361_v19  ;;  %3512 = vrot.lane.b32.xlu0 %v3361_v19, %s5098_s15 }
0x29ad   :  { %3441 = vrot.lane.b32.xlu1 %v3439_v20, %s5098_s15 }
0x29c4   :  { %v3436_v21 = vpop.permute.xlu0 %3435 }
0x29c5   :  { %v3438_v22 = vmul.f32 %v5010_v62, %v3436_v21 }
0x29c7   :  { %3516 = vrot.lane.b32.xlu1 %v3438_v22, %s5108_s10 }
0x2a1d   :  { %v3513_v36 = vpop.permute.xlu0 %3512 }
0x2a1f   :  { %v3442_v27 = vpop.permute.xlu1 %3441 }
0x2a20   :  { %4618 = vmatmul.mubr.msk.bf16.vlgmr.msra.gmra.mxu0 %vm1260_vm1, %v3442_v27 }
0x2a21   :  { %4622 = vmatpush3.bf16.msra.mxu0 %v5048_v32  ;;  %4629 = vmatprep.mubr.msk.bf16.mxu0 %vm5104_vm14, %v5103_v33 }
0x2a22   :  { %4623 = vmatprep.subr.bf16.mxu0 %v5103_v33 }
0x2a25   :  { %4624 = vmatpush3.bf16.msra.mxu0 %v5049_v28 }
0x2a26   :  { %4625 = vmatprep.subr.bf16.mxu0 %v5103_v33 }
0x2a29   :  { %4626 = vmatpush3.bf16.msra.mxu0 %v5050_v30 }
0x2a2a   :  { %4627 = vmatprep.subr.bf16.mxu0 %v5103_v33 }
0x2a2d   :  { %4628 = vmatpush3.bf16.msra.mxu0 %v5051_v31  ;;  %v4765_v31 = vld [vmem:[#allocation2 + $0x1b0] sm:$0xff]  }
0x2a2e   :  { %4645 = vmatprep.subr.bf16.mxu0 %v5103_v33 }
0x2a39   :  { %v3517_v37 = vpop.permute.xlu1 %3516 }
0x2a3a   :  { %v3519_v38 = vsel %vm1260_vm1, %v3513_v36, %v3517_v37  ;;  %v4766_v36 = vld [vmem:[#allocation2 + $0x1a8] sm:$0xff]  }
0x2a3b   :  { %v3520_v39 = vpack.c.bf16 %v3519_v38, %v3519_v38 }
0x2a3d   :  { %4630 = vmatmul.mubr.msk.bf16.vlgmr.msra.gmra.mxu0 %vm387_vm12, %v3520_v39 }
0x2a3e   :  { %4649 = vmatprep.mubr.msk.bf16.mxu0 %vm5104_vm14, %v5103_v33  ;;  %4646 = vmatpush3.bf16.msra.mxu0 %v4765_v31 }
0x2a3f   :  { %4647 = vmatprep.subr.bf16.mxu0 %v5103_v33 }
0x2a42   :  { %4648 = vmatpush3.bf16.msra.mxu0 %v4766_v36 }
0x2a43   :  { %4673 = vmatprep.subr.bf16.mxu0 %v5103_v33 }
0x2ae0   :  { %v3480_v10 = vpop.f32.mrf.mxu0 }
0x2ae1   :  { %v3486_v14 = vadd.f32 %v3480_v10, %v1234_v23  ;;  %v4775_v10 = vld [vmem:[#allocation2 + $0x230] sm:$0xff]  }
0x2ae2   :  { %v4619_v40 = vpop.f32.mrf.mxu0 }
0x2ae3   :  { %5015 = vtanh.f32 %v3486_v14  ;;  %v4085_v48 = vmul.f32 -1.442695, %v3486_v14  ;;  %v4776_v14 = vld [vmem:[#allocation2 + $0x228] sm:$0xff]   ;;  %v4777_v40 = vld [vmem:[#allocation2 + $0x220] sm:$0xff]  }
0x2ae4   :  { %v3483_v41 = vpop.f32.mrf.mxu0 }
0x2ae5   :  { %v4778_v41 = vld [vmem:[#allocation2 + $0x218] sm:$0xff]  }
0x2ae6   :  { %v4620_v43 = vpop.f32.mrf.mxu0 }
0x2ae7   :  { %v4779_v43 = vld [vmem:[#allocation2 + $0x210] sm:$0xff]  }
0x2af0   :  { %v5016_v44 = vpop.eup %5015 }
0x2af1   :  { %3496 = vrot.lane.b32.xlu0 %v5016_v44, %s5107_s5  ;;  %v4780_v44 = vld [vmem:[#allocation2 + $0x208] sm:$0xff]  }
0x2afd   :  { %v3558_v45 = vpop.f32.mrf.mxu0 }
0x2afe   :  { %v3559_v63 = vadd.f32 %v5052_v47, %v3558_v45  ;;  %v4781_v45 = vld [vmem:[#allocation2 + $0x200] sm:$0xff]  }
0x2aff   :  { %v4631_v49 = vpop.f32.mrf.mxu0 }
0x2b00   :  { %5017 = vtanh.f32 %v3559_v63  ;;  %v4087_v61 = vmul.f32 -1.442695, %v3559_v63  ;;  %v4768_v49 = vld [vmem:[#allocation2 + $0x1e8] sm:$0xff]  }
0x2b01   :  { %v3561_v42 = vpop.f32.mrf.mxu0  ;;  %5019 = vpow2.f32 %v4085_v48  ;;  %v4772_v48 = vld [vmem:[#allocation2 + $0x1c8] sm:$0xff]  }
0x2b02   :  { %v4769_v42 = vld [vmem:[#allocation2 + $0x1e0] sm:$0xff]  }
0x2b03   :  { %v4632_v50 = vpop.f32.mrf.mxu0 }
0x2b04   :  { %v4770_v50 = vld [vmem:[#allocation2 + $0x1d8] sm:$0xff]  }
0x2b0d   :  { %v5018_v6 = vpop.eup %5017 }
0x2b0e   :  { %3573 = vrot.lane.b32.xlu1 %v5018_v6, %s5107_s5  ;;  %v5020_v51 = vpop.eup %5019  ;;  %v4771_v6 = vld [vmem:[#allocation2 + $0x1d0] sm:$0xff]  }
0x2b0f   :  { %v3490_v26 = vadd.f32 1.0, %v5020_v51  ;;  %v4773_v51 = vld [vmem:[#allocation2 + $0x1c0] sm:$0xff]  }
0x2b11   :  { %5021 = vrcp.f32 %v3490_v26  ;;  %v4774_v26 = vld [vmem:[#allocation2 + $0x1b8] sm:$0xff]  }
0x2b12   :  { %5023 = vpow2.f32 %v4087_v61  ;;  %v1031_v61 = vmax.f32 %v5336_v46, 0.0 }
0x2b1e   :  { %v5022_v25 = vpop.eup %5021 }
0x2b1f   :  { %v5024_v1 = vpop.eup %5023  ;;  %v3494_v59 = vmul.f32 %v5022_v25, %v5912_v29 }
0x2b20   :  { %v3567_v0 = vadd.f32 1.0, %v5024_v1 }
0x2b22   :  { %5025 = vrcp.f32 %v3567_v0 }
0x2b2f   :  { %v5026_v24 = vpop.eup %5025 }
0x2b30   :  { %v3571_v35 = vmul.f32 %v5026_v24, %v5917_v60 }
0x2b63   :  { %v3497_v54 = vpop.permute.xlu0 %3496 }
0x2b64   :  { %v3499_v9 = vmul.f32 %v5022_v25, %v3497_v54  ;;  %v4782_v54 = vld [vmem:[#allocation2 + $0x1f8] sm:$0xff]  }
0x2b66   :  { %3501 = vrot.lane.b32.xlu0 %v3499_v9, %s5107_s5  ;;  %v4090_v9 = vld [vmem:[%s5989_s2 + $0x5] ss:$0 sm:$0xff] }
0x2b80   :  { %v3574_v2 = vpop.permute.xlu1 %3573 }
0x2b81   :  { %v3576_v55 = vmul.f32 %v5026_v24, %v3574_v2 }
0x2b83   :  { %3578 = vrot.lane.b32.xlu1 %v3576_v55, %s5107_s5 }
0x2bd8   :  { %v3502_v7 = vpop.permute.xlu0 %3501 }
0x2bd9   :  { %v3504_v3 = vadd.f32 %v3502_v7, %v3494_v59 }
0x2bdb   :  { %5027 = vtanh.f32 %v3504_v3 }
0x2be8   :  { %v5028_v4 = vpop.eup %5027 }
0x2be9   :  { %3507 = vrot.lane.b32.xlu0 %v5028_v4, %s5107_s5 }
0x2bf5   :  { %v3579_v8 = vpop.permute.xlu1 %3578 }
0x2bf6   :  { %v3581_v12 = vadd.f32 %v3579_v8, %v3571_v35  ;;  %v4110_v35 = vld [vmem:[%s5989_s2 + $0x6] ss:$0 sm:$0xff] }
0x2bf8   :  { %5029 = vtanh.f32 %v3581_v12 }
0x2c05   :  { %v5030_v53 = vpop.eup %5029 }
0x2c06   :  { %3584 = vrot.lane.b32.xlu1 %v5030_v53, %s5107_s5 }
0x2c5b   :  { %v3508_v13 = vpop.permute.xlu0 %3507 }
0x2c5c   :  { %v3510_v56 = vmul.f32 %v5022_v25, %v3508_v13  ;;  %v3733_v25 = vpack.c.bf16 %v1031_v61, %v1031_v61 }
0x2c5e   :  { %3589 = vrot.lane.b32.xlu0 %v3510_v56, %s5098_s15 }
0x2c78   :  { %v3585_v15 = vpop.permute.xlu1 %3584 }
0x2c79   :  { %v3587_v62 = vmul.f32 %v5026_v24, %v3585_v15 }
0x2c7b   :  { %3593 = vrot.lane.b32.xlu1 %v3587_v62, %s5108_s10 }
0x2cd0   :  { %v3590_v16 = vpop.permute.xlu0 %3589 }
0x2ced   :  { %v3594_v17 = vpop.permute.xlu1 %3593 }
0x2cee   :  { %v3596_v18 = vsel %vm1260_vm1, %v3590_v16, %v3594_v17 }
0x2cef   :  { %v3597_v52 = vpack.c.bf16 %v3596_v18, %v3596_v18 }
0x2cf1   :  { %4642 = vmatmul.mubr.msk.bf16.vlgmr.msra.gmra.mxu1 %vm387_vm12, %v3597_v52 }
0x2cf2   :  { %4669 = vmatprep.mubr.msk.bf16.mxu1 %vm5104_vm14, %v5103_v33  ;;  %4654 = vmatpush3.bf16.msra.mxu1 %v4775_v10 }
0x2cf3   :  { %4655 = vmatprep.subr.bf16.mxu1 %v5103_v33 }
0x2cf6   :  { %4656 = vmatpush3.bf16.msra.mxu1 %v4776_v14 }
0x2cf7   :  { %4657 = vmatprep.subr.bf16.mxu1 %v5103_v33 }
0x2cfa   :  { %4658 = vmatpush3.bf16.msra.mxu1 %v4777_v40 }
0x2cfb   :  { %4659 = vmatprep.subr.bf16.mxu1 %v5103_v33 }
0x2cfe   :  { %4660 = vmatpush3.bf16.msra.mxu1 %v4778_v41 }
0x2cff   :  { %4661 = vmatprep.subr.bf16.mxu1 %v5103_v33 }
0x2d02   :  { %4662 = vmatpush3.bf16.msra.mxu1 %v4779_v43 }
0x2d03   :  { %4663 = vmatprep.subr.bf16.mxu1 %v5103_v33 }
0x2d06   :  { %4664 = vmatpush3.bf16.msra.mxu1 %v4780_v44 }
0x2d07   :  { %4665 = vmatprep.subr.bf16.mxu1 %v5103_v33 }
0x2d0a   :  { %4666 = vmatpush3.bf16.msra.mxu1 %v4781_v45 }
0x2d0b   :  { %4667 = vmatprep.subr.bf16.mxu1 %v5103_v33 }
0x2d0e   :  { %4668 = vmatpush3.bf16.msra.mxu1 %v4782_v54 }
0x2db1   :  { %v3635_v29 = vpop.f32.mrf.mxu1 }
0x2db2   :  { %v3636_v57 = vadd.f32 %v5052_v47, %v3635_v29  ;;  %v4767_v47 = vld [vmem:[#allocation2 + $0x1f0] sm:$0xff]  }
0x2db3   :  { %v4643_v34 = vpop.f32.mrf.mxu1 }
0x2db4   :  { %5031 = vtanh.f32 %v3636_v57  ;;  %v4089_v11 = vmul.f32 -1.442695, %v3636_v57 }
0x2db5   :  { %v3638_v58 = vpop.f32.mrf.mxu1 }
0x2db6   :  { %5033 = vpow2.f32 %v4089_v11 }
0x2db7   :  { %v4644_v60 = vpop.f32.mrf.mxu1 }
0x2dc1   :  { %v5032_v5 = vpop.eup %5031 }
0x2dc2   :  { %3650 = vrot.lane.b32.xlu0 %v5032_v5, %s5107_s5 }
0x2dc3   :  { %v5034_v19 = vpop.eup %5033 }
0x2dc4   :  { %v3644_v20 = vadd.f32 1.0, %v5034_v19 }
0x2dc6   :  { %5035 = vrcp.f32 %v3644_v20 }
0x2dd3   :  { %v5036_v21 = vpop.eup %5035 }
0x2dd4   :  { %v3648_v32 = vmul.f32 %v5036_v21, %v3581_v12 }
0x2e34   :  { %v3651_v22 = vpop.permute.xlu0 %3650 }
0x2e35   :  { %v3653_v27 = vmul.f32 %v5036_v21, %v3651_v22 }
0x2e37   :  { %3655 = vrot.lane.b32.xlu1 %v3653_v27, %s5107_s5 }
0x2ea9   :  { %v3656_v28 = vpop.permute.xlu1 %3655 }
0x2eaa   :  { %v3658_v30 = vadd.f32 %v3656_v28, %v3648_v32 }
0x2eac   :  { %5037 = vtanh.f32 %v3658_v30 }
0x2eb9   :  { %v5038_v37 = vpop.eup %5037 }
0x2eba   :  { %3661 = vrot.lane.b32.xlu0 %v5038_v37, %s5107_s5 }
0x2f2c   :  { %v3662_v38 = vpop.permute.xlu0 %3661 }
0x2f2d   :  { %v3664_v39 = vmul.f32 %v5036_v21, %v3662_v38 }
0x2f2f   :  { %v3665_v23 = vpack.c.bf16 %v3664_v39, %v3664_v39 }
0x2f31   :  { %3676 = vrot.lane.b32.xlu1 %v3665_v23, %s5098_s15 }
0x2fa3   :  { %v3677_v63 = vpop.permute.xlu1 %3676 }
0x2fa4   :  { %4650 = vmatmul.mubr.msk.bf16.vlgmr.msra.gmra.mxu0 %vm1260_vm1, %v3677_v63 }
0x2fa5   :  { %4674 = vmatpush3.bf16.msra.mxu0 %v4767_v47  ;;  %4689 = vmatprep.mubr.msk.bf16.mxu0 %vm5104_vm14, %v5103_v33 }
0x2fa6   :  { %4675 = vmatprep.subr.bf16.mxu0 %v5103_v33 }
0x2fa9   :  { %4676 = vmatpush3.bf16.msra.mxu0 %v4768_v49 }
0x2faa   :  { %4677 = vmatprep.subr.bf16.mxu0 %v5103_v33 }
0x2fad   :  { %4678 = vmatpush3.bf16.msra.mxu0 %v4769_v42 }
0x2fae   :  { %4679 = vmatprep.subr.bf16.mxu0 %v5103_v33 }
0x2fb1   :  { %4680 = vmatpush3.bf16.msra.mxu0 %v4770_v50 }
0x2fb2   :  { %4681 = vmatprep.subr.bf16.mxu0 %v5103_v33 }
0x2fb5   :  { %4682 = vmatpush3.bf16.msra.mxu0 %v4771_v6 }
0x2fb6   :  { %4683 = vmatprep.subr.bf16.mxu0 %v5103_v33 }
0x2fb9   :  { %4684 = vmatpush3.bf16.msra.mxu0 %v4772_v48 }
0x2fba   :  { %4685 = vmatprep.subr.bf16.mxu0 %v5103_v33 }
0x2fbd   :  { %4686 = vmatpush3.bf16.msra.mxu0 %v4773_v51 }
0x2fbe   :  { %4687 = vmatprep.subr.bf16.mxu0 %v5103_v33 }
0x2fc1   :  { %4688 = vmatpush3.bf16.msra.mxu0 %v4774_v26 }
0x2fc4   :  { %4690 = vmatmul.mubr.bf16.vlgmr.msra.gmra.mxu0 %v3733_v25 }
0x3064   :  { %v3727_v1 = vpop.f32.mrf.mxu0 }
0x3065   :  { %v3728_v0 = vadd.f32 %v4090_v9, %v3727_v1 }
0x3066   :  { %v4651_v24 = vpop.f32.mrf.mxu0 }
0x3067   :  { %v3750_v2 = vpack.c.bf16 %v3728_v0, %v3728_v0 }
0x3068   :  { %v3730_v55 = vpop.f32.mrf.mxu0 }
0x3069   :  { %4670 = vmatmul.mubr.bf16.vlgmr.msra.gmra.mxu1 %v3750_v2 }
0x306a   :  { %v4652_v59 = vpop.f32.mrf.mxu0 }
0x3084   :  { %v3937_v7 = vpop.f32.mrf.mxu0 }
0x3086   :  { %v4691_v46 = vpop.f32.mrf.mxu0 }
0x3088   :  { %v3940_v3 = vpop.f32.mrf.mxu0 }
0x308a   :  { %v4692_v33 = vpop.f32.mrf.mxu0 }
0x3129   :  { %v3849_v4 = vpop.f32.mrf.mxu1 }
0x312a   :  { %v3938_v8 = vadd.f32 %v3937_v7, %v3849_v4 }
0x312b   :  { %v4671_v12 = vpop.f32.mrf.mxu1 }
0x312c   :  { %v3948_v53 = vadd.f32 %v4110_v35, %v3938_v8 }
0x312d   :  { %v3852_v13 = vpop.f32.mrf.mxu1 }
0x312e   :  { %3949 = vst [vmem:[#allocation5] sm:$0x3] %v3948_v53 }
0x312f   :  { %v4672_v56 = vpop.f32.mrf.mxu1 }
0x3130   :  { %5084 = shalt.err (!%p5081_p9)
}
0x3131   :  { %3959 = dma.vmem_to_hbm [thread:$0]  %s3957_s20, 32, %s5990_s3, [#allocation4]  }
0x3132   :  { %5095 = dma.done.wait [#allocation4], 32  }
0x3133   :  { %5096 = vsyncadd [#allocation4], 4294967264 }
0x3134   :  { %3963 = vsyncpa [#allocation3], 1 }
0x3135   :  { %3964 = vsyncpa [#allocation4], 1 }

</bundles_post_ra>
